<compile_context>
chip_gen: v7x
topology: tpu7x:2x2x1
jax: 0.10.0
libtpu: 0.0.40
codegen_flags: <defaults>
</compile_context>

<pallas_src>
import functools

import jax
import jax.numpy as jnp
from jax.experimental import pallas as pl
from jax.experimental.pallas import tpu as pltpu

LATENT = 100
H1 = 256
H2 = 512
OUT = 28 * 28          # 784
OUT_PAD = 896          # 7 * 128 — lane-dense padded output width


def _generator_kernel(x_ref, w1_ref, b1_ref, w2_ref, b2_ref, w3_ref, b3_ref,
                      o_ref):
    """Fused 3-layer MLP: (Linear+ReLU) -> (Linear+ReLU) -> (Linear+Tanh).

    x/weights arrive as bf16; all matmuls accumulate in f32 on the MXU and the
    epilogue (bias add, ReLU, tanh) is done in f32.
    """
    x = x_ref[...]                                               # (bm, 100) bf16

    # Layer 1: Linear(100 -> 256) + ReLU
    h1 = jnp.dot(x, w1_ref[...], preferred_element_type=jnp.float32)
    h1 = jnp.maximum(h1 + b1_ref[...], 0.0)                      # (bm, 256) f32

    # Layer 2: Linear(256 -> 512) + ReLU
    h2 = jnp.dot(h1.astype(jnp.bfloat16), w2_ref[...],
                 preferred_element_type=jnp.float32)
    h2 = jnp.maximum(h2 + b2_ref[...], 0.0)                      # (bm, 512) f32

    # Layer 3: Linear(512 -> 896[pad of 784]) + Tanh
    h3 = jnp.dot(h2.astype(jnp.bfloat16), w3_ref[...],
                 preferred_element_type=jnp.float32)
    o_ref[...] = jnp.tanh(h3 + b3_ref[...]).astype(o_ref.dtype)  # (bm, 896) f32


@functools.partial(jax.jit, static_argnames=("block_m",))
def generator_forward(x, w1, b1, w2, b2, w3, b3, *, block_m=256):
    """x: (B, 100) float32  ->  (B, 28, 28) float32."""
    B = x.shape[0]
    grid_m = pl.cdiv(B, block_m)
    b_pad = grid_m * block_m

    # Pad batch remainder with zero rows; pad last layer to OUT_PAD columns.
    x_p = jnp.pad(x, ((0, b_pad - B), (0, 0))).astype(jnp.bfloat16)
    w3_p = jnp.pad(w3, ((0, 0), (0, OUT_PAD - OUT)))
    b3_p = jnp.pad(b3, ((0, 0), (0, OUT_PAD - OUT)))

    # bf16 dot operands (f32 accumulation happens inside the kernel).
    w1_b = w1.astype(jnp.bfloat16)
    w2_b = w2.astype(jnp.bfloat16)
    w3_b = w3_p.astype(jnp.bfloat16)

    flat = pl.pallas_call(
        _generator_kernel,
        out_shape=jax.ShapeDtypeStruct((b_pad, OUT_PAD), jnp.float32),
        grid_spec=pltpu.PrefetchScalarGridSpec(
            num_scalar_prefetch=0,
            grid=(grid_m,),
            in_specs=[
                # batch tile of latents
                pl.BlockSpec((block_m, LATENT), lambda i: (i, 0)),
                # weights / biases: full arrays, resident across the grid
                pl.BlockSpec((LATENT, H1), lambda i: (0, 0)),
                pl.BlockSpec((1, H1), lambda i: (0, 0)),
                pl.BlockSpec((H1, H2), lambda i: (0, 0)),
                pl.BlockSpec((1, H2), lambda i: (0, 0)),
                pl.BlockSpec((H2, OUT_PAD), lambda i: (0, 0)),
                pl.BlockSpec((1, OUT_PAD), lambda i: (0, 0)),
            ],
            out_specs=pl.BlockSpec((block_m, OUT_PAD), lambda i: (i, 0)),
        ),
        compiler_params=pltpu.CompilerParams(
            dimension_semantics=("parallel",)),
    )(x_p, w1_b, b1, w2_b, b2, w3_b, b3_p)

    return flat[:B, :OUT].reshape(-1, 28, 28)


def init_params(key):
    """Deterministic init mirroring PyTorch nn.Linear default:
    U(-1/sqrt(fan_in), 1/sqrt(fan_in)) for both weight and bias.
    Weights are stored as (in_features, out_features)."""
    ks = jax.random.split(key, 6)

    def lin(kw, kb, fan_in, fan_out):
        bound = 1.0 / jnp.sqrt(fan_in)
        w = jax.random.uniform(kw, (fan_in, fan_out), jnp.float32,
                               -bound, bound)
        b = jax.random.uniform(kb, (1, fan_out), jnp.float32, -bound, bound)
        return w, b

    w1, b1 = lin(ks[0], ks[1], LATENT, H1)
    w2, b2 = lin(ks[2], ks[3], H1, H2)
    w3, b3 = lin(ks[4], ks[5], H2, OUT)
    return w1, b1, w2, b2, w3, b3


def _reference(x, w1, b1, w2, b2, w3, b3):
    """Plain-JAX reference with the same bf16-operand / f32-accumulate math."""
    h = jnp.dot(x.astype(jnp.bfloat16), w1.astype(jnp.bfloat16),
                preferred_element_type=jnp.float32)
    h = jnp.maximum(h + b1, 0.0)
    h = jnp.dot(h.astype(jnp.bfloat16), w2.astype(jnp.bfloat16),
                preferred_element_type=jnp.float32)
    h = jnp.maximum(h + b2, 0.0)
    h = jnp.dot(h.astype(jnp.bfloat16), w3.astype(jnp.bfloat16),
                preferred_element_type=jnp.float32)
    return jnp.tanh(h + b3).reshape(-1, 28, 28)


if __name__ == "__main__":
    key = jax.random.PRNGKey(0)
    k_params, k_x = jax.random.split(key)

    params = init_params(k_params)

    # Non-multiple batch so the padding path + multi-step grid (2 steps with
    # block_m=256 -> weight residency across grid iterations) are exercised.
    B = 300
    x = jax.random.normal(k_x, (B, LATENT), jnp.float32)

    img = generator_forward(x, *params)
    jax.block_until_ready(img)

    ref = _reference(x, *params)

    assert img.shape == (B, 28, 28), img.shape
    assert jnp.allclose(img, ref, atol=2e-3, rtol=2e-3), \
        float(jnp.max(jnp.abs(img - ref)))
    print("KERNEL_OK")
</pallas_src>

<mosaic_0001>
module attributes {stable_mosaic.version = 11 : i64} {
  func.func @_generator_kernel(%arg0: i32, %arg1: memref<256x100xbf16, #tpu.memory_space<vmem>>, %arg2: memref<100x256xbf16, #tpu.memory_space<vmem>>, %arg3: memref<1x256xf32, #tpu.memory_space<vmem>>, %arg4: memref<256x512xbf16, #tpu.memory_space<vmem>>, %arg5: memref<1x512xf32, #tpu.memory_space<vmem>>, %arg6: memref<512x896xbf16, #tpu.memory_space<vmem>>, %arg7: memref<1x896xf32, #tpu.memory_space<vmem>>, %arg8: memref<256x896xf32, #tpu.memory_space<vmem>>) attributes {dimension_semantics = [#tpu.dimension_semantics<parallel>], iteration_bounds = array<i64: 2>, scalar_prefetch = 0 : i64, scratch_operands = 0 : i64, tpu.core_type = #tpu.core_type<tc>, window_params = [{transform_indices = @transform_0, window_bounds = array<i64: 256, 100>}, {pipeline_mode = #tpu.pipeline_mode<synchronous>, transform_indices = @transform_1, window_bounds = array<i64: 100, 256>}, {pipeline_mode = #tpu.pipeline_mode<synchronous>, transform_indices = @transform_2, window_bounds = array<i64: 1, 256>}, {pipeline_mode = #tpu.pipeline_mode<synchronous>, transform_indices = @transform_3, window_bounds = array<i64: 256, 512>}, {pipeline_mode = #tpu.pipeline_mode<synchronous>, transform_indices = @transform_4, window_bounds = array<i64: 1, 512>}, {pipeline_mode = #tpu.pipeline_mode<synchronous>, transform_indices = @transform_5, window_bounds = array<i64: 512, 896>}, {pipeline_mode = #tpu.pipeline_mode<synchronous>, transform_indices = @transform_6, window_bounds = array<i64: 1, 896>}, {transform_indices = @transform_7, window_bounds = array<i64: 256, 896>}]} {
    %c0 = arith.constant 0 : index
    %c0_0 = arith.constant 0 : index
    %0 = vector.load %arg1[%c0, %c0_0] : memref<256x100xbf16, #tpu.memory_space<vmem>>, vector<256x100xbf16>
    %c0_1 = arith.constant 0 : index
    %c0_2 = arith.constant 0 : index
    %1 = vector.load %arg2[%c0_1, %c0_2] : memref<100x256xbf16, #tpu.memory_space<vmem>>, vector<100x256xbf16>
    %cst = arith.constant dense<0.000000e+00> : vector<256x256xf32>
    %2 = tpu.matmul %0, %1, %cst {dimension_numbers = #tpu.dot_dimension_numbers<[1], [0], [0], [1], [0, 0, 1, 1], [], []>} : vector<256x100xbf16>, vector<100x256xbf16>, vector<256x256xf32> -> vector<256x256xf32>
    %c0_3 = arith.constant 0 : index
    %c0_4 = arith.constant 0 : index
    %3 = vector.load %arg3[%c0_3, %c0_4] : memref<1x256xf32, #tpu.memory_space<vmem>>, vector<1x256xf32>
    %4 = vector.broadcast %3 : vector<1x256xf32> to vector<256x256xf32>
    %5 = arith.addf %2, %4 : vector<256x256xf32>
    %cst_5 = arith.constant 0.000000e+00 : f32
    %6 = vector.broadcast %cst_5 : f32 to vector<256x256xf32>
    %7 = arith.maximumf %5, %6 : vector<256x256xf32>
    %8 = arith.truncf %7 : vector<256x256xf32> to vector<256x256xbf16>
    %c0_6 = arith.constant 0 : index
    %c0_7 = arith.constant 0 : index
    %9 = vector.load %arg4[%c0_6, %c0_7] : memref<256x512xbf16, #tpu.memory_space<vmem>>, vector<256x512xbf16>
    %cst_8 = arith.constant dense<0.000000e+00> : vector<256x512xf32>
    %10 = tpu.matmul %8, %9, %cst_8 {dimension_numbers = #tpu.dot_dimension_numbers<[1], [0], [0], [1], [0, 0, 1, 1], [], []>} : vector<256x256xbf16>, vector<256x512xbf16>, vector<256x512xf32> -> vector<256x512xf32>
    %c0_9 = arith.constant 0 : index
    %c0_10 = arith.constant 0 : index
    %11 = vector.load %arg5[%c0_9, %c0_10] : memref<1x512xf32, #tpu.memory_space<vmem>>, vector<1x512xf32>
    %12 = vector.broadcast %11 : vector<1x512xf32> to vector<256x512xf32>
    %13 = arith.addf %10, %12 : vector<256x512xf32>
    %cst_11 = arith.constant 0.000000e+00 : f32
    %14 = vector.broadcast %cst_11 : f32 to vector<256x512xf32>
    %15 = arith.maximumf %13, %14 : vector<256x512xf32>
    %16 = arith.truncf %15 : vector<256x512xf32> to vector<256x512xbf16>
    %c0_12 = arith.constant 0 : index
    %c0_13 = arith.constant 0 : index
    %17 = vector.load %arg6[%c0_12, %c0_13] : memref<512x896xbf16, #tpu.memory_space<vmem>>, vector<512x896xbf16>
    %cst_14 = arith.constant dense<0.000000e+00> : vector<256x896xf32>
    %18 = tpu.matmul %16, %17, %cst_14 {dimension_numbers = #tpu.dot_dimension_numbers<[1], [0], [0], [1], [0, 0, 1, 1], [], []>} : vector<256x512xbf16>, vector<512x896xbf16>, vector<256x896xf32> -> vector<256x896xf32>
    %c0_15 = arith.constant 0 : index
    %c0_16 = arith.constant 0 : index
    %19 = vector.load %arg7[%c0_15, %c0_16] : memref<1x896xf32, #tpu.memory_space<vmem>>, vector<1x896xf32>
    %20 = vector.broadcast %19 : vector<1x896xf32> to vector<256x896xf32>
    %21 = arith.addf %18, %20 : vector<256x896xf32>
    %22 = math.tanh %21 : vector<256x896xf32>
    %c0_17 = arith.constant 0 : index
    %c0_18 = arith.constant 0 : index
    %23 = vector.load %arg8[%c0_17, %c0_18] : memref<256x896xf32, #tpu.memory_space<vmem>>, vector<256x896xf32>
    tpu.vector_store %arg8[%c0_17, %c0_18], %22 {strides = array<i32>} : memref<256x896xf32, #tpu.memory_space<vmem>>, vector<256x896xf32>,
    return
  }
  func.func @transform_0(%arg0: i32) -> (i32, i32) {
    %c0_i32 = arith.constant 0 : i32
    %c0_i32_0 = arith.constant 0 : i32
    return %arg0, %c0_i32 : i32, i32
  }
  func.func @transform_1(%arg0: i32) -> (i32, i32) {
    %c0_i32 = arith.constant 0 : i32
    %c0_i32_0 = arith.constant 0 : i32
    %c0_i32_1 = arith.constant 0 : i32
    return %c0_i32, %c0_i32_0 : i32, i32
  }
  func.func @transform_2(%arg0: i32) -> (i32, i32) {
    %c0_i32 = arith.constant 0 : i32
    %c0_i32_0 = arith.constant 0 : i32
    %c0_i32_1 = arith.constant 0 : i32
    return %c0_i32, %c0_i32_0 : i32, i32
  }
  func.func @transform_3(%arg0: i32) -> (i32, i32) {
    %c0_i32 = arith.constant 0 : i32
    %c0_i32_0 = arith.constant 0 : i32
    %c0_i32_1 = arith.constant 0 : i32
    return %c0_i32, %c0_i32_0 : i32, i32
  }
  func.func @transform_4(%arg0: i32) -> (i32, i32) {
    %c0_i32 = arith.constant 0 : i32
    %c0_i32_0 = arith.constant 0 : i32
    %c0_i32_1 = arith.constant 0 : i32
    return %c0_i32, %c0_i32_0 : i32, i32
  }
  func.func @transform_5(%arg0: i32) -> (i32, i32) {
    %c0_i32 = arith.constant 0 : i32
    %c0_i32_0 = arith.constant 0 : i32
    %c0_i32_1 = arith.constant 0 : i32
    return %c0_i32, %c0_i32_0 : i32, i32
  }
  func.func @transform_6(%arg0: i32) -> (i32, i32) {
    %c0_i32 = arith.constant 0 : i32
    %c0_i32_0 = arith.constant 0 : i32
    %c0_i32_1 = arith.constant 0 : i32
    return %c0_i32, %c0_i32_0 : i32, i32
  }
  func.func @transform_7(%arg0: i32) -> (i32, i32) {
    %c0_i32 = arith.constant 0 : i32
    %c0_i32_0 = arith.constant 0 : i32
    return %arg0, %c0_i32 : i32, i32
  }
}

</mosaic_0001>

<bundles_post_ra>
// kernel: generator_forward.1
= control target key start
LH: loop header
LB: loop body
LE: loop exit
PB: predicated region body
PF: predicated region fallthrough
CT: control target
= control target key end

     0   :  { %s7175_s24 = smov 0   ;;  %s9392_s0 = inlined_call_operand.vmem [shape: bf16[512,100], index: 0, kind: input, shape index: {}]   ;;  %s9393_s1 = inlined_call_operand.vmem [shape: bf16[100,256], index: 1, kind: input, shape index: {}]   ;;  %s9394_s2 = inlined_call_operand.vmem [shape: f32[1,256], index: 2, kind: input, shape index: {}]   ;;  %s9395_s3 = inlined_call_operand.vmem [shape: bf16[256,512], index: 3, kind: input, shape index: {}]   ;;  %s9396_s4 = inlined_call_operand.vmem [shape: f32[1,512], index: 4, kind: input, shape index: {}]   ;;  %s9397_s5 = inlined_call_operand.vmem [shape: bf16[512,896], index: 5, kind: input, shape index: {}]   ;;  %s9398_s6 = inlined_call_operand.vmem [shape: f32[1,896], index: 6, kind: input, shape index: {}]   ;;  %s9399_s7 = inlined_call_operand.vmem [shape: f32[512,896], index: 7, kind: output, shape index: {}]  }
   0x1 LB: > { %s5247_s25 = sadd.s32 4294967295, %s7132_s24   ;;  %p5251_p0 = scmp.ge.s32.totalorder %s7132_s24, 1  ;;  %s7132_s24 = sphi %s7175_s24, %s17_s24  }
   0x2   : > { %p238_p1 = scmp.lt.s32.totalorder %s7132_s24, 3 }
   0x4   : > { %p239_p2 = pnand %p5251_p0, %p238_p1 }
   0x6   : > { %242 = sbr.rel (%p239_p2) target bundleno = 1224 (0x4c8), region = 48 }
   0xd   : > { %v6225_v0 = vld [vmem:[%s9393_s1 + $0x4] ss:$8 sps:$4 sm:$0xff]   ;;  %v6227_v1 = vld [vmem:[%s9393_s1] ss:$8 sps:$4 sm:$0xff]   ;;  %v7134_v2 = vmov 0   ;;  %s5252_s30 = sshll.u32 %s5247_s25, 5 }
   0xe   : > { %575 = vmatprep.mubr.bf16.mxu0 %v7134_v2  ;;  %655 = vmatprep.mubr.bf16.mxu1 %v7134_v2  ;;  %v6228_v3 = vld [vmem:[%s9393_s1 + $0x14] ss:$8 sps:$4 sm:$0xff]   ;;  %p272_p3 = scmp.lt.s32.totalorder %s5252_s30, 63  ;;  %v6230_v4 = vld [vmem:[%s9393_s1 + $0x10] ss:$8 sps:$4 sm:$0xff]   ;;  %vm536_vm0 = vcmask 1041408  }
   0xf   : > { %543 = vmatprep.subr.bf16.mxu0 %v6225_v0  ;;  %5817 = vmatprep.subr.bf16.mxu1 %v6225_v0  ;;  %v6231_v5 = vld [vmem:[%s9393_s1 + $0x24] ss:$8 sps:$4 sm:$0xff]   ;;  %v6233_v6 = vld [vmem:[%s9393_s1 + $0x20] ss:$8 sps:$4 sm:$0xff]   ;;  %v6234_v7 = vld [vmem:[%s9393_s1 + $0x34] ss:$8 sps:$4 sm:$0xff]  }
  0x10   : > { %544 = vmatpush1.bf16.msra.mxu0 %v6227_v1  ;;  %5824 = vmatpush1.bf16.msra.mxu1 %v6227_v1  ;;  %s9495_s30 = smov (!%p272_p3, %s5252_s30), 63  ;;  %v6236_v8 = vld [vmem:[%s9393_s1 + $0x30] ss:$8 sps:$4 sm:$0xff]   ;;  %v6237_v9 = vld [vmem:[%s9393_s1 + $0x44] ss:$8 sps:$4 sm:$0xff]   ;;  %vm487_vm1 = vcmask 818176  }
  0x11   : > { %545 = vmatprep.subr.bf16.mxu0 %v6228_v3  ;;  %5818 = vmatprep.subr.bf16.mxu1 %v6228_v3  ;;  %s5253_s14 = sshll.u32 %s9495_s30, 2  ;;  %v6239_v10 = vld [vmem:[%s9393_s1 + $0x40] ss:$8 sps:$4 sm:$0xff]   ;;  %v6240_v11 = vld [vmem:[%s9393_s1 + $0x54] ss:$8 sps:$4 sm:$0xff]   ;;  %s6215_s12 = smul.u32 56, %s9495_s30 }
  0x12   : > { %s7209_s19 = scalar_lea.vmem %s9392_s0, %s5253_s14  ;;  %v329_v12 = vld [vmem:[%s9393_s1 + $0x60] sm:$0x33]  ;;  %v6242_v13 = vld [vmem:[%s9393_s1 + $0x50] ss:$8 sps:$4 sm:$0xff]   ;;  %v6266_v20 = vld [vmem:[%s9395_s3 + $0xc] ss:$16 sps:$4 sm:$0xff]  }
  0x13   : > { %v5285_v14 = vcombine.high %v329_v12, %v329_v12  ;;  %v5284_v15 = vcombine.low %v329_v12, %v329_v12  ;;  %v6245_v17 = vld [vmem:[%s7209_s19] sm:$0xff]   ;;  %v6264_v22 = vld [vmem:[%s9395_s3 + $0x8] ss:$16 sps:$4 sm:$0xff]   ;;  %v6272_v24 = vld [vmem:[%s9395_s3 + $0x2c] ss:$16 sps:$4 sm:$0xff]   ;;  %s8765_s14 = scalar_lea.vmem %s9399_s7, %s6215_s12 }
  0x14   : > { %546 = vmatpush1.bf16.msra.mxu0 %v6230_v4  ;;  %5825 = vmatpush1.bf16.msra.mxu1 %v6230_v4  ;;  %v6263_v18 = vld [vmem:[%s9395_s3 + $0x4] ss:$16 sps:$4 sm:$0xff]   ;;  %v6261_v21 = vld [vmem:[%s9395_s3] ss:$16 sps:$4 sm:$0xff]   ;;  %v6270_v26 = vld [vmem:[%s9395_s3 + $0x28] ss:$16 sps:$4 sm:$0xff]  }
  0x15   : > { %547 = vmatprep.subr.bf16.mxu0 %v6231_v5  ;;  %5819 = vmatprep.subr.bf16.mxu1 %v6231_v5  ;;  %v538_v16 = vsel %vm536_vm0, %v5284_v15, 0  ;;  %v6253_v19 = vld [vmem:[%s7209_s19 + $0x40] sm:$0xff]   ;;  %v6278_v28 = vld [vmem:[%s9395_s3 + $0x4c] ss:$16 sps:$4 sm:$0xff]   ;;  %v6276_v32 = vld [vmem:[%s9395_s3 + $0x48] ss:$16 sps:$4 sm:$0xff]  }
  0x16   : > { %v6269_v23 = vld [vmem:[%s9395_s3 + $0x24] ss:$16 sps:$4 sm:$0xff]   ;;  %v6267_v25 = vld [vmem:[%s9395_s3 + $0x20] ss:$16 sps:$4 sm:$0xff]   ;;  %v6246_v29 = vld [vmem:[%s7209_s19 + $0x8] sm:$0xff]  }
  0x17   : > { %v6275_v27 = vld [vmem:[%s9395_s3 + $0x44] ss:$16 sps:$4 sm:$0xff]   ;;  %v6254_v30 = vld [vmem:[%s7209_s19 + $0x48] sm:$0xff]   ;;  %v6273_v31 = vld [vmem:[%s9395_s3 + $0x40] ss:$16 sps:$4 sm:$0xff]  }
  0x18   : > { %548 = vmatpush1.bf16.msra.mxu0 %v6233_v6  ;;  %5826 = vmatpush1.bf16.msra.mxu1 %v6233_v6  ;;  %v6281_v33 = vld [vmem:[%s9395_s3 + $0x64] ss:$16 sps:$4 sm:$0xff]   ;;  %v6284_v34 = vld [vmem:[%s9395_s3 + $0x6c] ss:$16 sps:$4 sm:$0xff]   ;;  %v6279_v35 = vld [vmem:[%s9395_s3 + $0x60] ss:$16 sps:$4 sm:$0xff]  }
  0x19   : > { %549 = vmatprep.subr.bf16.mxu0 %v6234_v7  ;;  %5820 = vmatprep.subr.bf16.mxu1 %v6234_v7  ;;  %v6282_v36 = vld [vmem:[%s9395_s3 + $0x68] ss:$16 sps:$4 sm:$0xff]   ;;  %v6287_v37 = vld [vmem:[%s9395_s3 + $0x84] ss:$16 sps:$4 sm:$0xff]   ;;  %v6290_v38 = vld [vmem:[%s9395_s3 + $0x8c] ss:$16 sps:$4 sm:$0xff]  }
  0x1a   : > { %v6247_v39 = vld [vmem:[%s7209_s19 + $0x10] sm:$0xff]   ;;  %v6288_v42 = vld [vmem:[%s9395_s3 + $0x88] ss:$16 sps:$4 sm:$0xff]   ;;  %v6296_v44 = vld [vmem:[%s9395_s3 + $0xac] ss:$16 sps:$4 sm:$0xff]  }
  0x1b   : > { %v6255_v40 = vld [vmem:[%s7209_s19 + $0x50] sm:$0xff]   ;;  %v6294_v46 = vld [vmem:[%s9395_s3 + $0xa8] ss:$16 sps:$4 sm:$0xff]   ;;  %v6302_v48 = vld [vmem:[%s9395_s3 + $0xcc] ss:$16 sps:$4 sm:$0xff]  }
  0x1c   : > { %550 = vmatpush1.bf16.msra.mxu0 %v6236_v8  ;;  %5827 = vmatpush1.bf16.msra.mxu1 %v6236_v8  ;;  %v6285_v41 = vld [vmem:[%s9395_s3 + $0x80] ss:$16 sps:$4 sm:$0xff]   ;;  %v6293_v43 = vld [vmem:[%s9395_s3 + $0xa4] ss:$16 sps:$4 sm:$0xff]   ;;  %v6248_v49 = vld [vmem:[%s7209_s19 + $0x18] sm:$0xff]  }
  0x1d   : > { %551 = vmatprep.subr.bf16.mxu0 %v6237_v9  ;;  %5821 = vmatprep.subr.bf16.mxu1 %v6237_v9  ;;  %v6291_v45 = vld [vmem:[%s9395_s3 + $0xa0] ss:$16 sps:$4 sm:$0xff]   ;;  %v6299_v47 = vld [vmem:[%s9395_s3 + $0xc4] ss:$16 sps:$4 sm:$0xff]   ;;  %v6256_v50 = vld [vmem:[%s7209_s19 + $0x58] sm:$0xff]  }
  0x1e   : > { %v6297_v51 = vld [vmem:[%s9395_s3 + $0xc0] ss:$16 sps:$4 sm:$0xff]   ;;  %v6300_v52 = vld [vmem:[%s9395_s3 + $0xc8] ss:$16 sps:$4 sm:$0xff]   ;;  %v6305_v53 = vld [vmem:[%s9395_s3 + $0xe4] ss:$16 sps:$4 sm:$0xff]  }
  0x1f   : > { %v6308_v54 = vld [vmem:[%s9395_s3 + $0xec] ss:$16 sps:$4 sm:$0xff]   ;;  %v6303_v55 = vld [vmem:[%s9395_s3 + $0xe0] ss:$16 sps:$4 sm:$0xff]   ;;  %v6306_v56 = vld [vmem:[%s9395_s3 + $0xe8] ss:$16 sps:$4 sm:$0xff]  }
  0x20   : > { %552 = vmatpush1.bf16.msra.mxu0 %v6239_v10  ;;  %5828 = vmatpush1.bf16.msra.mxu1 %v6239_v10  ;;  %v6311_v57 = vld [vmem:[%s9395_s3 + $0x104] ss:$16 sps:$4 sm:$0xff]   ;;  %v6314_v58 = vld [vmem:[%s9395_s3 + $0x10c] ss:$16 sps:$4 sm:$0xff]   ;;  %v6309_v61 = vld [vmem:[%s9395_s3 + $0x100] ss:$16 sps:$4 sm:$0xff]  }
  0x21   : > { %553 = vmatprep.subr.bf16.mxu0 %v6240_v11  ;;  %5822 = vmatprep.subr.bf16.mxu1 %v6240_v11  ;;  %v6249_v59 = vld [vmem:[%s7209_s19 + $0x20] sm:$0xff]   ;;  %v6312_v62 = vld [vmem:[%s9395_s3 + $0x108] ss:$16 sps:$4 sm:$0xff]   ;;  %v6320_v0 = vld [vmem:[%s9395_s3 + $0x12c] ss:$16 sps:$4 sm:$0xff]  }
  0x22   : > { %v6257_v60 = vld [vmem:[%s7209_s19 + $0x60] sm:$0xff]   ;;  %v6318_v3 = vld [vmem:[%s9395_s3 + $0x128] ss:$16 sps:$4 sm:$0xff]   ;;  %v6326_v5 = vld [vmem:[%s9395_s3 + $0x14c] ss:$16 sps:$4 sm:$0xff]  }
  0x23   : > { %v6317_v63 = vld [vmem:[%s9395_s3 + $0x124] ss:$16 sps:$4 sm:$0xff]   ;;  %v6315_v1 = vld [vmem:[%s9395_s3 + $0x120] ss:$16 sps:$4 sm:$0xff]   ;;  %v6250_v6 = vld [vmem:[%s7209_s19 + $0x28] sm:$0xff]  }
  0x24   : > { %554 = vmatpush1.bf16.msra.mxu0 %v6242_v13  ;;  %5829 = vmatpush1.bf16.msra.mxu1 %v6242_v13  ;;  %v6323_v4 = vld [vmem:[%s9395_s3 + $0x144] ss:$16 sps:$4 sm:$0xff]   ;;  %v6258_v7 = vld [vmem:[%s7209_s19 + $0x68] sm:$0xff]   ;;  %v6321_v8 = vld [vmem:[%s9395_s3 + $0x140] ss:$16 sps:$4 sm:$0xff]  }
  0x25   : > { %5286 = vmatprep.subr.msk.bf16.mxu0 %vm536_vm0, %v5285_v14  ;;  %5823 = vmatprep.subr.msk.bf16.mxu1 %vm536_vm0, %v5285_v14  ;;  %v6324_v9 = vld [vmem:[%s9395_s3 + $0x148] ss:$16 sps:$4 sm:$0xff]   ;;  %v6329_v10 = vld [vmem:[%s9395_s3 + $0x164] ss:$16 sps:$4 sm:$0xff]   ;;  %v6332_v11 = vld [vmem:[%s9395_s3 + $0x16c] ss:$16 sps:$4 sm:$0xff]  }
  0x26   : > { %v6327_v12 = vld [vmem:[%s9395_s3 + $0x160] ss:$16 sps:$4 sm:$0xff]   ;;  %v6330_v13 = vld [vmem:[%s9395_s3 + $0x168] ss:$16 sps:$4 sm:$0xff]   ;;  %v6335_v14 = vld [vmem:[%s9395_s3 + $0x184] ss:$16 sps:$4 sm:$0xff]  }
  0x27   : > { %v6338_v15 = vld [vmem:[%s9395_s3 + $0x18c] ss:$16 sps:$4 sm:$0xff]  }
  0x28   : > { %556 = vmatpush1.bf16.msra.mxu0 %v538_v16  ;;  %5830 = vmatpush1.bf16.msra.mxu1 %v538_v16  ;;  %v6251_v16 = vld [vmem:[%s7209_s19 + $0x30] sm:$0xff]  }
  0x29   : > { %1238 = vmatprep.subr.bf16.mxu1 %v6263_v18  ;;  %1431 = vmatprep.subr.bf16.mxu0 %v6266_v20  ;;  %v6333_v18 = vld [vmem:[%s9395_s3 + $0x180] ss:$16 sps:$4 sm:$0xff]   ;;  %v6341_v20 = vld [vmem:[%s9395_s3 + $0x1a4] ss:$16 sps:$4 sm:$0xff]  }
  0x2b   : > { %5287 = vmatmul.mubr.msk.bf16.vlgmr.msra.gmra.mrb[0].mxu0 %vm487_vm1, %v6245_v17  ;;  %5295 = vmatmul.mubr.msk.bf16.vlgmr.msra.gmra.mrb[0].mxu1 %vm487_vm1, %v6253_v19  ;;  %v6259_v17 = vld [vmem:[%s7209_s19 + $0x70] sm:$0xff]   ;;  %v6336_v19 = vld [vmem:[%s9395_s3 + $0x188] ss:$16 sps:$4 sm:$0xff]  }
  0x2c   : > { %585 = vmatprep.mubr.bf16.mxu0 %v7134_v2  ;;  %665 = vmatprep.mubr.bf16.mxu1 %v7134_v2 }
  0x2d   : > { %1239 = vmatpush1.bf16.msra.mxu1 %v6261_v21  ;;  %1432 = vmatpush1.bf16.msra.mxu0 %v6264_v22  ;;  %v6344_v21 = vld [vmem:[%s9395_s3 + $0x1ac] ss:$16 sps:$4 sm:$0xff]   ;;  %v6339_v22 = vld [vmem:[%s9395_s3 + $0x1a0] ss:$16 sps:$4 sm:$0xff]  }
  0x2e   : > { %1240 = vmatprep.subr.bf16.mxu1 %v6269_v23  ;;  %1433 = vmatprep.subr.bf16.mxu0 %v6272_v24  ;;  %v6342_v23 = vld [vmem:[%s9395_s3 + $0x1a8] ss:$16 sps:$4 sm:$0xff]  }
  0x2f   : > { %v6252_v24 = vld [vmem:[%s7209_s19 + $0x38] sm:$0xff]  }
  0x31   : > { %1241 = vmatpush1.bf16.msra.mxu1 %v6267_v25  ;;  %1434 = vmatpush1.bf16.msra.mxu0 %v6270_v26  ;;  %v6260_v25 = vld [vmem:[%s7209_s19 + $0x78] sm:$0xff]   ;;  %v6347_v26 = vld [vmem:[%s9395_s3 + $0x1c4] ss:$16 sps:$4 sm:$0xff]  }
  0x32   : > { %1242 = vmatprep.subr.bf16.mxu1 %v6275_v27  ;;  %1435 = vmatprep.subr.bf16.mxu0 %v6278_v28  ;;  %v6345_v27 = vld [vmem:[%s9395_s3 + $0x1c0] ss:$16 sps:$4 sm:$0xff]   ;;  %v6348_v28 = vld [vmem:[%s9395_s3 + $0x1c8] ss:$16 sps:$4 sm:$0xff]  }
  0x33   : > { %5288 = vmatmul.mubr.msk.bf16.gmra.mrb[4].mxu0 %vm487_vm1, %v6246_v29  ;;  %5296 = vmatmul.mubr.msk.bf16.gmra.mrb[4].mxu1 %vm487_vm1, %v6254_v30  ;;  %v6353_v29 = vld [vmem:[%s9395_s3 + $0x1e4] ss:$16 sps:$4 sm:$0xff]   ;;  %v6356_v30 = vld [vmem:[%s9395_s3 + $0x1ec] ss:$16 sps:$4 sm:$0xff]  }
  0x34   : > { %595 = vmatprep.mubr.bf16.mxu0 %v7134_v2  ;;  %675 = vmatprep.mubr.bf16.mxu1 %v7134_v2 }
  0x35   : > { %1243 = vmatpush1.bf16.msra.mxu1 %v6273_v31  ;;  %1436 = vmatpush1.bf16.msra.mxu0 %v6276_v32  ;;  %v6351_v31 = vld [vmem:[%s9395_s3 + $0x1e0] ss:$16 sps:$4 sm:$0xff]   ;;  %v6354_v32 = vld [vmem:[%s9395_s3 + $0x1e8] ss:$16 sps:$4 sm:$0xff]  }
  0x36   : > { %1244 = vmatprep.subr.bf16.mxu1 %v6281_v33  ;;  %1437 = vmatprep.subr.bf16.mxu0 %v6284_v34  ;;  %v6359_v33 = vld [vmem:[%s9397_s5 + $0xc] ss:$28 sps:$4 sm:$0xff]   ;;  %v6362_v34 = vld [vmem:[%s9397_s5 + $0x4] ss:$28 sps:$4 sm:$0xff]  }
  0x39   : > { %1245 = vmatpush1.bf16.msra.mxu1 %v6279_v35  ;;  %1438 = vmatpush1.bf16.msra.mxu0 %v6282_v36  ;;  %v332_v35 = vlaneseq }
  0x3a   : > { %1246 = vmatprep.subr.bf16.mxu1 %v6287_v37  ;;  %1439 = vmatprep.subr.bf16.mxu0 %v6290_v38  ;;  %v330_v38 = vld [vmem:[%s9394_s2] sm:$0x3] }
  0x3b   : > { %5289 = vmatmul.mubr.msk.bf16.gmra.mrb[8].mxu0 %vm487_vm1, %v6247_v39  ;;  %5297 = vmatmul.mubr.msk.bf16.gmra.mrb[8].mxu1 %vm487_vm1, %v6255_v40  ;;  %v7476_v36 = vshrl.u32 %v332_v35, 7 }
  0x3c   : > { %605 = vmatprep.mubr.bf16.mxu0 %v7134_v2  ;;  %685 = vmatprep.mubr.bf16.mxu1 %v7134_v2 }
  0x3d   : > { %1247 = vmatpush1.bf16.msra.mxu1 %v6285_v41  ;;  %1440 = vmatpush1.bf16.msra.mxu0 %v6288_v42  ;;  %9446 = vst [vmem:[#allocation2_spill] sm:$0xff] %v7476_v36  ;;  %v7479_v37 = vsub.s32 0, %v7476_v36  ;;  %v7485_v39 = vsub.s32 1, %v7476_v36 }
  0x3e   : > { %1248 = vmatprep.subr.bf16.mxu1 %v6293_v43  ;;  %1441 = vmatprep.subr.bf16.mxu0 %v6296_v44 }
  0x3f   : > { %9447 = vst [vmem:[#allocation3_spill] sm:$0xff] %v7479_v37  ;;  %9448 = vst [vmem:[#allocation4_spill] sm:$0xff] %v7485_v39  ;;  %v7488_v40 = vrot.slane %v330_v38, %v7479_v37  ;;  %v7491_v41 = vrot.slane %v330_v38, %v7485_v39 }
  0x41   : > { %1249 = vmatpush1.bf16.msra.mxu1 %v6291_v45  ;;  %1442 = vmatpush1.bf16.msra.mxu0 %v6294_v46 }
  0x42   : > { %1250 = vmatprep.subr.bf16.mxu1 %v6299_v47  ;;  %1443 = vmatprep.subr.bf16.mxu0 %v6302_v48 }
  0x43   : > { %5290 = vmatmul.mubr.msk.bf16.gmra.mrb[12].mxu0 %vm487_vm1, %v6248_v49  ;;  %5298 = vmatmul.mubr.msk.bf16.gmra.mrb[12].mxu1 %vm487_vm1, %v6256_v50 }
  0x44   : > { %615 = vmatprep.mubr.bf16.mxu0 %v7134_v2  ;;  %695 = vmatprep.mubr.bf16.mxu1 %v7134_v2 }
  0x45   : > { %1251 = vmatpush1.bf16.msra.mxu1 %v6297_v51  ;;  %1444 = vmatpush1.bf16.msra.mxu0 %v6300_v52 }
  0x46   : > { %1252 = vmatprep.subr.bf16.mxu1 %v6305_v53  ;;  %1445 = vmatprep.subr.bf16.mxu0 %v6308_v54 }
  0x49   : > { %1253 = vmatpush1.bf16.msra.mxu1 %v6303_v55  ;;  %1446 = vmatpush1.bf16.msra.mxu0 %v6306_v56 }
  0x4a   : > { %1254 = vmatprep.subr.bf16.mxu1 %v6311_v57  ;;  %1447 = vmatprep.subr.bf16.mxu0 %v6314_v58 }
  0x4b   : > { %5291 = vmatmul.mubr.msk.bf16.gmra.mrb[16].mxu0 %vm487_vm1, %v6249_v59  ;;  %5299 = vmatmul.mubr.msk.bf16.gmra.mrb[16].mxu1 %vm487_vm1, %v6257_v60 }
  0x4c   : > { %625 = vmatprep.mubr.bf16.mxu0 %v7134_v2  ;;  %705 = vmatprep.mubr.bf16.mxu1 %v7134_v2 }
  0x4d   : > { %1255 = vmatpush1.bf16.msra.mxu1 %v6309_v61  ;;  %1448 = vmatpush1.bf16.msra.mxu0 %v6312_v62 }
  0x4e   : > { %1256 = vmatprep.subr.bf16.mxu1 %v6317_v63  ;;  %1449 = vmatprep.subr.bf16.mxu0 %v6320_v0 }
  0x51   : > { %1257 = vmatpush1.bf16.msra.mxu1 %v6315_v1  ;;  %1450 = vmatpush1.bf16.msra.mxu0 %v6318_v3 }
  0x52   : > { %1258 = vmatprep.subr.bf16.mxu1 %v6323_v4  ;;  %1451 = vmatprep.subr.bf16.mxu0 %v6326_v5 }
  0x53   : > { %5292 = vmatmul.mubr.msk.bf16.gmra.mrb[20].mxu0 %vm487_vm1, %v6250_v6  ;;  %5300 = vmatmul.mubr.msk.bf16.gmra.mrb[20].mxu1 %vm487_vm1, %v6258_v7 }
  0x54   : > { %635 = vmatprep.mubr.bf16.mxu0 %v7134_v2  ;;  %715 = vmatprep.mubr.bf16.mxu1 %v7134_v2 }
  0x55   : > { %1259 = vmatpush1.bf16.msra.mxu1 %v6321_v8  ;;  %1452 = vmatpush1.bf16.msra.mxu0 %v6324_v9  ;;  %v6357_v9 = vld [vmem:[%s9397_s5 + $0x8] ss:$28 sps:$4 sm:$0xff]  }
  0x56   : > { %1260 = vmatprep.subr.bf16.mxu1 %v6329_v10  ;;  %1453 = vmatprep.subr.bf16.mxu0 %v6332_v11  ;;  %v6360_v10 = vld [vmem:[%s9397_s5] ss:$28 sps:$4 sm:$0xff]  }
  0x59   : > { %1261 = vmatpush1.bf16.msra.mxu1 %v6327_v12  ;;  %1454 = vmatpush1.bf16.msra.mxu0 %v6330_v13 }
  0x5a   : > { %1262 = vmatprep.subr.bf16.mxu1 %v6335_v14  ;;  %1455 = vmatprep.subr.bf16.mxu0 %v6338_v15  ;;  %v6365_v15 = vld [vmem:[%s9397_s5 + $0x44] ss:$28 sps:$4 sm:$0xff]  }
  0x5b   : > { %5293 = vmatmul.mubr.msk.bf16.gmra.mrb[24].mxu0 %vm487_vm1, %v6251_v16  ;;  %5301 = vmatmul.mubr.msk.bf16.gmra.mrb[24].mxu1 %vm487_vm1, %v6259_v17  ;;  %v6368_v16 = vld [vmem:[%s9397_s5 + $0x3c] ss:$28 sps:$4 sm:$0xff]  }
  0x5c   : > { %645 = vmatprep.mubr.bf16.mxu0 %v7134_v2  ;;  %725 = vmatprep.mubr.bf16.mxu1 %v7134_v2  ;;  %v6350_v2 = vld [vmem:[%s9395_s3 + $0x1cc] ss:$16 sps:$4 sm:$0xff]  }
  0x5d   : > { %1263 = vmatpush1.bf16.msra.mxu1 %v6333_v18  ;;  %1456 = vmatpush1.bf16.msra.mxu0 %v6336_v19 }
  0x5e   : > { %1264 = vmatprep.subr.bf16.mxu1 %v6341_v20  ;;  %1457 = vmatprep.subr.bf16.mxu0 %v6344_v21 }
  0x61   : > { %1265 = vmatpush1.bf16.msra.mxu1 %v6339_v22  ;;  %1458 = vmatpush1.bf16.msra.mxu0 %v6342_v23 }
  0x62   : > { %1266 = vmatprep.subr.bf16.mxu1 %v6347_v26  ;;  %1459 = vmatprep.subr.bf16.mxu0 %v6350_v2  ;;  %v6363_v26 = vld [vmem:[%s9397_s5 + $0x40] ss:$28 sps:$4 sm:$0xff]  }
  0x63   : > { %5294 = vmatmul.mubr.msk.bf16.gmra.mrb[28].mxu0 %vm487_vm1, %v6252_v24  ;;  %5302 = vmatmul.mubr.msk.bf16.gmra.mrb[28].mxu1 %vm487_vm1, %v6260_v25 }
  0x65   : > { %1267 = vmatpush1.bf16.msra.mxu1 %v6345_v27  ;;  %1460 = vmatpush1.bf16.msra.mxu0 %v6348_v28 }
  0x66   : > { %1268 = vmatprep.subr.bf16.mxu1 %v6353_v29  ;;  %1461 = vmatprep.subr.bf16.mxu0 %v6356_v30  ;;  %v6366_v29 = vld [vmem:[%s9397_s5 + $0x38] ss:$28 sps:$4 sm:$0xff]  }
  0x67   : > { %v6371_v30 = vld [vmem:[%s9397_s5 + $0x7c] ss:$28 sps:$4 sm:$0xff]  }
  0x69   : > { %1269 = vmatpush1.bf16.msra.mxu1 %v6351_v31  ;;  %1462 = vmatpush1.bf16.msra.mxu0 %v6354_v32 }
  0x6a   : > { %3647 = vmatprep.subr.bf16.mxu0 %v6359_v33  ;;  %3261 = vmatprep.subr.bf16.mxu1 %v6362_v34  ;;  %v6374_v34 = vld [vmem:[%s9397_s5 + $0x74] ss:$28 sps:$4 sm:$0xff]  }
  0xfe   : > { %v577_v42 = vpop.f32.mrb[0].mxu0  ;;  %v657_v43 = vpop.f32.mrb[0].mxu1 }
  0xff   : > { %v578_v44 = vadd.f32 %v577_v42, %v7488_v40  ;;  %v579_v45 = vpop.f32.mrb[1].mxu0  ;;  %v658_v46 = vadd.f32 %v657_v43, %v7488_v40  ;;  %v659_v47 = vpop.f32.mrb[1].mxu1 }
 0x100   : > { %v580_v48 = vadd.f32 %v579_v45, %v7491_v41  ;;  %v581_v49 = vpop.f32.mrb[2].mxu0  ;;  %v660_v50 = vadd.f32 %v659_v47, %v7491_v41  ;;  %v661_v51 = vpop.f32.mrb[2].mxu1 }
 0x101   : > { %v582_v52 = vadd.f32 %v581_v49, %v7488_v40  ;;  %v583_v53 = vpop.f32.mrb[3].mxu0  ;;  %v768_v54 = vmax.f32 %v658_v46, 0.0  ;;  %v662_v55 = vadd.f32 %v661_v51, %v7488_v40  ;;  %v663_v56 = vpop.f32.mrb[3].mxu1  ;;  %v736_v60 = vmax.f32 %v578_v44, 0.0  ;;  %v6369_v49 = vld [vmem:[%s9397_s5 + $0x78] ss:$28 sps:$4 sm:$0xff]  }
 0x102   : > { %v584_v57 = vadd.f32 %v583_v53, %v7491_v41  ;;  %v769_v58 = vmax.f32 %v660_v50, 0.0  ;;  %v664_v59 = vadd.f32 %v663_v56, %v7491_v41  ;;  %v737_v63 = vmax.f32 %v580_v48, 0.0  ;;  %v6372_v50 = vld [vmem:[%s9397_s5 + $0x70] ss:$28 sps:$4 sm:$0xff]  }
 0x103   : > { %v738_v61 = vmax.f32 %v582_v52, 0.0  ;;  %v770_v62 = vmax.f32 %v662_v55, 0.0  ;;  %v6377_v55 = vld [vmem:[%s9397_s5 + $0xb4] ss:$28 sps:$4 sm:$0xff]   ;;  %v6380_v56 = vld [vmem:[%s9397_s5 + $0xac] ss:$28 sps:$4 sm:$0xff]  }
 0x104   : > { %v739_v0 = vmax.f32 %v584_v57, 0.0  ;;  %v771_v1 = vmax.f32 %v664_v59, 0.0 }
 0x105   : > { %v800_v3 = vpack.c.bf16 %v738_v61, %v736_v60  ;;  %v7501_v4 = vpack.c.bf16 %v770_v62, %v768_v54 }
 0x106   : > { %v587_v5 = vpop.f32.mrb[4].mxu0  ;;  %v801_v6 = vpack.c.bf16 %v739_v0, %v737_v63  ;;  %v7503_v7 = vpack.c.bf16 %v771_v1, %v769_v58  ;;  %v667_v8 = vpop.f32.mrb[4].mxu1 }
 0x107   : > { %v588_v11 = vadd.f32 %v587_v5, %v7488_v40  ;;  %v589_v12 = vpop.f32.mrb[5].mxu0  ;;  %v668_v13 = vadd.f32 %v667_v8, %v7488_v40  ;;  %v669_v14 = vpop.f32.mrb[5].mxu1 }
 0x108   : > { %v590_v17 = vadd.f32 %v589_v12, %v7491_v41  ;;  %v591_v18 = vpop.f32.mrb[6].mxu0  ;;  %1270 = vmatprep.mubr.bf16.mxu1 %v801_v6  ;;  %1463 = vmatprep.mubr.bf16.mxu0 %v801_v6  ;;  %v670_v19 = vadd.f32 %v669_v14, %v7491_v41  ;;  %v671_v20 = vpop.f32.mrb[6].mxu1  ;;  %v6386_v14 = vld [vmem:[%s9397_s5 + $0xe4] ss:$28 sps:$4 sm:$0xff]  }
 0x109   : > { %v592_v21 = vadd.f32 %v591_v18, %v7488_v40  ;;  %v593_v22 = vpop.f32.mrb[7].mxu0  ;;  %1271 = vmatmul.mubr.bf16.vlgmr.msra.gmra.mrb[32].mxu1 %v800_v3  ;;  %1464 = vmatmul.mubr.bf16.vlgmr.msra.gmra.mrb[32].mxu0 %v800_v3  ;;  %v772_v23 = vmax.f32 %v668_v13, 0.0  ;;  %v672_v24 = vadd.f32 %v671_v20, %v7488_v40  ;;  %v673_v25 = vpop.f32.mrb[7].mxu1  ;;  %v740_v31 = vmax.f32 %v588_v11, 0.0  ;;  %v6375_v3 = vld [vmem:[%s9397_s5 + $0xb0] ss:$28 sps:$4 sm:$0xff]  }
 0x10a   : > { %v594_v2 = vadd.f32 %v593_v22, %v7491_v41  ;;  %v773_v27 = vmax.f32 %v670_v19, 0.0  ;;  %v674_v28 = vadd.f32 %v673_v25, %v7491_v41  ;;  %3648 = vmatpush1.bf16.msra.mxu0 %v6357_v9  ;;  %3262 = vmatpush1.bf16.msra.mxu1 %v6360_v10  ;;  %v741_v35 = vmax.f32 %v590_v17, 0.0  ;;  %v6378_v9 = vld [vmem:[%s9397_s5 + $0xa8] ss:$28 sps:$4 sm:$0xff]   ;;  %v6384_v25 = vld [vmem:[%s9397_s5 + $0xe0] ss:$28 sps:$4 sm:$0xff]  }
 0x10b   : > { %v742_v32 = vmax.f32 %v592_v21, 0.0  ;;  %v774_v33 = vmax.f32 %v672_v24, 0.0  ;;  %3649 = vmatprep.subr.bf16.mxu0 %v6365_v15  ;;  %3263 = vmatprep.subr.bf16.mxu1 %v6368_v16  ;;  %v6383_v10 = vld [vmem:[%s9397_s5 + $0xec] ss:$28 sps:$4 sm:$0xff]  }
 0x10c   : > { %v743_v38 = vmax.f32 %v594_v2, 0.0  ;;  %v775_v42 = vmax.f32 %v674_v28, 0.0  ;;  %v6381_v24 = vld [vmem:[%s9397_s5 + $0xe8] ss:$28 sps:$4 sm:$0xff]  }
 0x10d   : > { %v802_v43 = vpack.c.bf16 %v742_v32, %v740_v31  ;;  %v7537_v44 = vpack.c.bf16 %v774_v33, %v772_v23 }
 0x10e   : > { %v597_v45 = vpop.f32.mrb[8].mxu0  ;;  %v803_v46 = vpack.c.bf16 %v743_v38, %v741_v35  ;;  %v7539_v47 = vpack.c.bf16 %v775_v42, %v773_v27  ;;  %v677_v48 = vpop.f32.mrb[8].mxu1  ;;  %3650 = vmatpush1.bf16.msra.mxu0 %v6363_v26  ;;  %3264 = vmatpush1.bf16.msra.mxu1 %v6366_v29  ;;  %v6389_v29 = vld [vmem:[%s9397_s5 + $0x124] ss:$28 sps:$4 sm:$0xff]  }
 0x10f   : > { %v598_v51 = vadd.f32 %v597_v45, %v7488_v40  ;;  %v599_v52 = vpop.f32.mrb[9].mxu0  ;;  %v678_v53 = vadd.f32 %v677_v48, %v7488_v40  ;;  %v679_v54 = vpop.f32.mrb[9].mxu1  ;;  %3651 = vmatprep.subr.bf16.mxu0 %v6371_v30  ;;  %3265 = vmatprep.subr.bf16.mxu1 %v6374_v34  ;;  %v6392_v30 = vld [vmem:[%s9397_s5 + $0x11c] ss:$28 sps:$4 sm:$0xff]  }
 0x110   : > { %v600_v57 = vadd.f32 %v599_v52, %v7491_v41  ;;  %v601_v58 = vpop.f32.mrb[10].mxu0  ;;  %1280 = vmatprep.mubr.bf16.mxu1 %v803_v46  ;;  %1473 = vmatprep.mubr.bf16.mxu0 %v803_v46  ;;  %v680_v59 = vadd.f32 %v679_v54, %v7491_v41  ;;  %v681_v60 = vpop.f32.mrb[10].mxu1  ;;  %v6387_v46 = vld [vmem:[%s9397_s5 + $0x120] ss:$28 sps:$4 sm:$0xff]  }
 0x111   : > { %v602_v61 = vadd.f32 %v601_v58, %v7488_v40  ;;  %v603_v62 = vpop.f32.mrb[11].mxu0  ;;  %1281 = vmatmul.mubr.bf16.gmra.mrb[36].mxu1 %v802_v43  ;;  %1474 = vmatmul.mubr.bf16.gmra.mrb[36].mxu0 %v802_v43  ;;  %v776_v63 = vmax.f32 %v678_v53, 0.0  ;;  %v682_v0 = vadd.f32 %v681_v60, %v7488_v40  ;;  %v683_v1 = vpop.f32.mrb[11].mxu1  ;;  %v744_v11 = vmax.f32 %v598_v51, 0.0  ;;  %v6390_v51 = vld [vmem:[%s9397_s5 + $0x118] ss:$28 sps:$4 sm:$0xff]  }
 0x112   : > { %v604_v5 = vadd.f32 %v603_v62, %v7491_v41  ;;  %v777_v6 = vmax.f32 %v680_v59, 0.0  ;;  %v684_v8 = vadd.f32 %v683_v1, %v7491_v41  ;;  %3652 = vmatpush1.bf16.msra.mxu0 %v6369_v49  ;;  %3266 = vmatpush1.bf16.msra.mxu1 %v6372_v50  ;;  %v745_v15 = vmax.f32 %v600_v57, 0.0  ;;  %v6395_v52 = vld [vmem:[%s9397_s5 + $0x15c] ss:$28 sps:$4 sm:$0xff]  }
 0x113   : > { %v746_v12 = vmax.f32 %v602_v61, 0.0  ;;  %v778_v13 = vmax.f32 %v682_v0, 0.0  ;;  %3653 = vmatprep.subr.bf16.mxu0 %v6377_v55  ;;  %3267 = vmatprep.subr.bf16.mxu1 %v6380_v56  ;;  %v6398_v56 = vld [vmem:[%s9397_s5 + $0x154] ss:$28 sps:$4 sm:$0xff]  }
 0x114   : > { %v747_v16 = vmax.f32 %v604_v5, 0.0  ;;  %v779_v17 = vmax.f32 %v684_v8, 0.0  ;;  %v6396_v5 = vld [vmem:[%s9397_s5 + $0x150] ss:$28 sps:$4 sm:$0xff]  }
 0x115   : > { %v804_v18 = vpack.c.bf16 %v746_v12, %v744_v11  ;;  %v7573_v19 = vpack.c.bf16 %v778_v13, %v776_v63  ;;  %v6401_v11 = vld [vmem:[%s9397_s5 + $0x194] ss:$28 sps:$4 sm:$0xff]   ;;  %v6404_v12 = vld [vmem:[%s9397_s5 + $0x18c] ss:$28 sps:$4 sm:$0xff]  }
 0x116   : > { %v607_v20 = vpop.f32.mrb[12].mxu0  ;;  %v805_v21 = vpack.c.bf16 %v747_v16, %v745_v15  ;;  %v7575_v22 = vpack.c.bf16 %v779_v17, %v777_v6  ;;  %v687_v23 = vpop.f32.mrb[12].mxu1  ;;  %3654 = vmatpush1.bf16.msra.mxu0 %v6375_v3  ;;  %3268 = vmatpush1.bf16.msra.mxu1 %v6378_v9  ;;  %v6393_v3 = vld [vmem:[%s9397_s5 + $0x158] ss:$28 sps:$4 sm:$0xff]  }
 0x117   : > { %v608_v26 = vadd.f32 %v607_v20, %v7488_v40  ;;  %v609_v2 = vpop.f32.mrb[13].mxu0  ;;  %v688_v27 = vadd.f32 %v687_v23, %v7488_v40  ;;  %v689_v28 = vpop.f32.mrb[13].mxu1  ;;  %3655 = vmatprep.subr.bf16.mxu0 %v6383_v10  ;;  %3269 = vmatprep.subr.bf16.mxu1 %v6386_v14 }
 0x118   : > { %v610_v31 = vadd.f32 %v609_v2, %v7491_v41  ;;  %v611_v32 = vpop.f32.mrb[14].mxu0  ;;  %1290 = vmatprep.mubr.bf16.mxu1 %v805_v21  ;;  %1483 = vmatprep.mubr.bf16.mxu0 %v805_v21  ;;  %v690_v33 = vadd.f32 %v689_v28, %v7491_v41  ;;  %v691_v34 = vpop.f32.mrb[14].mxu1  ;;  %v6407_v28 = vld [vmem:[%s9397_s5 + $0x1cc] ss:$28 sps:$4 sm:$0xff]  }
 0x119   : > { %v612_v35 = vadd.f32 %v611_v32, %v7488_v40  ;;  %v613_v38 = vpop.f32.mrb[15].mxu0  ;;  %1291 = vmatmul.mubr.bf16.gmra.mrb[40].mxu1 %v804_v18  ;;  %1484 = vmatmul.mubr.bf16.gmra.mrb[40].mxu0 %v804_v18  ;;  %v780_v42 = vmax.f32 %v688_v27, 0.0  ;;  %v692_v43 = vadd.f32 %v691_v34, %v7488_v40  ;;  %v693_v45 = vpop.f32.mrb[15].mxu1  ;;  %v748_v53 = vmax.f32 %v608_v26, 0.0  ;;  %v6402_v27 = vld [vmem:[%s9397_s5 + $0x188] ss:$28 sps:$4 sm:$0xff]  }
 0x11a   : > { %v614_v48 = vadd.f32 %v613_v38, %v7491_v41  ;;  %v781_v49 = vmax.f32 %v690_v33, 0.0  ;;  %v694_v50 = vadd.f32 %v693_v45, %v7491_v41  ;;  %3656 = vmatpush1.bf16.msra.mxu0 %v6381_v24  ;;  %3270 = vmatpush1.bf16.msra.mxu1 %v6384_v25  ;;  %v749_v57 = vmax.f32 %v610_v31, 0.0  ;;  %v6399_v24 = vld [vmem:[%s9397_s5 + $0x190] ss:$28 sps:$4 sm:$0xff]   ;;  %v6410_v32 = vld [vmem:[%s9397_s5 + $0x1c4] ss:$28 sps:$4 sm:$0xff]  }
 0x11b   : > { %v750_v54 = vmax.f32 %v612_v35, 0.0  ;;  %v782_v55 = vmax.f32 %v692_v43, 0.0  ;;  %3657 = vmatprep.subr.bf16.mxu0 %v6389_v29  ;;  %3271 = vmatprep.subr.bf16.mxu1 %v6392_v30 }
 0x11c   : > { %v751_v58 = vmax.f32 %v614_v48, 0.0  ;;  %v783_v59 = vmax.f32 %v694_v50, 0.0  ;;  %v6408_v50 = vld [vmem:[%s9397_s5 + $0x1c0] ss:$28 sps:$4 sm:$0xff]  }
 0x11d   : > { %v806_v60 = vpack.c.bf16 %v750_v54, %v748_v53  ;;  %v7609_v61 = vpack.c.bf16 %v782_v55, %v780_v42  ;;  %v6413_v55 = vld [vmem:[%s9397_s5 + $0x204] ss:$28 sps:$4 sm:$0xff]  }
 0x11e   : > { %v617_v62 = vpop.f32.mrb[16].mxu0  ;;  %v807_v63 = vpack.c.bf16 %v751_v58, %v749_v57  ;;  %v7611_v0 = vpack.c.bf16 %v783_v59, %v781_v49  ;;  %v697_v1 = vpop.f32.mrb[16].mxu1  ;;  %3658 = vmatpush1.bf16.msra.mxu0 %v6387_v46  ;;  %3272 = vmatpush1.bf16.msra.mxu1 %v6390_v51  ;;  %v6405_v49 = vld [vmem:[%s9397_s5 + $0x1c8] ss:$28 sps:$4 sm:$0xff]  }
 0x11f   : > { %v618_v6 = vadd.f32 %v617_v62, %v7488_v40  ;;  %v619_v8 = vpop.f32.mrb[17].mxu0  ;;  %v698_v9 = vadd.f32 %v697_v1, %v7488_v40  ;;  %v699_v10 = vpop.f32.mrb[17].mxu1  ;;  %3659 = vmatprep.subr.bf16.mxu0 %v6395_v52  ;;  %3273 = vmatprep.subr.bf16.mxu1 %v6398_v56  ;;  %v6416_v56 = vld [vmem:[%s9397_s5 + $0x1fc] ss:$28 sps:$4 sm:$0xff]  }
 0x120   : > { %v620_v13 = vadd.f32 %v619_v8, %v7491_v41  ;;  %v621_v14 = vpop.f32.mrb[18].mxu0  ;;  %1300 = vmatprep.mubr.bf16.mxu1 %v807_v63  ;;  %1493 = vmatprep.mubr.bf16.mxu0 %v807_v63  ;;  %v700_v15 = vadd.f32 %v699_v10, %v7491_v41  ;;  %v701_v16 = vpop.f32.mrb[18].mxu1 }
 0x121   : > { %v622_v17 = vadd.f32 %v621_v14, %v7488_v40  ;;  %v623_v18 = vpop.f32.mrb[19].mxu0  ;;  %1301 = vmatmul.mubr.bf16.gmra.mrb[44].mxu1 %v806_v60  ;;  %1494 = vmatmul.mubr.bf16.gmra.mrb[44].mxu0 %v806_v60  ;;  %v784_v20 = vmax.f32 %v698_v9, 0.0  ;;  %v702_v21 = vadd.f32 %v701_v16, %v7488_v40  ;;  %v703_v23 = vpop.f32.mrb[19].mxu1  ;;  %v752_v29 = vmax.f32 %v618_v6, 0.0  ;;  %v6411_v6 = vld [vmem:[%s9397_s5 + $0x200] ss:$28 sps:$4 sm:$0xff]  }
 0x122   : > { %v624_v25 = vadd.f32 %v623_v18, %v7491_v41  ;;  %v785_v26 = vmax.f32 %v700_v15, 0.0  ;;  %v704_v2 = vadd.f32 %v703_v23, %v7491_v41  ;;  %3660 = vmatpush1.bf16.msra.mxu0 %v6393_v3  ;;  %3274 = vmatpush1.bf16.msra.mxu1 %v6396_v5  ;;  %v753_v33 = vmax.f32 %v620_v13, 0.0  ;;  %v6422_v16 = vld [vmem:[%s9397_s5 + $0x234] ss:$28 sps:$4 sm:$0xff]  }
 0x123   : > { %v754_v30 = vmax.f32 %v622_v17, 0.0  ;;  %v786_v31 = vmax.f32 %v702_v21, 0.0  ;;  %3661 = vmatprep.subr.bf16.mxu0 %v6401_v11  ;;  %3275 = vmatprep.subr.bf16.mxu1 %v6404_v12  ;;  %v6414_v11 = vld [vmem:[%s9397_s5 + $0x1f8] ss:$28 sps:$4 sm:$0xff]  }
 0x124   : > { %v755_v34 = vmax.f32 %v624_v25, 0.0  ;;  %v787_v35 = vmax.f32 %v704_v2, 0.0  ;;  %v6419_v12 = vld [vmem:[%s9397_s5 + $0x23c] ss:$28 sps:$4 sm:$0xff]  }
 0x125   : > { %v808_v38 = vpack.c.bf16 %v754_v30, %v752_v29  ;;  %v7645_v42 = vpack.c.bf16 %v786_v31, %v784_v20 }
 0x126   : > { %v627_v43 = vpop.f32.mrb[20].mxu0  ;;  %v809_v45 = vpack.c.bf16 %v755_v34, %v753_v33  ;;  %v7647_v46 = vpack.c.bf16 %v787_v35, %v785_v26  ;;  %v707_v48 = vpop.f32.mrb[20].mxu1  ;;  %3662 = vmatpush1.bf16.msra.mxu0 %v6399_v24  ;;  %3276 = vmatpush1.bf16.msra.mxu1 %v6402_v27  ;;  %v6417_v27 = vld [vmem:[%s9397_s5 + $0x238] ss:$28 sps:$4 sm:$0xff]   ;;  %v6428_v34 = vld [vmem:[%s9397_s5 + $0x26c] ss:$28 sps:$4 sm:$0xff]  }
 0x127   : > { %v628_v51 = vadd.f32 %v627_v43, %v7488_v40  ;;  %v629_v52 = vpop.f32.mrb[21].mxu0  ;;  %v708_v53 = vadd.f32 %v707_v48, %v7488_v40  ;;  %v709_v54 = vpop.f32.mrb[21].mxu1  ;;  %3663 = vmatprep.subr.bf16.mxu0 %v6407_v28  ;;  %3277 = vmatprep.subr.bf16.mxu1 %v6410_v32  ;;  %v6420_v28 = vld [vmem:[%s9397_s5 + $0x230] ss:$28 sps:$4 sm:$0xff]  }
 0x128   : > { %v630_v57 = vadd.f32 %v629_v52, %v7491_v41  ;;  %v631_v58 = vpop.f32.mrb[22].mxu0  ;;  %1310 = vmatprep.mubr.bf16.mxu1 %v809_v45  ;;  %1503 = vmatprep.mubr.bf16.mxu0 %v809_v45  ;;  %v710_v59 = vadd.f32 %v709_v54, %v7491_v41  ;;  %v711_v60 = vpop.f32.mrb[22].mxu1  ;;  %v6425_v33 = vld [vmem:[%s9397_s5 + $0x274] ss:$28 sps:$4 sm:$0xff]  }
 0x129   : > { %v632_v62 = vadd.f32 %v631_v58, %v7488_v40  ;;  %v633_v63 = vpop.f32.mrb[23].mxu0  ;;  %1311 = vmatmul.mubr.bf16.gmra.mrb[48].mxu1 %v808_v38  ;;  %1504 = vmatmul.mubr.bf16.gmra.mrb[48].mxu0 %v808_v38  ;;  %v788_v1 = vmax.f32 %v708_v53, 0.0  ;;  %v712_v3 = vadd.f32 %v711_v60, %v7488_v40  ;;  %v713_v5 = vpop.f32.mrb[23].mxu1  ;;  %v756_v13 = vmax.f32 %v628_v51, 0.0  ;;  %v6423_v53 = vld [vmem:[%s9397_s5 + $0x270] ss:$28 sps:$4 sm:$0xff]  }
 0x12a   : > { %v634_v8 = vadd.f32 %v633_v63, %v7491_v41  ;;  %v789_v9 = vmax.f32 %v710_v59, 0.0  ;;  %v714_v10 = vadd.f32 %v713_v5, %v7491_v41  ;;  %3664 = vmatpush1.bf16.msra.mxu0 %v6405_v49  ;;  %3278 = vmatpush1.bf16.msra.mxu1 %v6408_v50  ;;  %v757_v17 = vmax.f32 %v630_v57, 0.0  ;;  %v6426_v57 = vld [vmem:[%s9397_s5 + $0x268] ss:$28 sps:$4 sm:$0xff]  }
 0x12b   : > { %v758_v14 = vmax.f32 %v632_v62, 0.0  ;;  %v790_v15 = vmax.f32 %v712_v3, 0.0  ;;  %3665 = vmatprep.subr.bf16.mxu0 %v6413_v55  ;;  %3279 = vmatprep.subr.bf16.mxu1 %v6416_v56  ;;  %v6431_v58 = vld [vmem:[%s9397_s5 + $0x2ac] ss:$28 sps:$4 sm:$0xff]   ;;  %v6434_v63 = vld [vmem:[%s9397_s5 + $0x2a4] ss:$28 sps:$4 sm:$0xff]  }
 0x12c   : > { %v759_v18 = vmax.f32 %v634_v8, 0.0  ;;  %v791_v20 = vmax.f32 %v714_v10, 0.0 }
 0x12d   : > { %v810_v21 = vpack.c.bf16 %v758_v14, %v756_v13  ;;  %v7681_v23 = vpack.c.bf16 %v790_v15, %v788_v1  ;;  %v6429_v13 = vld [vmem:[%s9397_s5 + $0x2a8] ss:$28 sps:$4 sm:$0xff]   ;;  %v6432_v14 = vld [vmem:[%s9397_s5 + $0x2a0] ss:$28 sps:$4 sm:$0xff]  }
 0x12e   : > { %v637_v24 = vpop.f32.mrb[24].mxu0  ;;  %v811_v25 = vpack.c.bf16 %v759_v18, %v757_v17  ;;  %v7683_v26 = vpack.c.bf16 %v791_v20, %v789_v9  ;;  %v717_v2 = vpop.f32.mrb[24].mxu1  ;;  %3666 = vmatpush1.bf16.msra.mxu0 %v6411_v6  ;;  %3280 = vmatpush1.bf16.msra.mxu1 %v6414_v11  ;;  %v6437_v20 = vld [vmem:[%s9397_s5 + $0x2e4] ss:$28 sps:$4 sm:$0xff]  }
 0x12f   : > { %v638_v29 = vadd.f32 %v637_v24, %v7488_v40  ;;  %v639_v30 = vpop.f32.mrb[25].mxu0  ;;  %v718_v31 = vadd.f32 %v717_v2, %v7488_v40  ;;  %v719_v32 = vpop.f32.mrb[25].mxu1  ;;  %3667 = vmatprep.subr.bf16.mxu0 %v6419_v12  ;;  %3281 = vmatprep.subr.bf16.mxu1 %v6422_v16 }
 0x130   : > { %v640_v35 = vadd.f32 %v639_v30, %v7491_v41  ;;  %v641_v38 = vpop.f32.mrb[26].mxu0  ;;  %1320 = vmatprep.mubr.bf16.mxu1 %v811_v25  ;;  %1513 = vmatprep.mubr.bf16.mxu0 %v811_v25  ;;  %v720_v43 = vadd.f32 %v719_v32, %v7491_v41  ;;  %v721_v45 = vpop.f32.mrb[26].mxu1 }
 0x131   : > { %v642_v48 = vadd.f32 %v641_v38, %v7488_v40  ;;  %v643_v49 = vpop.f32.mrb[27].mxu0  ;;  %1321 = vmatmul.mubr.bf16.gmra.mrb[52].mxu1 %v810_v21  ;;  %1514 = vmatmul.mubr.bf16.gmra.mrb[52].mxu0 %v810_v21  ;;  %v792_v50 = vmax.f32 %v718_v31, 0.0  ;;  %v722_v51 = vadd.f32 %v721_v45, %v7488_v40  ;;  %v723_v52 = vpop.f32.mrb[27].mxu1  ;;  %v760_v59 = vmax.f32 %v638_v29, 0.0  ;;  %v6440_v21 = vld [vmem:[%s9397_s5 + $0x2dc] ss:$28 sps:$4 sm:$0xff]  }
 0x132   : > { %v644_v54 = vadd.f32 %v643_v49, %v7491_v41  ;;  %v793_v55 = vmax.f32 %v720_v43, 0.0  ;;  %v724_v56 = vadd.f32 %v723_v52, %v7491_v41  ;;  %3668 = vmatpush1.bf16.msra.mxu0 %v6417_v27  ;;  %3282 = vmatpush1.bf16.msra.mxu1 %v6420_v28  ;;  %v761_v1 = vmax.f32 %v640_v35, 0.0  ;;  %v6438_v43 = vld [vmem:[%s9397_s5 + $0x2d8] ss:$28 sps:$4 sm:$0xff]  }
 0x133   : > { %v762_v60 = vmax.f32 %v642_v48, 0.0  ;;  %v794_v62 = vmax.f32 %v722_v51, 0.0  ;;  %3669 = vmatprep.subr.bf16.mxu0 %v6425_v33  ;;  %3283 = vmatprep.subr.bf16.mxu1 %v6428_v34  ;;  %v6435_v33 = vld [vmem:[%s9397_s5 + $0x2e0] ss:$28 sps:$4 sm:$0xff]  }
 0x134   : > { %v763_v3 = vmax.f32 %v644_v54, 0.0  ;;  %v795_v5 = vmax.f32 %v724_v56, 0.0 }
 0x135   : > { %v812_v6 = vpack.c.bf16 %v762_v60, %v760_v59  ;;  %v7717_v8 = vpack.c.bf16 %v794_v62, %v792_v50  ;;  %v6446_v50 = vld [vmem:[%s9397_s5 + $0x314] ss:$28 sps:$4 sm:$0xff]  }
 0x136   : > { %v647_v9 = vpop.f32.mrb[28].mxu0  ;;  %v813_v10 = vpack.c.bf16 %v763_v3, %v761_v1  ;;  %v7719_v11 = vpack.c.bf16 %v795_v5, %v793_v55  ;;  %v727_v12 = vpop.f32.mrb[28].mxu1  ;;  %3670 = vmatpush1.bf16.msra.mxu0 %v6423_v53  ;;  %3284 = vmatpush1.bf16.msra.mxu1 %v6426_v57  ;;  %v6441_v57 = vld [vmem:[%s9397_s5 + $0x318] ss:$28 sps:$4 sm:$0xff]  }
 0x137   : > { %v648_v15 = vadd.f32 %v647_v9, %v7488_v40  ;;  %v649_v16 = vpop.f32.mrb[29].mxu0  ;;  %v728_v17 = vadd.f32 %v727_v12, %v7488_v40  ;;  %v729_v18 = vpop.f32.mrb[29].mxu1  ;;  %3671 = vmatprep.subr.bf16.mxu0 %v6431_v58  ;;  %3285 = vmatprep.subr.bf16.mxu1 %v6434_v63  ;;  %v6444_v58 = vld [vmem:[%s9397_s5 + $0x310] ss:$28 sps:$4 sm:$0xff]  }
 0x138   : > { %v650_v24 = vadd.f32 %v649_v16, %v7491_v41  ;;  %v651_v25 = vpop.f32.mrb[30].mxu0  ;;  %1330 = vmatprep.mubr.bf16.mxu1 %v813_v10  ;;  %1523 = vmatprep.mubr.bf16.mxu0 %v813_v10  ;;  %v730_v2 = vadd.f32 %v729_v18, %v7491_v41  ;;  %v731_v27 = vpop.f32.mrb[30].mxu1 }
 0x139   : > { %v652_v28 = vadd.f32 %v651_v25, %v7488_v40  ;;  %v653_v29 = vpop.f32.mrb[31].mxu0  ;;  %1331 = vmatmul.mubr.bf16.gmra.mrb[56].mxu1 %v812_v6  ;;  %1524 = vmatmul.mubr.bf16.gmra.mrb[56].mxu0 %v812_v6  ;;  %v796_v30 = vmax.f32 %v728_v17, 0.0  ;;  %v732_v31 = vadd.f32 %v731_v27, %v7488_v40  ;;  %v733_v32 = vpop.f32.mrb[31].mxu1  ;;  %v6443_v40 = vld [vmem:[%s9397_s5 + $0x31c] ss:$28 sps:$4 sm:$0xff]   ;;  %v764_v45 = vmax.f32 %v648_v15, 0.0 }
 0x13a   : > { %v654_v34 = vadd.f32 %v653_v29, %v7491_v41  ;;  %v797_v35 = vmax.f32 %v730_v2, 0.0  ;;  %v734_v38 = vadd.f32 %v733_v32, %v7491_v41  ;;  %3672 = vmatpush1.bf16.msra.mxu0 %v6429_v13  ;;  %3286 = vmatpush1.bf16.msra.mxu1 %v6432_v14  ;;  %v765_v41 = vmax.f32 %v650_v24, 0.0 }
 0x13b   : > { %v766_v48 = vmax.f32 %v652_v28, 0.0  ;;  %v798_v49 = vmax.f32 %v732_v31, 0.0  ;;  %3673 = vmatprep.subr.bf16.mxu0 %v6437_v20  ;;  %3287 = vmatprep.subr.bf16.mxu1 %v6440_v21 }
 0x13c   : > { %v767_v51 = vmax.f32 %v654_v34, 0.0  ;;  %v799_v52 = vmax.f32 %v734_v38, 0.0  ;;  %v6453_v34 = vld [vmem:[%s9397_s5 + $0x388] ss:$28 sps:$4 sm:$0xff]  }
 0x13d   : > { %v814_v53 = vpack.c.bf16 %v766_v48, %v764_v45  ;;  %v830_v54 = vpack.c.bf16 %v798_v49, %v796_v30  ;;  %v6461_v48 = vld [vmem:[%s9397_s5 + $0x3c4] ss:$28 sps:$4 sm:$0xff]   ;;  %v6464_v49 = vld [vmem:[%s9397_s5 + $0x3bc] ss:$28 sps:$4 sm:$0xff]  }
 0x13e   : > { %v815_v55 = vpack.c.bf16 %v767_v51, %v765_v41  ;;  %v831_v56 = vpack.c.bf16 %v799_v52, %v797_v35  ;;  %3674 = vmatpush1.bf16.msra.mxu0 %v6435_v33  ;;  %3288 = vmatpush1.bf16.msra.mxu1 %v6438_v43  ;;  %v6456_v35 = vld [vmem:[%s9397_s5 + $0x380] ss:$28 sps:$4 sm:$0xff]  }
 0x13f   : > { %3675 = vmatprep.subr.bf16.mxu0 %v6443_v40  ;;  %3289 = vmatprep.subr.bf16.mxu1 %v6446_v50 }
 0x140   : > { %1340 = vmatprep.mubr.bf16.mxu1 %v815_v55  ;;  %1533 = vmatprep.mubr.bf16.mxu0 %v815_v55 }
 0x141   : > { %1341 = vmatmul.mubr.bf16.gmra.mrb[60].mxu1 %v814_v53  ;;  %1534 = vmatmul.mubr.bf16.gmra.mrb[60].mxu0 %v814_v53 }
 0x142   : > { %1350 = vmatprep.mubr.bf16.mxu1 %v7503_v7  ;;  %1543 = vmatprep.mubr.bf16.mxu0 %v7503_v7  ;;  %v6452_v7 = vld [vmem:[%s9397_s5 + $0x34c] ss:$28 sps:$4 sm:$0xff]  }
 0x143   : > { %3676 = vmatpush1.bf16.msra.mxu0 %v6441_v57  ;;  %3290 = vmatpush1.bf16.msra.mxu1 %v6444_v58 }
 0x144   : > { %3291 = vmatprep.subr.bf16.mxu1 %v6452_v7  ;;  %v6462_v7 = vld [vmem:[%s9397_s5 + $0x3b8] ss:$28 sps:$4 sm:$0xff]  }
 0x149   : > { %1351 = vmatmul.mubr.bf16.gmra.mrb[64].mxu1 %v7501_v4  ;;  %1544 = vmatmul.mubr.bf16.gmra.mrb[64].mxu0 %v7501_v4  ;;  %v6449_v4 = vld [vmem:[%s9397_s5 + $0x354] ss:$28 sps:$4 sm:$0xff]  }
 0x14a   : > { %1360 = vmatprep.mubr.bf16.mxu1 %v7539_v47  ;;  %1553 = vmatprep.mubr.bf16.mxu0 %v7539_v47  ;;  %v6450_v47 = vld [vmem:[%s9397_s5 + $0x348] ss:$28 sps:$4 sm:$0xff]  }
 0x14b   : > { %3677 = vmatprep.subr.bf16.mxu0 %v6449_v4  ;;  %3292 = vmatpush1.bf16.msra.mxu1 %v6450_v47  ;;  %v6459_v4 = vld [vmem:[%s9397_s5 + $0x3c0] ss:$28 sps:$4 sm:$0xff]  }
 0x151   : > { %1361 = vmatmul.mubr.bf16.gmra.mrb[68].mxu1 %v7537_v44  ;;  %1554 = vmatmul.mubr.bf16.gmra.mrb[68].mxu0 %v7537_v44  ;;  %v6447_v44 = vld [vmem:[%s9397_s5 + $0x350] ss:$28 sps:$4 sm:$0xff]  }
 0x152   : > { %1370 = vmatprep.mubr.bf16.mxu1 %v7575_v22  ;;  %1563 = vmatprep.mubr.bf16.mxu0 %v7575_v22  ;;  %v6458_v22 = vld [vmem:[%s9397_s5 + $0x384] ss:$28 sps:$4 sm:$0xff]  }
 0x153   : > { %3678 = vmatpush1.bf16.msra.mxu0 %v6447_v44  ;;  %3454 = vmatprep.subr.bf16.mxu1 %v6458_v22  ;;  %v6467_v44 = vld [vmem:[%s9397_s5 + $0x3fc] ss:$28 sps:$4 sm:$0xff]  }
 0x159   : > { %1371 = vmatmul.mubr.bf16.gmra.mrb[72].mxu1 %v7573_v19  ;;  %1564 = vmatmul.mubr.bf16.gmra.mrb[72].mxu0 %v7573_v19  ;;  %v6455_v19 = vld [vmem:[%s9397_s5 + $0x38c] ss:$28 sps:$4 sm:$0xff]  }
 0x15a   : > { %1380 = vmatprep.mubr.bf16.mxu1 %v7611_v0  ;;  %1573 = vmatprep.mubr.bf16.mxu0 %v7611_v0  ;;  %v896_v0 = vld [vmem:[%s9396_s4] sm:$0xf] }
 0x15b   : > { %3840 = vmatprep.subr.bf16.mxu0 %v6455_v19 }
 0x161   : > { %1381 = vmatmul.mubr.bf16.gmra.mrb[76].mxu1 %v7609_v61  ;;  %1574 = vmatmul.mubr.bf16.gmra.mrb[76].mxu0 %v7609_v61  ;;  %v9401_v61 = vsub.s32 2, %v7476_v36 }
 0x162   : > { %1390 = vmatprep.mubr.bf16.mxu1 %v7647_v46  ;;  %1583 = vmatprep.mubr.bf16.mxu0 %v7647_v46  ;;  %v7811_v46 = vrot.slane %v896_v0, %v7479_v37 }
 0x169   : > { %1391 = vmatmul.mubr.bf16.gmra.mrb[80].mxu1 %v7645_v42  ;;  %1584 = vmatmul.mubr.bf16.gmra.mrb[80].mxu0 %v7645_v42  ;;  %v9400_v42 = vsub.s32 3, %v7476_v36 }
 0x16a   : > { %1400 = vmatprep.mubr.bf16.mxu1 %v7683_v26  ;;  %1593 = vmatprep.mubr.bf16.mxu0 %v7683_v26  ;;  %v7818_v26 = vrot.slane %v896_v0, %v7485_v39 }
 0x16b   : > { %v7822_v59 = vrot.slane %v896_v0, %v9400_v42 }
 0x171   : > { %1401 = vmatmul.mubr.bf16.gmra.mrb[84].mxu1 %v7681_v23  ;;  %1594 = vmatmul.mubr.bf16.gmra.mrb[84].mxu0 %v7681_v23  ;;  %v7815_v23 = vrot.slane %v896_v0, %v9401_v61 }
 0x172   : > { %1410 = vmatprep.mubr.bf16.mxu1 %v7719_v11  ;;  %1603 = vmatprep.mubr.bf16.mxu0 %v7719_v11 }
 0x179   : > { %1411 = vmatmul.mubr.bf16.gmra.mrb[88].mxu1 %v7717_v8  ;;  %1604 = vmatmul.mubr.bf16.gmra.mrb[88].mxu0 %v7717_v8 }
 0x17a   : > { %1420 = vmatprep.mubr.bf16.mxu1 %v831_v56  ;;  %1613 = vmatprep.mubr.bf16.mxu0 %v831_v56 }
 0x181   : > { %1421 = vmatmul.mubr.bf16.gmra.mrb[92].mxu1 %v830_v54  ;;  %1614 = vmatmul.mubr.bf16.gmra.mrb[92].mxu0 %v830_v54 }
 0x1dc   : > { %v1272_v60 = vpop.f32.mrb[32].mxu1  ;;  %v1465_v62 = vpop.f32.mrb[32].mxu0 }
 0x1dd   : > { %v1273_v63 = vadd.f32 %v1272_v60, %v7811_v46  ;;  %v1466_v1 = vadd.f32 %v1465_v62, %v7815_v23  ;;  %v1274_v3 = vpop.f32.mrb[33].mxu1  ;;  %v1467_v5 = vpop.f32.mrb[33].mxu0  ;;  %v6470_v60 = vld [vmem:[%s9397_s5 + $0x3f4] ss:$28 sps:$4 sm:$0xff]  }
 0x1de   : > { %v1275_v6 = vadd.f32 %v1274_v3, %v7818_v26  ;;  %v1468_v8 = vadd.f32 %v1467_v5, %v7822_v59  ;;  %v1276_v9 = vpop.f32.mrb[34].mxu1  ;;  %v1469_v10 = vpop.f32.mrb[34].mxu0 }
 0x1df   : > { %v1277_v11 = vadd.f32 %v1276_v9, %v7811_v46  ;;  %v1470_v12 = vadd.f32 %v1469_v10, %v7815_v23  ;;  %v1278_v13 = vpop.f32.mrb[35].mxu1  ;;  %v1471_v14 = vpop.f32.mrb[35].mxu0  ;;  %v1624_v17 = vmax.f32 %v1273_v63, 0.0  ;;  %v1626_v18 = vmax.f32 %v1466_v1, 0.0 }
 0x1e0   : > { %v1279_v15 = vadd.f32 %v1278_v13, %v7818_v26  ;;  %v1472_v16 = vadd.f32 %v1471_v14, %v7822_v59  ;;  %v1625_v24 = vmax.f32 %v1275_v6, 0.0  ;;  %v1627_v25 = vmax.f32 %v1468_v8, 0.0  ;;  %v6468_v13 = vld [vmem:[%s9397_s5 + $0x3f0] ss:$28 sps:$4 sm:$0xff]  }
 0x1e1   : > { %v1628_v20 = vmax.f32 %v1277_v11, 0.0  ;;  %v1630_v21 = vmax.f32 %v1470_v12, 0.0  ;;  %v6465_v12 = vld [vmem:[%s9397_s5 + $0x3f8] ss:$28 sps:$4 sm:$0xff]  }
 0x1e2   : > { %v1629_v2 = vmax.f32 %v1279_v15, 0.0  ;;  %v1631_v27 = vmax.f32 %v1472_v16, 0.0 }
 0x1e3   : > { %v7832_v28 = vpack.c.bf16 %v1628_v20, %v1624_v17  ;;  %v7834_v29 = vpack.c.bf16 %v1630_v21, %v1626_v18  ;;  %v6473_v18 = vld [vmem:[%s9397_s5 + $0x434] ss:$28 sps:$4 sm:$0xff]   ;;  %v6476_v20 = vld [vmem:[%s9397_s5 + $0x42c] ss:$28 sps:$4 sm:$0xff]  }
 0x1e4   : > { %v7836_v30 = vpack.c.bf16 %v1629_v2, %v1625_v24  ;;  %v7838_v31 = vpack.c.bf16 %v1631_v27, %v1627_v25  ;;  %v1282_v32 = vpop.f32.mrb[36].mxu1  ;;  %v1475_v33 = vpop.f32.mrb[36].mxu0 }
 0x1e5   : > { %v1283_v38 = vadd.f32 %v1282_v32, %v7811_v46  ;;  %v1476_v43 = vadd.f32 %v1475_v33, %v7815_v23  ;;  %v1284_v40 = vpop.f32.mrb[37].mxu1  ;;  %v1477_v45 = vpop.f32.mrb[37].mxu0 }
 0x1e6   : > { %v1285_v50 = vadd.f32 %v1284_v40, %v7818_v26  ;;  %v1478_v41 = vadd.f32 %v1477_v45, %v7822_v59  ;;  %v1286_v51 = vpop.f32.mrb[38].mxu1  ;;  %v1479_v52 = vpop.f32.mrb[38].mxu0  ;;  %3293 = vmatprep.mubr.bf16.mxu1 %v7836_v30  ;;  %3679 = vmatprep.mubr.bf16.mxu0 %v7836_v30  ;;  %v6474_v40 = vld [vmem:[%s9397_s5 + $0x428] ss:$28 sps:$4 sm:$0xff]  }
 0x1e7   : > { %v1287_v53 = vadd.f32 %v1286_v51, %v7811_v46  ;;  %v1480_v54 = vadd.f32 %v1479_v52, %v7815_v23  ;;  %v1288_v55 = vpop.f32.mrb[39].mxu1  ;;  %v1481_v56 = vpop.f32.mrb[39].mxu0  ;;  %3294 = vmatmul.mubr.bf16.vlgmr.msra.gmra.mrb[96].mxu1 %v7832_v28  ;;  %3680 = vmatmul.mubr.bf16.vlgmr.msra.gmra.mrb[96].mxu0 %v7832_v28  ;;  %v1632_v47 = vmax.f32 %v1283_v38, 0.0  ;;  %v1634_v19 = vmax.f32 %v1476_v43, 0.0  ;;  %v6471_v43 = vld [vmem:[%s9397_s5 + $0x430] ss:$28 sps:$4 sm:$0xff]  }
 0x1e8   : > { %v1289_v57 = vadd.f32 %v1288_v55, %v7818_v26  ;;  %v1482_v58 = vadd.f32 %v1481_v56, %v7822_v59  ;;  %3841 = vmatpush1.bf16.msra.mxu0 %v6453_v34  ;;  %3455 = vmatpush1.bf16.msra.mxu1 %v6456_v35  ;;  %v1633_v62 = vmax.f32 %v1285_v50, 0.0  ;;  %v1635_v63 = vmax.f32 %v1478_v41, 0.0  ;;  %v6479_v45 = vld [vmem:[%s9397_s5 + $0x46c] ss:$28 sps:$4 sm:$0xff]   ;;  %v6482_v51 = vld [vmem:[%s9397_s5 + $0x464] ss:$28 sps:$4 sm:$0xff]  }
 0x1e9   : > { %v1636_v22 = vmax.f32 %v1287_v53, 0.0  ;;  %v1638_v0 = vmax.f32 %v1480_v54, 0.0  ;;  %3842 = vmatprep.subr.bf16.mxu0 %v6461_v48  ;;  %3456 = vmatprep.subr.bf16.mxu1 %v6464_v49 }
 0x1ea   : > { %v1637_v1 = vmax.f32 %v1289_v57, 0.0  ;;  %v1639_v3 = vmax.f32 %v1482_v58, 0.0 }
 0x1eb   : > { %v7876_v5 = vpack.c.bf16 %v1636_v22, %v1632_v47  ;;  %v7878_v6 = vpack.c.bf16 %v1638_v0, %v1634_v19  ;;  %v6477_v47 = vld [vmem:[%s9397_s5 + $0x468] ss:$28 sps:$4 sm:$0xff]   ;;  %v6480_v19 = vld [vmem:[%s9397_s5 + $0x460] ss:$28 sps:$4 sm:$0xff]  }
 0x1ec   : > { %v7880_v8 = vpack.c.bf16 %v1637_v1, %v1633_v62  ;;  %v7882_v9 = vpack.c.bf16 %v1639_v3, %v1635_v63  ;;  %v1292_v10 = vpop.f32.mrb[40].mxu1  ;;  %v1485_v11 = vpop.f32.mrb[40].mxu0  ;;  %3843 = vmatpush1.bf16.msra.mxu0 %v6459_v4  ;;  %3457 = vmatpush1.bf16.msra.mxu1 %v6462_v7  ;;  %v6485_v63 = vld [vmem:[%s9397_s5 + $0x4a4] ss:$28 sps:$4 sm:$0xff]   ;;  %v6488_v1 = vld [vmem:[%s9397_s5 + $0x49c] ss:$28 sps:$4 sm:$0xff]  }
 0x1ed   : > { %v1293_v14 = vadd.f32 %v1292_v10, %v7811_v46  ;;  %v1486_v15 = vadd.f32 %v1485_v11, %v7815_v23  ;;  %v1294_v16 = vpop.f32.mrb[41].mxu1  ;;  %v1487_v17 = vpop.f32.mrb[41].mxu0  ;;  %3844 = vmatprep.subr.bf16.mxu0 %v6467_v44  ;;  %3458 = vmatprep.subr.bf16.mxu1 %v6470_v60 }
 0x1ee   : > { %v1295_v21 = vadd.f32 %v1294_v16, %v7818_v26  ;;  %v1488_v24 = vadd.f32 %v1487_v17, %v7822_v59  ;;  %v1296_v25 = vpop.f32.mrb[42].mxu1  ;;  %v1489_v2 = vpop.f32.mrb[42].mxu0  ;;  %3303 = vmatprep.mubr.bf16.mxu1 %v7880_v8  ;;  %3689 = vmatprep.mubr.bf16.mxu0 %v7880_v8 }
 0x1ef   : > { %v1297_v27 = vadd.f32 %v1296_v25, %v7811_v46  ;;  %v1490_v32 = vadd.f32 %v1489_v2, %v7815_v23  ;;  %v1298_v33 = vpop.f32.mrb[43].mxu1  ;;  %v1491_v34 = vpop.f32.mrb[43].mxu0  ;;  %3304 = vmatmul.mubr.bf16.gmra.mrb[100].mxu1 %v7876_v5  ;;  %3690 = vmatmul.mubr.bf16.gmra.mrb[100].mxu0 %v7876_v5  ;;  %v1640_v48 = vmax.f32 %v1293_v14, 0.0  ;;  %v1642_v49 = vmax.f32 %v1486_v15, 0.0 }
 0x1f0   : > { %v1299_v35 = vadd.f32 %v1298_v33, %v7818_v26  ;;  %v1492_v38 = vadd.f32 %v1491_v34, %v7822_v59  ;;  %3845 = vmatpush1.bf16.msra.mxu0 %v6465_v12  ;;  %3459 = vmatpush1.bf16.msra.mxu1 %v6468_v13  ;;  %v1641_v52 = vmax.f32 %v1295_v21, 0.0  ;;  %v1643_v53 = vmax.f32 %v1488_v24, 0.0  ;;  %v6486_v21 = vld [vmem:[%s9397_s5 + $0x498] ss:$28 sps:$4 sm:$0xff]  }
 0x1f1   : > { %v1644_v50 = vmax.f32 %v1297_v27, 0.0  ;;  %v1646_v41 = vmax.f32 %v1490_v32, 0.0  ;;  %3846 = vmatprep.subr.bf16.mxu0 %v6473_v18  ;;  %3460 = vmatprep.subr.bf16.mxu1 %v6476_v20  ;;  %v6483_v20 = vld [vmem:[%s9397_s5 + $0x4a0] ss:$28 sps:$4 sm:$0xff]   ;;  %v6494_v33 = vld [vmem:[%s9397_s5 + $0x4d4] ss:$28 sps:$4 sm:$0xff]  }
 0x1f2   : > { %v1645_v54 = vmax.f32 %v1299_v35, 0.0  ;;  %v1647_v55 = vmax.f32 %v1492_v38, 0.0  ;;  %v6491_v24 = vld [vmem:[%s9397_s5 + $0x4dc] ss:$28 sps:$4 sm:$0xff]  }
 0x1f3   : > { %v7920_v56 = vpack.c.bf16 %v1644_v50, %v1640_v48  ;;  %v7922_v57 = vpack.c.bf16 %v1646_v41, %v1642_v49 }
 0x1f4   : > { %v7924_v58 = vpack.c.bf16 %v1645_v54, %v1641_v52  ;;  %v7926_v4 = vpack.c.bf16 %v1647_v55, %v1643_v53  ;;  %v1302_v7 = vpop.f32.mrb[44].mxu1  ;;  %v1495_v44 = vpop.f32.mrb[44].mxu0  ;;  %3847 = vmatpush1.bf16.msra.mxu0 %v6471_v43  ;;  %3461 = vmatpush1.bf16.msra.mxu1 %v6474_v40  ;;  %v6492_v52 = vld [vmem:[%s9397_s5 + $0x4d0] ss:$28 sps:$4 sm:$0xff]  }
 0x1f5   : > { %v1303_v22 = vadd.f32 %v1302_v7, %v7811_v46  ;;  %v1496_v0 = vadd.f32 %v1495_v44, %v7815_v23  ;;  %v1304_v60 = vpop.f32.mrb[45].mxu1  ;;  %v1497_v62 = vpop.f32.mrb[45].mxu0  ;;  %3848 = vmatprep.subr.bf16.mxu0 %v6479_v45  ;;  %3462 = vmatprep.subr.bf16.mxu1 %v6482_v51  ;;  %v6489_v51 = vld [vmem:[%s9397_s5 + $0x4d8] ss:$28 sps:$4 sm:$0xff]  }
 0x1f6   : > { %v1305_v3 = vadd.f32 %v1304_v60, %v7818_v26  ;;  %v1498_v10 = vadd.f32 %v1497_v62, %v7822_v59  ;;  %v1306_v11 = vpop.f32.mrb[46].mxu1  ;;  %v1499_v12 = vpop.f32.mrb[46].mxu0  ;;  %3313 = vmatprep.mubr.bf16.mxu1 %v7924_v58  ;;  %3699 = vmatprep.mubr.bf16.mxu0 %v7924_v58  ;;  %v6497_v44 = vld [vmem:[%s9397_s5 + $0x514] ss:$28 sps:$4 sm:$0xff]  }
 0x1f7   : > { %v1307_v13 = vadd.f32 %v1306_v11, %v7811_v46  ;;  %v1500_v14 = vadd.f32 %v1499_v12, %v7815_v23  ;;  %v1308_v15 = vpop.f32.mrb[47].mxu1  ;;  %v1501_v16 = vpop.f32.mrb[47].mxu0  ;;  %3314 = vmatmul.mubr.bf16.gmra.mrb[104].mxu1 %v7920_v56  ;;  %3700 = vmatmul.mubr.bf16.gmra.mrb[104].mxu0 %v7920_v56  ;;  %v1648_v25 = vmax.f32 %v1303_v22, 0.0  ;;  %v1650_v2 = vmax.f32 %v1496_v0, 0.0  ;;  %v6495_v12 = vld [vmem:[%s9397_s5 + $0x510] ss:$28 sps:$4 sm:$0xff]  }
 0x1f8   : > { %v1309_v17 = vadd.f32 %v1308_v15, %v7818_v26  ;;  %v1502_v18 = vadd.f32 %v1501_v16, %v7822_v59  ;;  %3849 = vmatpush1.bf16.msra.mxu0 %v6477_v47  ;;  %3463 = vmatpush1.bf16.msra.mxu1 %v6480_v19  ;;  %v1649_v34 = vmax.f32 %v1305_v3, 0.0  ;;  %v1651_v35 = vmax.f32 %v1498_v10, 0.0  ;;  %v6500_v47 = vld [vmem:[%s9397_s5 + $0x50c] ss:$28 sps:$4 sm:$0xff]  }
 0x1f9   : > { %v1652_v27 = vmax.f32 %v1307_v13, 0.0  ;;  %v1654_v32 = vmax.f32 %v1500_v14, 0.0  ;;  %3850 = vmatprep.subr.bf16.mxu0 %v6485_v63  ;;  %3464 = vmatprep.subr.bf16.mxu1 %v6488_v1  ;;  %v6498_v13 = vld [vmem:[%s9397_s5 + $0x508] ss:$28 sps:$4 sm:$0xff]  }
 0x1fa   : > { %v1653_v38 = vmax.f32 %v1309_v17, 0.0  ;;  %v1655_v43 = vmax.f32 %v1502_v18, 0.0  ;;  %v6503_v14 = vld [vmem:[%s9397_s5 + $0x54c] ss:$28 sps:$4 sm:$0xff]  }
 0x1fb   : > { %v7964_v40 = vpack.c.bf16 %v1652_v27, %v1648_v25  ;;  %v7966_v45 = vpack.c.bf16 %v1654_v32, %v1650_v2 }
 0x1fc   : > { %v7968_v48 = vpack.c.bf16 %v1653_v38, %v1649_v34  ;;  %v7970_v49 = vpack.c.bf16 %v1655_v43, %v1651_v35  ;;  %v1312_v50 = vpop.f32.mrb[48].mxu1  ;;  %v1505_v41 = vpop.f32.mrb[48].mxu0  ;;  %3851 = vmatpush1.bf16.msra.mxu0 %v6483_v20  ;;  %3465 = vmatpush1.bf16.msra.mxu1 %v6486_v21  ;;  %v6506_v20 = vld [vmem:[%s9397_s5 + $0x544] ss:$28 sps:$4 sm:$0xff]  }
 0x1fd   : > { %v1313_v53 = vadd.f32 %v1312_v50, %v7811_v46  ;;  %v1506_v54 = vadd.f32 %v1505_v41, %v7815_v23  ;;  %v1314_v55 = vpop.f32.mrb[49].mxu1  ;;  %v1507_v7 = vpop.f32.mrb[49].mxu0  ;;  %3852 = vmatprep.subr.bf16.mxu0 %v6491_v24  ;;  %3466 = vmatprep.subr.bf16.mxu1 %v6494_v33  ;;  %v6501_v43 = vld [vmem:[%s9397_s5 + $0x548] ss:$28 sps:$4 sm:$0xff]   ;;  %v6504_v50 = vld [vmem:[%s9397_s5 + $0x540] ss:$28 sps:$4 sm:$0xff]  }
 0x1fe   : > { %v1315_v19 = vadd.f32 %v1314_v55, %v7818_v26  ;;  %v1508_v22 = vadd.f32 %v1507_v7, %v7822_v59  ;;  %v1316_v0 = vpop.f32.mrb[50].mxu1  ;;  %v1509_v60 = vpop.f32.mrb[50].mxu0  ;;  %3323 = vmatprep.mubr.bf16.mxu1 %v7968_v48  ;;  %3709 = vmatprep.mubr.bf16.mxu0 %v7968_v48  ;;  %v6512_v55 = vld [vmem:[%s9397_s5 + $0x57c] ss:$28 sps:$4 sm:$0xff]  }
 0x1ff   : > { %v1317_v62 = vadd.f32 %v1316_v0, %v7811_v46  ;;  %v1510_v63 = vadd.f32 %v1509_v60, %v7815_v23  ;;  %v1318_v1 = vpop.f32.mrb[51].mxu1  ;;  %v1511_v3 = vpop.f32.mrb[51].mxu0  ;;  %3324 = vmatmul.mubr.bf16.gmra.mrb[108].mxu1 %v7964_v40  ;;  %3710 = vmatmul.mubr.bf16.gmra.mrb[108].mxu0 %v7964_v40  ;;  %v1656_v15 = vmax.f32 %v1313_v53, 0.0  ;;  %v1658_v16 = vmax.f32 %v1506_v54, 0.0  ;;  %v6509_v54 = vld [vmem:[%s9397_s5 + $0x584] ss:$28 sps:$4 sm:$0xff]  }
 0x200   : > { %v1319_v10 = vadd.f32 %v1318_v1, %v7818_v26  ;;  %v1512_v11 = vadd.f32 %v1511_v3, %v7822_v59  ;;  %3853 = vmatpush1.bf16.msra.mxu0 %v6489_v51  ;;  %3467 = vmatpush1.bf16.msra.mxu1 %v6492_v52  ;;  %v1657_v21 = vmax.f32 %v1315_v19, 0.0  ;;  %v1659_v24 = vmax.f32 %v1508_v22, 0.0  ;;  %v6507_v3 = vld [vmem:[%s9397_s5 + $0x580] ss:$28 sps:$4 sm:$0xff]  }
 0x201   : > { %v1660_v17 = vmax.f32 %v1317_v62, 0.0  ;;  %v1662_v18 = vmax.f32 %v1510_v63, 0.0  ;;  %3854 = vmatprep.subr.bf16.mxu0 %v6497_v44  ;;  %3468 = vmatprep.subr.bf16.mxu1 %v6500_v47 }
 0x202   : > { %v1661_v25 = vmax.f32 %v1319_v10, 0.0  ;;  %v1663_v2 = vmax.f32 %v1512_v11, 0.0  ;;  %v6510_v10 = vld [vmem:[%s9397_s5 + $0x578] ss:$28 sps:$4 sm:$0xff]  }
 0x203   : > { %v8008_v27 = vpack.c.bf16 %v1660_v17, %v1656_v15  ;;  %v8010_v32 = vpack.c.bf16 %v1662_v18, %v1658_v16  ;;  %v6515_v11 = vld [vmem:[%s9397_s5 + $0x5bc] ss:$28 sps:$4 sm:$0xff]   ;;  %v6518_v16 = vld [vmem:[%s9397_s5 + $0x5b4] ss:$28 sps:$4 sm:$0xff]  }
 0x204   : > { %v8012_v33 = vpack.c.bf16 %v1661_v25, %v1657_v21  ;;  %v8014_v34 = vpack.c.bf16 %v1663_v2, %v1659_v24  ;;  %v1322_v35 = vpop.f32.mrb[52].mxu1  ;;  %v1515_v38 = vpop.f32.mrb[52].mxu0  ;;  %3855 = vmatpush1.bf16.msra.mxu0 %v6495_v12  ;;  %3469 = vmatpush1.bf16.msra.mxu1 %v6498_v13 }
 0x205   : > { %9449 = vst [vmem:[#allocation5_spill] sm:$0xff] %v8008_v27  ;;  %v1323_v41 = vadd.f32 %v1322_v35, %v7811_v46  ;;  %v1516_v51 = vadd.f32 %v1515_v38, %v7815_v23  ;;  %v1324_v52 = vpop.f32.mrb[53].mxu1  ;;  %v1517_v53 = vpop.f32.mrb[53].mxu0  ;;  %3856 = vmatprep.subr.bf16.mxu0 %v6503_v14  ;;  %3470 = vmatprep.subr.bf16.mxu1 %v6506_v20 }
 0x206   : > { %v1325_v7 = vadd.f32 %v1324_v52, %v7818_v26  ;;  %v1518_v44 = vadd.f32 %v1517_v53, %v7822_v59  ;;  %v1326_v47 = vpop.f32.mrb[54].mxu1  ;;  %v1519_v19 = vpop.f32.mrb[54].mxu0  ;;  %3333 = vmatprep.mubr.bf16.mxu1 %v8012_v33  ;;  %3719 = vmatprep.mubr.bf16.mxu0 %v8012_v33 }
 0x207   : > { %v1327_v22 = vadd.f32 %v1326_v47, %v7811_v46  ;;  %v1520_v0 = vadd.f32 %v1519_v19, %v7815_v23  ;;  %v1328_v60 = vpop.f32.mrb[55].mxu1  ;;  %v1521_v62 = vpop.f32.mrb[55].mxu0  ;;  %3334 = vmatmul.mubr.bf16.gmra.mrb[112].mxu1 %v8008_v27  ;;  %3720 = vmatmul.mubr.bf16.gmra.mrb[112].mxu0 %v8008_v27  ;;  %v1664_v12 = vmax.f32 %v1323_v41, 0.0  ;;  %v1666_v13 = vmax.f32 %v1516_v51, 0.0  ;;  %v6516_v41 = vld [vmem:[%s9397_s5 + $0x5b0] ss:$28 sps:$4 sm:$0xff]  }
 0x208   : > { %v1329_v63 = vadd.f32 %v1328_v60, %v7818_v26  ;;  %v1522_v1 = vadd.f32 %v1521_v62, %v7822_v59  ;;  %3857 = vmatpush1.bf16.msra.mxu0 %v6501_v43  ;;  %3471 = vmatpush1.bf16.msra.mxu1 %v6504_v50  ;;  %v1665_v17 = vmax.f32 %v1325_v7, 0.0  ;;  %v1667_v18 = vmax.f32 %v1518_v44, 0.0  ;;  %v6513_v50 = vld [vmem:[%s9397_s5 + $0x5b8] ss:$28 sps:$4 sm:$0xff]   ;;  %v6524_v7 = vld [vmem:[%s9397_s5 + $0x5ec] ss:$28 sps:$4 sm:$0xff]  }
 0x209   : > { %v1668_v14 = vmax.f32 %v1327_v22, 0.0  ;;  %v1670_v15 = vmax.f32 %v1520_v0, 0.0  ;;  %3858 = vmatprep.subr.bf16.mxu0 %v6509_v54  ;;  %3472 = vmatprep.subr.bf16.mxu1 %v6512_v55  ;;  %v6521_v55 = vld [vmem:[%s9397_s5 + $0x5f4] ss:$28 sps:$4 sm:$0xff]  }
 0x20a   : > { %v1669_v20 = vmax.f32 %v1329_v63, 0.0  ;;  %v1671_v21 = vmax.f32 %v1522_v1, 0.0 }
 0x20b   : > { %v8052_v24 = vpack.c.bf16 %v1668_v14, %v1664_v12  ;;  %v8054_v25 = vpack.c.bf16 %v1670_v15, %v1666_v13  ;;  %v6527_v12 = vld [vmem:[%s9397_s5 + $0x62c] ss:$28 sps:$4 sm:$0xff]  }
 0x20c   : > { %v8056_v2 = vpack.c.bf16 %v1669_v20, %v1665_v17  ;;  %v8058_v35 = vpack.c.bf16 %v1671_v21, %v1667_v18  ;;  %v1332_v38 = vpop.f32.mrb[56].mxu1  ;;  %v1525_v43 = vpop.f32.mrb[56].mxu0  ;;  %3859 = vmatpush1.bf16.msra.mxu0 %v6507_v3  ;;  %3473 = vmatpush1.bf16.msra.mxu1 %v6510_v10  ;;  %v6519_v10 = vld [vmem:[%s9397_s5 + $0x5f0] ss:$28 sps:$4 sm:$0xff]   ;;  %v6530_v17 = vld [vmem:[%s9397_s5 + $0x624] ss:$28 sps:$4 sm:$0xff]  }
 0x20d   : > { %9450 = vst [vmem:[#allocation6_spill] sm:$0xff] %v8052_v24  ;;  %v1333_v51 = vadd.f32 %v1332_v38, %v7811_v46  ;;  %v1526_v52 = vadd.f32 %v1525_v43, %v7815_v23  ;;  %v1334_v53 = vpop.f32.mrb[57].mxu1  ;;  %v1527_v54 = vpop.f32.mrb[57].mxu0  ;;  %3860 = vmatprep.subr.bf16.mxu0 %v6515_v11  ;;  %3474 = vmatprep.subr.bf16.mxu1 %v6518_v16  ;;  %v6522_v11 = vld [vmem:[%s9397_s5 + $0x5e8] ss:$28 sps:$4 sm:$0xff]  }
 0x20e   : > { %9451 = vst [vmem:[#allocation7_spill] sm:$0xff] %v8056_v2  ;;  %v1335_v44 = vadd.f32 %v1334_v53, %v7818_v26  ;;  %v1528_v47 = vadd.f32 %v1527_v54, %v7822_v59  ;;  %v1336_v19 = vpop.f32.mrb[58].mxu1  ;;  %v1529_v22 = vpop.f32.mrb[58].mxu0  ;;  %3343 = vmatprep.mubr.bf16.mxu1 %v8056_v2  ;;  %3729 = vmatprep.mubr.bf16.mxu0 %v8056_v2  ;;  %v6525_v54 = vld [vmem:[%s9397_s5 + $0x628] ss:$28 sps:$4 sm:$0xff]  }
 0x20f   : > { %v1337_v0 = vadd.f32 %v1336_v19, %v7811_v46  ;;  %v1530_v60 = vadd.f32 %v1529_v22, %v7815_v23  ;;  %v1338_v62 = vpop.f32.mrb[59].mxu1  ;;  %v1531_v63 = vpop.f32.mrb[59].mxu0  ;;  %3344 = vmatmul.mubr.bf16.gmra.mrb[116].mxu1 %v8052_v24  ;;  %3730 = vmatmul.mubr.bf16.gmra.mrb[116].mxu0 %v8052_v24  ;;  %v1672_v13 = vmax.f32 %v1333_v51, 0.0  ;;  %v1674_v14 = vmax.f32 %v1526_v52, 0.0  ;;  %v6533_v22 = vld [vmem:[%s9397_s5 + $0x664] ss:$28 sps:$4 sm:$0xff]  }
 0x210   : > { %v1339_v1 = vadd.f32 %v1338_v62, %v7818_v26  ;;  %v1532_v3 = vadd.f32 %v1531_v63, %v7822_v59  ;;  %3861 = vmatpush1.bf16.msra.mxu0 %v6513_v50  ;;  %3475 = vmatpush1.bf16.msra.mxu1 %v6516_v41  ;;  %v1673_v18 = vmax.f32 %v1335_v44, 0.0  ;;  %v1675_v20 = vmax.f32 %v1528_v47, 0.0 }
 0x211   : > { %v1676_v15 = vmax.f32 %v1337_v0, 0.0  ;;  %v1678_v16 = vmax.f32 %v1530_v60, 0.0  ;;  %3862 = vmatprep.subr.bf16.mxu0 %v6521_v55  ;;  %3476 = vmatprep.subr.bf16.mxu1 %v6524_v7  ;;  %v6528_v55 = vld [vmem:[%s9397_s5 + $0x620] ss:$28 sps:$4 sm:$0xff]  }
 0x212   : > { %v1677_v21 = vmax.f32 %v1339_v1, 0.0  ;;  %v1679_v38 = vmax.f32 %v1532_v3, 0.0  ;;  %v6536_v0 = vld [vmem:[%s9397_s5 + $0x65c] ss:$28 sps:$4 sm:$0xff]  }
 0x213   : > { %v8096_v43 = vpack.c.bf16 %v1676_v15, %v1672_v13  ;;  %v8098_v50 = vpack.c.bf16 %v1678_v16, %v1674_v14  ;;  %v6531_v15 = vld [vmem:[%s9397_s5 + $0x660] ss:$28 sps:$4 sm:$0xff]   ;;  %v6534_v16 = vld [vmem:[%s9397_s5 + $0x658] ss:$28 sps:$4 sm:$0xff]  }
 0x214   : > { %v8100_v41 = vpack.c.bf16 %v1677_v21, %v1673_v18  ;;  %v8102_v51 = vpack.c.bf16 %v1679_v38, %v1675_v20  ;;  %v1342_v52 = vpop.f32.mrb[60].mxu1  ;;  %v1535_v53 = vpop.f32.mrb[60].mxu0  ;;  %3863 = vmatpush1.bf16.msra.mxu0 %v6519_v10  ;;  %3477 = vmatpush1.bf16.msra.mxu1 %v6522_v11 }
 0x215   : > { %9452 = vst [vmem:[#allocation8_spill] sm:$0xff] %v8096_v43  ;;  %v1343_v7 = vadd.f32 %v1342_v52, %v7811_v46  ;;  %v1536_v44 = vadd.f32 %v1535_v53, %v7815_v23  ;;  %v1344_v47 = vpop.f32.mrb[61].mxu1  ;;  %v1537_v19 = vpop.f32.mrb[61].mxu0  ;;  %3864 = vmatprep.subr.bf16.mxu0 %v6527_v12  ;;  %3478 = vmatprep.subr.bf16.mxu1 %v6530_v17  ;;  %v6539_v17 = vld [vmem:[%s9397_s5 + $0x69c] ss:$28 sps:$4 sm:$0xff]  }
 0x216   : > { %9453 = vst [vmem:[#allocation9_spill] sm:$0xff] %v8100_v41  ;;  %v1345_v60 = vadd.f32 %v1344_v47, %v7818_v26  ;;  %v1538_v62 = vadd.f32 %v1537_v19, %v7822_v59  ;;  %v1346_v63 = vpop.f32.mrb[62].mxu1  ;;  %v1539_v1 = vpop.f32.mrb[62].mxu0  ;;  %3353 = vmatprep.mubr.bf16.mxu1 %v8100_v41  ;;  %3739 = vmatprep.mubr.bf16.mxu0 %v8100_v41  ;;  %v6542_v52 = vld [vmem:[%s9397_s5 + $0x694] ss:$28 sps:$4 sm:$0xff]  }
 0x217   : > { %v1347_v3 = vadd.f32 %v1346_v63, %v7811_v46  ;;  %v1540_v10 = vadd.f32 %v1539_v1, %v7815_v23  ;;  %v1348_v11 = vpop.f32.mrb[63].mxu1  ;;  %v1541_v12 = vpop.f32.mrb[63].mxu0  ;;  %3354 = vmatmul.mubr.bf16.gmra.mrb[120].mxu1 %v8096_v43  ;;  %3740 = vmatmul.mubr.bf16.gmra.mrb[120].mxu0 %v8096_v43  ;;  %v1680_v18 = vmax.f32 %v1343_v7, 0.0  ;;  %v1682_v20 = vmax.f32 %v1536_v44, 0.0 }
 0x218   : > { %v1349_v13 = vadd.f32 %v1348_v11, %v7818_v26  ;;  %v1542_v14 = vadd.f32 %v1541_v12, %v7822_v59  ;;  %3865 = vmatpush1.bf16.msra.mxu0 %v6525_v54  ;;  %3479 = vmatpush1.bf16.msra.mxu1 %v6528_v55  ;;  %v1681_v53 = vmax.f32 %v1345_v60, 0.0  ;;  %v1683_v54 = vmax.f32 %v1538_v62, 0.0  ;;  %v6545_v12 = vld [vmem:[%s9397_s5 + $0x6d4] ss:$28 sps:$4 sm:$0xff]  }
 0x219   : > { %v1684_v21 = vmax.f32 %v1347_v3, 0.0  ;;  %v1686_v38 = vmax.f32 %v1540_v10, 0.0  ;;  %3866 = vmatprep.subr.bf16.mxu0 %v6533_v22  ;;  %3480 = vmatprep.subr.bf16.mxu1 %v6536_v0  ;;  %v6537_v22 = vld [vmem:[%s9397_s5 + $0x698] ss:$28 sps:$4 sm:$0xff]   ;;  %v6540_v0 = vld [vmem:[%s9397_s5 + $0x690] ss:$28 sps:$4 sm:$0xff]  }
 0x21a   : > { %v1685_v55 = vmax.f32 %v1349_v13, 0.0  ;;  %v1687_v47 = vmax.f32 %v1542_v14, 0.0  ;;  %v6548_v13 = vld [vmem:[%s9397_s5 + $0x6cc] ss:$28 sps:$4 sm:$0xff]  }
 0x21b   : > { %v8140_v19 = vpack.c.bf16 %v1684_v21, %v1680_v18  ;;  %v8142_v63 = vpack.c.bf16 %v1686_v38, %v1682_v20 }
 0x21c   : > { %v8144_v1 = vpack.c.bf16 %v1685_v55, %v1681_v53  ;;  %v8146_v7 = vpack.c.bf16 %v1687_v47, %v1683_v54  ;;  %v1352_v44 = vpop.f32.mrb[64].mxu1  ;;  %v1545_v3 = vpop.f32.mrb[64].mxu0  ;;  %3867 = vmatpush1.bf16.msra.mxu0 %v6531_v15  ;;  %3481 = vmatpush1.bf16.msra.mxu1 %v6534_v16  ;;  %v6543_v54 = vld [vmem:[%s9397_s5 + $0x6d0] ss:$28 sps:$4 sm:$0xff]   ;;  %v6546_v55 = vld [vmem:[%s9397_s5 + $0x6c8] ss:$28 sps:$4 sm:$0xff]  }
 0x21d   : > { %9454 = vst [vmem:[#allocation10_spill] sm:$0xff] %v8140_v19  ;;  %v1353_v60 = vadd.f32 %v1352_v44, %v7811_v46  ;;  %v1546_v62 = vadd.f32 %v1545_v3, %v7815_v23  ;;  %v1354_v10 = vpop.f32.mrb[65].mxu1  ;;  %v1547_v11 = vpop.f32.mrb[65].mxu0  ;;  %3868 = vmatprep.subr.bf16.mxu0 %v6539_v17  ;;  %3482 = vmatprep.subr.bf16.mxu1 %v6542_v52  ;;  %v6549_v47 = vld [vmem:[%s9397_s5 + $0x1d8] ss:$28 sps:$4 sm:$0xff]  }
 0x21e   : > { %9455 = vst [vmem:[#allocation11_spill] sm:$0xff] %v8144_v1  ;;  %v1355_v14 = vadd.f32 %v1354_v10, %v7818_v26  ;;  %v1548_v15 = vadd.f32 %v1547_v11, %v7822_v59  ;;  %v1356_v16 = vpop.f32.mrb[66].mxu1  ;;  %v1549_v18 = vpop.f32.mrb[66].mxu0  ;;  %3363 = vmatprep.mubr.bf16.mxu1 %v8144_v1  ;;  %3749 = vmatprep.mubr.bf16.mxu0 %v8144_v1 }
 0x21f   : > { %v1357_v17 = vadd.f32 %v1356_v16, %v7811_v46  ;;  %v1550_v20 = vadd.f32 %v1549_v18, %v7815_v23  ;;  %v1358_v21 = vpop.f32.mrb[67].mxu1  ;;  %v1551_v38 = vpop.f32.mrb[67].mxu0  ;;  %3364 = vmatmul.mubr.bf16.gmra.mrb[124].mxu1 %v8140_v19  ;;  %3750 = vmatmul.mubr.bf16.gmra.mrb[124].mxu0 %v8140_v19  ;;  %v1688_v44 = vmax.f32 %v1353_v60, 0.0  ;;  %v1690_v3 = vmax.f32 %v1546_v62, 0.0 }
 0x220   : > { %v1359_v52 = vadd.f32 %v1358_v21, %v7818_v26  ;;  %v1552_v53 = vadd.f32 %v1551_v38, %v7822_v59  ;;  %3869 = vmatpush1.bf16.msra.mxu0 %v6537_v22  ;;  %3483 = vmatpush1.bf16.msra.mxu1 %v6540_v0  ;;  %v6553_v22 = vld [vmem:[%s9397_s5 + $0x14] ss:$28 sps:$4 sm:$0xff]   ;;  %v1689_v0 = vmax.f32 %v1355_v14, 0.0  ;;  %v1691_v16 = vmax.f32 %v1548_v15, 0.0 }
 0x221   : > { %v1692_v10 = vmax.f32 %v1357_v17, 0.0  ;;  %v1694_v11 = vmax.f32 %v1550_v20, 0.0  ;;  %3870 = vmatprep.subr.bf16.mxu0 %v6545_v12  ;;  %3484 = vmatprep.subr.bf16.mxu1 %v6548_v13 }
 0x222   : > { %v1693_v18 = vmax.f32 %v1359_v52, 0.0  ;;  %v1695_v21 = vmax.f32 %v1552_v53, 0.0 }
 0x223   : > { %v8184_v38 = vpack.c.bf16 %v1692_v10, %v1688_v44  ;;  %v8186_v42 = vpack.c.bf16 %v1694_v11, %v1690_v3 }
 0x224   : > { %v8188_v61 = vpack.c.bf16 %v1693_v18, %v1689_v0  ;;  %v8190_v60 = vpack.c.bf16 %v1695_v21, %v1691_v16  ;;  %v1362_v62 = vpop.f32.mrb[68].mxu1  ;;  %v1555_v17 = vpop.f32.mrb[68].mxu0  ;;  %3871 = vmatpush1.bf16.msra.mxu0 %v6543_v54  ;;  %3485 = vmatpush1.bf16.msra.mxu1 %v6546_v55 }
 0x225   : > { %9456 = vst [vmem:[#allocation12_spill] sm:$0xff] %v8184_v38  ;;  %v1363_v12 = vadd.f32 %v1362_v62, %v7811_v46  ;;  %v1556_v13 = vadd.f32 %v1555_v17, %v7815_v23  ;;  %v1364_v14 = vpop.f32.mrb[69].mxu1  ;;  %v1557_v15 = vpop.f32.mrb[69].mxu0  ;;  %5593 = vmatprep.subr.bf16.mxu0 %v6549_v47  ;;  %4033 = vmatprep.subr.bf16.mxu1 %v6553_v22 }
 0x226   : > { %9457 = vst [vmem:[#allocation13_spill] sm:$0xff] %v8188_v61  ;;  %v1365_v20 = vadd.f32 %v1364_v14, %v7818_v26  ;;  %v1558_v52 = vadd.f32 %v1557_v15, %v7822_v59  ;;  %v1366_v53 = vpop.f32.mrb[70].mxu1  ;;  %v1559_v44 = vpop.f32.mrb[70].mxu0  ;;  %3373 = vmatprep.mubr.bf16.mxu1 %v8188_v61  ;;  %3759 = vmatprep.mubr.bf16.mxu0 %v8188_v61 }
 0x227   : > { %v1367_v54 = vadd.f32 %v1366_v53, %v7811_v46  ;;  %v1560_v55 = vadd.f32 %v1559_v44, %v7815_v23  ;;  %v1368_v3 = vpop.f32.mrb[71].mxu1  ;;  %v1561_v10 = vpop.f32.mrb[71].mxu0  ;;  %3374 = vmatmul.mubr.bf16.gmra.mrb[128].mxu1 %v8184_v38  ;;  %3760 = vmatmul.mubr.bf16.gmra.mrb[128].mxu0 %v8184_v38  ;;  %v1696_v22 = vmax.f32 %v1363_v12, 0.0  ;;  %v1698_v0 = vmax.f32 %v1556_v13, 0.0 }
 0x228   : > { %v1369_v47 = vadd.f32 %v1368_v3, %v7818_v26  ;;  %v1562_v11 = vadd.f32 %v1561_v10, %v7822_v59  ;;  %v1697_v21 = vmax.f32 %v1365_v20, 0.0  ;;  %v1699_v62 = vmax.f32 %v1558_v52, 0.0 }
 0x229   : > { %v1700_v16 = vmax.f32 %v1367_v54, 0.0  ;;  %v1702_v18 = vmax.f32 %v1560_v55, 0.0 }
 0x22a   : > { %v1701_v17 = vmax.f32 %v1369_v47, 0.0  ;;  %v1703_v14 = vmax.f32 %v1562_v11, 0.0 }
 0x22b   : > { %v8204_v15 = vpack.c.bf16 %v1700_v16, %v1696_v22  ;;  %v8206_v53 = vpack.c.bf16 %v1702_v18, %v1698_v0 }
 0x22c   : > { %v8208_v44 = vpack.c.bf16 %v1701_v17, %v1697_v21  ;;  %v8210_v39 = vpack.c.bf16 %v1703_v14, %v1699_v62  ;;  %v1372_v36 = vpop.f32.mrb[72].mxu1  ;;  %v1565_v3 = vpop.f32.mrb[72].mxu0 }
 0x22d   : > { %9458 = vst [vmem:[#allocation14_spill] sm:$0xff] %v8204_v15  ;;  %v1373_v10 = vadd.f32 %v1372_v36, %v7811_v46  ;;  %v1566_v12 = vadd.f32 %v1565_v3, %v7815_v23  ;;  %v1374_v13 = vpop.f32.mrb[73].mxu1  ;;  %v1567_v54 = vpop.f32.mrb[73].mxu0 }
 0x22e   : > { %9459 = vst [vmem:[#allocation15_spill] sm:$0xff] %v8208_v44  ;;  %v1375_v20 = vadd.f32 %v1374_v13, %v7818_v26  ;;  %v1568_v52 = vadd.f32 %v1567_v54, %v7822_v59  ;;  %v1376_v55 = vpop.f32.mrb[74].mxu1  ;;  %v1569_v47 = vpop.f32.mrb[74].mxu0  ;;  %3383 = vmatprep.mubr.bf16.mxu1 %v8208_v44  ;;  %3769 = vmatprep.mubr.bf16.mxu0 %v8208_v44 }
 0x22f   : > { %v1377_v11 = vadd.f32 %v1376_v55, %v7811_v46  ;;  %v1570_v22 = vadd.f32 %v1569_v47, %v7815_v23  ;;  %v1378_v0 = vpop.f32.mrb[75].mxu1  ;;  %v1571_v36 = vpop.f32.mrb[75].mxu0  ;;  %3384 = vmatmul.mubr.bf16.gmra.mrb[132].mxu1 %v8204_v15  ;;  %3770 = vmatmul.mubr.bf16.gmra.mrb[132].mxu0 %v8204_v15  ;;  %v1704_v21 = vmax.f32 %v1373_v10, 0.0  ;;  %v1706_v62 = vmax.f32 %v1566_v12, 0.0 }
 0x230   : > { %v1379_v16 = vadd.f32 %v1378_v0, %v7818_v26  ;;  %v1572_v18 = vadd.f32 %v1571_v36, %v7822_v59  ;;  %v1705_v3 = vmax.f32 %v1375_v20, 0.0  ;;  %v1707_v13 = vmax.f32 %v1568_v52, 0.0 }
 0x231   : > { %v1708_v17 = vmax.f32 %v1377_v11, 0.0  ;;  %v1710_v14 = vmax.f32 %v1570_v22, 0.0 }
 0x232   : > { %v1709_v54 = vmax.f32 %v1379_v16, 0.0  ;;  %v1711_v55 = vmax.f32 %v1572_v18, 0.0 }
 0x233   : > { %v8224_v37 = vpack.c.bf16 %v1708_v17, %v1704_v21  ;;  %v8226_v47 = vpack.c.bf16 %v1710_v14, %v1706_v62 }
 0x234   : > { %v8228_v44 = vpack.c.bf16 %v1709_v54, %v1705_v3  ;;  %v8230_v38 = vpack.c.bf16 %v1711_v55, %v1707_v13  ;;  %v1382_v15 = vpop.f32.mrb[76].mxu1  ;;  %v1575_v0 = vpop.f32.mrb[76].mxu0 }
 0x235   : > { %9460 = vst [vmem:[#allocation16_spill] sm:$0xff] %v8224_v37  ;;  %v1383_v36 = vadd.f32 %v1382_v15, %v7811_v46  ;;  %v1576_v10 = vadd.f32 %v1575_v0, %v7815_v23  ;;  %v1384_v12 = vpop.f32.mrb[77].mxu1  ;;  %v1577_v11 = vpop.f32.mrb[77].mxu0 }
 0x236   : > { %9461 = vst [vmem:[#allocation17_spill] sm:$0xff] %v8228_v44  ;;  %v1385_v20 = vadd.f32 %v1384_v12, %v7818_v26  ;;  %v1578_v52 = vadd.f32 %v1577_v11, %v7822_v59  ;;  %v1386_v22 = vpop.f32.mrb[78].mxu1  ;;  %v1579_v16 = vpop.f32.mrb[78].mxu0  ;;  %3393 = vmatprep.mubr.bf16.mxu1 %v8228_v44  ;;  %3779 = vmatprep.mubr.bf16.mxu0 %v8228_v44 }
 0x237   : > { %v1387_v18 = vadd.f32 %v1386_v22, %v7811_v46  ;;  %v1580_v21 = vadd.f32 %v1579_v16, %v7815_v23  ;;  %v1388_v62 = vpop.f32.mrb[79].mxu1  ;;  %v1581_v15 = vpop.f32.mrb[79].mxu0  ;;  %3394 = vmatmul.mubr.bf16.gmra.mrb[136].mxu1 %v8224_v37  ;;  %3780 = vmatmul.mubr.bf16.gmra.mrb[136].mxu0 %v8224_v37  ;;  %v1712_v3 = vmax.f32 %v1383_v36, 0.0  ;;  %v1714_v13 = vmax.f32 %v1576_v10, 0.0 }
 0x238   : > { %v1389_v17 = vadd.f32 %v1388_v62, %v7818_v26  ;;  %v1582_v14 = vadd.f32 %v1581_v15, %v7822_v59  ;;  %v1713_v0 = vmax.f32 %v1385_v20, 0.0  ;;  %v1715_v12 = vmax.f32 %v1578_v52, 0.0 }
 0x239   : > { %v1716_v54 = vmax.f32 %v1387_v18, 0.0  ;;  %v1718_v55 = vmax.f32 %v1580_v21, 0.0 }
 0x23a   : > { %v1717_v11 = vmax.f32 %v1389_v17, 0.0  ;;  %v1719_v22 = vmax.f32 %v1582_v14, 0.0 }
 0x23b   : > { %v8244_v44 = vpack.c.bf16 %v1716_v54, %v1712_v3  ;;  %v8246_v16 = vpack.c.bf16 %v1718_v55, %v1714_v13 }
 0x23c   : > { %v8248_v61 = vpack.c.bf16 %v1717_v11, %v1713_v0  ;;  %v8250_v19 = vpack.c.bf16 %v1719_v22, %v1715_v12  ;;  %v1392_v37 = vpop.f32.mrb[80].mxu1  ;;  %v1585_v62 = vpop.f32.mrb[80].mxu0 }
 0x23d   : > { %9462 = vst [vmem:[#allocation18_spill] sm:$0xff] %v8244_v44  ;;  %v1393_v15 = vadd.f32 %v1392_v37, %v7811_v46  ;;  %v1586_v36 = vadd.f32 %v1585_v62, %v7815_v23  ;;  %v1394_v10 = vpop.f32.mrb[81].mxu1  ;;  %v1587_v18 = vpop.f32.mrb[81].mxu0 }
 0x23e   : > { %9463 = vst [vmem:[#allocation19_spill] sm:$0xff] %v8248_v61  ;;  %v1395_v20 = vadd.f32 %v1394_v10, %v7818_v26  ;;  %v1588_v52 = vadd.f32 %v1587_v18, %v7822_v59  ;;  %v1396_v21 = vpop.f32.mrb[82].mxu1  ;;  %v1589_v17 = vpop.f32.mrb[82].mxu0  ;;  %3403 = vmatprep.mubr.bf16.mxu1 %v8248_v61  ;;  %3789 = vmatprep.mubr.bf16.mxu0 %v8248_v61 }
 0x23f   : > { %v1397_v14 = vadd.f32 %v1396_v21, %v7811_v46  ;;  %v1590_v3 = vadd.f32 %v1589_v17, %v7815_v23  ;;  %v1398_v13 = vpop.f32.mrb[83].mxu1  ;;  %v1591_v37 = vpop.f32.mrb[83].mxu0  ;;  %3404 = vmatmul.mubr.bf16.gmra.mrb[140].mxu1 %v8244_v44  ;;  %3790 = vmatmul.mubr.bf16.gmra.mrb[140].mxu0 %v8244_v44  ;;  %v1720_v0 = vmax.f32 %v1393_v15, 0.0  ;;  %v1722_v12 = vmax.f32 %v1586_v36, 0.0 }
 0x240   : > { %v1399_v54 = vadd.f32 %v1398_v13, %v7818_v26  ;;  %v1592_v55 = vadd.f32 %v1591_v37, %v7822_v59  ;;  %v1721_v62 = vmax.f32 %v1395_v20, 0.0  ;;  %v1723_v10 = vmax.f32 %v1588_v52, 0.0 }
 0x241   : > { %v1724_v11 = vmax.f32 %v1397_v14, 0.0  ;;  %v1726_v22 = vmax.f32 %v1590_v3, 0.0 }
 0x242   : > { %v1725_v18 = vmax.f32 %v1399_v54, 0.0  ;;  %v1727_v21 = vmax.f32 %v1592_v55, 0.0 }
 0x243   : > { %v8264_v61 = vpack.c.bf16 %v1724_v11, %v1720_v0  ;;  %v8266_v17 = vpack.c.bf16 %v1726_v22, %v1722_v12 }
 0x244   : > { %v8268_v1 = vpack.c.bf16 %v1725_v18, %v1721_v62  ;;  %v8270_v43 = vpack.c.bf16 %v1727_v21, %v1723_v10  ;;  %v1402_v44 = vpop.f32.mrb[84].mxu1  ;;  %v1595_v13 = vpop.f32.mrb[84].mxu0 }
 0x245   : > { %9464 = vst [vmem:[#allocation20_spill] sm:$0xff] %v8264_v61  ;;  %v1403_v37 = vadd.f32 %v1402_v44, %v7811_v46  ;;  %v1596_v15 = vadd.f32 %v1595_v13, %v7815_v23  ;;  %v1404_v36 = vpop.f32.mrb[85].mxu1  ;;  %v1597_v14 = vpop.f32.mrb[85].mxu0 }
 0x246   : > { %9465 = vst [vmem:[#allocation21_spill] sm:$0xff] %v8268_v1  ;;  %v1405_v20 = vadd.f32 %v1404_v36, %v7818_v26  ;;  %v1598_v52 = vadd.f32 %v1597_v14, %v7822_v59  ;;  %v1406_v3 = vpop.f32.mrb[86].mxu1  ;;  %v1599_v54 = vpop.f32.mrb[86].mxu0  ;;  %3413 = vmatprep.mubr.bf16.mxu1 %v8268_v1  ;;  %3799 = vmatprep.mubr.bf16.mxu0 %v8268_v1 }
 0x247   : > { %v1407_v55 = vadd.f32 %v1406_v3, %v7811_v46  ;;  %v1600_v0 = vadd.f32 %v1599_v54, %v7815_v23  ;;  %v1408_v12 = vpop.f32.mrb[87].mxu1  ;;  %v1601_v44 = vpop.f32.mrb[87].mxu0  ;;  %3414 = vmatmul.mubr.bf16.gmra.mrb[144].mxu1 %v8264_v61  ;;  %3800 = vmatmul.mubr.bf16.gmra.mrb[144].mxu0 %v8264_v61  ;;  %v1728_v62 = vmax.f32 %v1403_v37, 0.0  ;;  %v1730_v10 = vmax.f32 %v1596_v15, 0.0 }
 0x248   : > { %v1409_v11 = vadd.f32 %v1408_v12, %v7818_v26  ;;  %v1602_v22 = vadd.f32 %v1601_v44, %v7822_v59  ;;  %v1729_v13 = vmax.f32 %v1405_v20, 0.0  ;;  %v1731_v36 = vmax.f32 %v1598_v52, 0.0 }
 0x249   : > { %v1732_v18 = vmax.f32 %v1407_v55, 0.0  ;;  %v1734_v21 = vmax.f32 %v1600_v0, 0.0 }
 0x24a   : > { %v1733_v14 = vmax.f32 %v1409_v11, 0.0  ;;  %v1735_v3 = vmax.f32 %v1602_v22, 0.0 }
 0x24b   : > { %v8284_v1 = vpack.c.bf16 %v1732_v18, %v1728_v62  ;;  %v8286_v54 = vpack.c.bf16 %v1734_v21, %v1730_v10 }
 0x24c   : > { %v8288_v41 = vpack.c.bf16 %v1733_v14, %v1729_v13  ;;  %v8290_v24 = vpack.c.bf16 %v1735_v3, %v1731_v36  ;;  %v1412_v61 = vpop.f32.mrb[88].mxu1  ;;  %v1605_v12 = vpop.f32.mrb[88].mxu0 }
 0x24d   : > { %9466 = vst [vmem:[#allocation22_spill] sm:$0xff] %v8284_v1  ;;  %v1413_v44 = vadd.f32 %v1412_v61, %v7811_v46  ;;  %v1606_v37 = vadd.f32 %v1605_v12, %v7815_v23  ;;  %v1414_v15 = vpop.f32.mrb[89].mxu1  ;;  %v1607_v55 = vpop.f32.mrb[89].mxu0 }
 0x24e   : > { %9467 = vst [vmem:[#allocation23_spill] sm:$0xff] %v8288_v41  ;;  %v1415_v20 = vadd.f32 %v1414_v15, %v7818_v26  ;;  %v1608_v52 = vadd.f32 %v1607_v55, %v7822_v59  ;;  %v1416_v0 = vpop.f32.mrb[90].mxu1  ;;  %v1609_v11 = vpop.f32.mrb[90].mxu0  ;;  %3423 = vmatprep.mubr.bf16.mxu1 %v8288_v41  ;;  %3809 = vmatprep.mubr.bf16.mxu0 %v8288_v41 }
 0x24f   : > { %v1417_v22 = vadd.f32 %v1416_v0, %v7811_v46  ;;  %v1610_v62 = vadd.f32 %v1609_v11, %v7815_v23  ;;  %v1418_v10 = vpop.f32.mrb[91].mxu1  ;;  %v1611_v61 = vpop.f32.mrb[91].mxu0  ;;  %3424 = vmatmul.mubr.bf16.gmra.mrb[148].mxu1 %v8284_v1  ;;  %3810 = vmatmul.mubr.bf16.gmra.mrb[148].mxu0 %v8284_v1  ;;  %v1736_v13 = vmax.f32 %v1413_v44, 0.0  ;;  %v1738_v36 = vmax.f32 %v1606_v37, 0.0 }
 0x250   : > { %v1419_v18 = vadd.f32 %v1418_v10, %v7818_v26  ;;  %v1612_v21 = vadd.f32 %v1611_v61, %v7822_v59  ;;  %v1737_v12 = vmax.f32 %v1415_v20, 0.0  ;;  %v1739_v15 = vmax.f32 %v1608_v52, 0.0 }
 0x251   : > { %v1740_v14 = vmax.f32 %v1417_v22, 0.0  ;;  %v1742_v3 = vmax.f32 %v1610_v62, 0.0 }
 0x252   : > { %v1741_v55 = vmax.f32 %v1419_v18, 0.0  ;;  %v1743_v0 = vmax.f32 %v1612_v21, 0.0 }
 0x253   : > { %v8304_v41 = vpack.c.bf16 %v1740_v14, %v1736_v13  ;;  %v8306_v11 = vpack.c.bf16 %v1742_v3, %v1738_v36 }
 0x254   : > { %v8308_v2 = vpack.c.bf16 %v1741_v55, %v1737_v12  ;;  %v8310_v27 = vpack.c.bf16 %v1743_v0, %v1739_v15  ;;  %v1422_v1 = vpop.f32.mrb[92].mxu1  ;;  %v1615_v10 = vpop.f32.mrb[92].mxu0 }
 0x255   : > { %v1423_v61 = vadd.f32 %v1422_v1, %v7811_v46  ;;  %v1616_v44 = vadd.f32 %v1615_v10, %v7815_v23  ;;  %v1424_v37 = vpop.f32.mrb[93].mxu1  ;;  %v1617_v22 = vpop.f32.mrb[93].mxu0 }
 0x256   : > { %9468 = vst [vmem:[#allocation24_spill] sm:$0xff] %v8308_v2  ;;  %v1425_v20 = vadd.f32 %v1424_v37, %v7818_v26  ;;  %v1618_v52 = vadd.f32 %v1617_v22, %v7822_v59  ;;  %v1426_v62 = vpop.f32.mrb[94].mxu1  ;;  %v1619_v18 = vpop.f32.mrb[94].mxu0  ;;  %3433 = vmatprep.mubr.bf16.mxu1 %v8308_v2  ;;  %3819 = vmatprep.mubr.bf16.mxu0 %v8308_v2 }
 0x257   : > { %v1427_v21 = vadd.f32 %v1426_v62, %v7811_v46  ;;  %v1620_v13 = vadd.f32 %v1619_v18, %v7815_v23  ;;  %v1428_v36 = vpop.f32.mrb[95].mxu1  ;;  %v1621_v1 = vpop.f32.mrb[95].mxu0  ;;  %3434 = vmatmul.mubr.bf16.gmra.mrb[152].mxu1 %v8304_v41  ;;  %3820 = vmatmul.mubr.bf16.gmra.mrb[152].mxu0 %v8304_v41  ;;  %v1744_v12 = vmax.f32 %v1423_v61, 0.0  ;;  %v1746_v15 = vmax.f32 %v1616_v44, 0.0  ;;  %v6556_v61 = vld [vmem:[%s9397_s5 + $0x4c] ss:$28 sps:$4 sm:$0xff]  }
 0x258   : > { %v1429_v14 = vadd.f32 %v1428_v36, %v7818_v26  ;;  %v1622_v3 = vadd.f32 %v1621_v1, %v7822_v59  ;;  %v1745_v10 = vmax.f32 %v1425_v20, 0.0  ;;  %v1747_v37 = vmax.f32 %v1618_v52, 0.0  ;;  %v6550_v26 = vld [vmem:[%s9397_s5 + $0x18] ss:$28 sps:$4 sm:$0xff]   ;;  %v6551_v59 = vld [vmem:[%s9397_s5 + $0x10] ss:$28 sps:$4 sm:$0xff]  }
 0x259   : > { %v1748_v55 = vmax.f32 %v1427_v21, 0.0  ;;  %v1750_v0 = vmax.f32 %v1620_v13, 0.0  ;;  %v6557_v44 = vld [vmem:[%s9397_s5 + $0x210] ss:$28 sps:$4 sm:$0xff]   ;;  %v6554_v52 = vld [vmem:[%s9397_s5 + $0x48] ss:$28 sps:$4 sm:$0xff]  }
 0x25a   : > { %v1749_v22 = vmax.f32 %v1429_v14, 0.0  ;;  %v1751_v46 = vmax.f32 %v1622_v3, 0.0  ;;  %v6558_v20 = vld [vmem:[%s9397_s5 + $0x50] ss:$28 sps:$4 sm:$0xff]   ;;  %v6565_v21 = vld [vmem:[%s9397_s5 + $0x248] ss:$28 sps:$4 sm:$0xff]  }
 0x25b   : > { %v8324_v62 = vpack.c.bf16 %v1748_v55, %v1744_v12  ;;  %v8326_v23 = vpack.c.bf16 %v1750_v0, %v1746_v15  ;;  %v6561_v13 = vld [vmem:[%s9397_s5 + $0x84] ss:$28 sps:$4 sm:$0xff]   ;;  %v6564_v14 = vld [vmem:[%s9397_s5 + $0xbc] ss:$28 sps:$4 sm:$0xff]   ;;  %v6569_v55 = vld [vmem:[%s9397_s5 + $0xf4] ss:$28 sps:$4 sm:$0xff]  }
 0x25c   : > { %v8328_v18 = vpack.c.bf16 %v1749_v22, %v1745_v10  ;;  %v8330_v2 = vpack.c.bf16 %v1751_v46, %v1747_v37  ;;  %v6559_v36 = vld [vmem:[%s9397_s5 + $0x80] ss:$28 sps:$4 sm:$0xff]   ;;  %v6566_v1 = vld [vmem:[%s9397_s5 + $0x88] ss:$28 sps:$4 sm:$0xff]   ;;  %v6562_v12 = vld [vmem:[%s9397_s5 + $0xb8] ss:$28 sps:$4 sm:$0xff]  }
 0x25d   : > { %v6573_v3 = vld [vmem:[%s9397_s5 + $0x280] ss:$28 sps:$4 sm:$0xff]   ;;  %v6581_v0 = vld [vmem:[%s9397_s5 + $0x2b8] ss:$28 sps:$4 sm:$0xff]   ;;  %v6567_v10 = vld [vmem:[%s9397_s5 + $0xf0] ss:$28 sps:$4 sm:$0xff]  }
 0x25e   : > { %3443 = vmatprep.mubr.bf16.mxu1 %v8328_v18  ;;  %3829 = vmatprep.mubr.bf16.mxu0 %v8328_v18  ;;  %v6574_v15 = vld [vmem:[%s9397_s5 + $0xc0] ss:$28 sps:$4 sm:$0xff]   ;;  %v6582_v37 = vld [vmem:[%s9397_s5 + $0xf8] ss:$28 sps:$4 sm:$0xff]   ;;  %v6572_v22 = vld [vmem:[%s9397_s5 + $0x12c] ss:$28 sps:$4 sm:$0xff]  }
 0x25f   : > { %3444 = vmatmul.mubr.bf16.gmra.mrb[156].mxu1 %v8324_v62  ;;  %3830 = vmatmul.mubr.bf16.gmra.mrb[156].mxu0 %v8324_v62  ;;  %v6589_v46 = vld [vmem:[%s9397_s5 + $0x2f0] ss:$28 sps:$4 sm:$0xff]  }
 0x260   : > { %3486 = vmatprep.mubr.bf16.mxu1 %v7838_v31  ;;  %3872 = vmatprep.mubr.bf16.mxu0 %v7838_v31 }
 0x267   : > { %3487 = vmatmul.mubr.bf16.vlgmr.msra.gmra.mrb[96].mxu1 %v7834_v29  ;;  %3873 = vmatmul.mubr.bf16.vlgmr.msra.gmra.mrb[96].mxu0 %v7834_v29 }
 0x268   : > { %5594 = vmatpush3.bf16.msra.mxu0 %v6550_v26  ;;  %3496 = vmatprep.mubr.bf16.mxu1 %v7882_v9  ;;  %v6570_v26 = vld [vmem:[%s9397_s5 + $0x128] ss:$28 sps:$4 sm:$0xff]  }
 0x269   : > { %3882 = vmatprep.mubr.bf16.mxu0 %v7882_v9  ;;  %4034 = vmatpush1.bf16.msra.mxu1 %v6551_v59  ;;  %v6590_v59 = vld [vmem:[%s9397_s5 + $0x130] ss:$28 sps:$4 sm:$0xff]  }
 0x26a   : > { %4035 = vmatprep.subr.bf16.mxu1 %v6556_v61  ;;  %5595 = vmatprep.subr.bf16.mxu0 %v6557_v44  ;;  %v6577_v61 = vld [vmem:[%s9397_s5 + $0x164] ss:$28 sps:$4 sm:$0xff]  }
 0x26b   : > { %v6597_v44 = vld [vmem:[%s9397_s5 + $0x328] ss:$28 sps:$4 sm:$0xff]  }
 0x26c   : > { %5596 = vmatpush3.bf16.msra.mxu0 %v6558_v20  ;;  %v6575_v20 = vld [vmem:[%s9397_s5 + $0x160] ss:$28 sps:$4 sm:$0xff]  }
 0x26d   : > { %4036 = vmatpush1.bf16.msra.mxu1 %v6554_v52  ;;  %5597 = vmatprep.subr.bf16.mxu0 %v6565_v21  ;;  %v6598_v52 = vld [vmem:[%s9397_s5 + $0x168] ss:$28 sps:$4 sm:$0xff]   ;;  %v6580_v21 = vld [vmem:[%s9397_s5 + $0x19c] ss:$28 sps:$4 sm:$0xff]  }
 0x26e   : > { %4037 = vmatprep.subr.bf16.mxu1 %v6561_v13  ;;  %v6605_v13 = vld [vmem:[%s9397_s5 + $0x360] ss:$28 sps:$4 sm:$0xff]  }
 0x26f   : > { %3497 = vmatmul.mubr.bf16.gmra.mrb[100].mxu1 %v7878_v6  ;;  %3883 = vmatmul.mubr.bf16.gmra.mrb[100].mxu0 %v7878_v6 }
 0x270   : > { %3506 = vmatprep.mubr.bf16.mxu1 %v7926_v4  ;;  %3892 = vmatprep.mubr.bf16.mxu0 %v7926_v4 }
 0x271   : > { %4038 = vmatpush1.bf16.msra.mxu1 %v6559_v36  ;;  %5598 = vmatpush3.bf16.msra.mxu0 %v6566_v1  ;;  %v6578_v36 = vld [vmem:[%s9397_s5 + $0x198] ss:$28 sps:$4 sm:$0xff]   ;;  %v6606_v1 = vld [vmem:[%s9397_s5 + $0x1a0] ss:$28 sps:$4 sm:$0xff]  }
 0x272   : > { %4039 = vmatprep.subr.bf16.mxu1 %v6564_v14  ;;  %5599 = vmatprep.subr.bf16.mxu0 %v6573_v3  ;;  %v6585_v14 = vld [vmem:[%s9397_s5 + $0x1d4] ss:$28 sps:$4 sm:$0xff]  }
 0x273   : > { %v6613_v3 = vld [vmem:[%s9397_s5 + $0x558] ss:$28 sps:$4 sm:$0xff]  }
 0x275   : > { %4040 = vmatpush1.bf16.msra.mxu1 %v6562_v12  ;;  %5600 = vmatpush3.bf16.msra.mxu0 %v6574_v15  ;;  %v6583_v12 = vld [vmem:[%s9397_s5 + $0x1d0] ss:$28 sps:$4 sm:$0xff]  }
 0x276   : > { %4041 = vmatprep.subr.bf16.mxu1 %v6569_v55  ;;  %5601 = vmatprep.subr.bf16.mxu0 %v6581_v0  ;;  %v6588_v15 = vld [vmem:[%s9397_s5 + $0x20c] ss:$28 sps:$4 sm:$0xff]   ;;  %v6593_v0 = vld [vmem:[%s9397_s5 + $0x244] ss:$28 sps:$4 sm:$0xff]  }
 0x277   : > { %3507 = vmatmul.mubr.bf16.gmra.mrb[104].mxu1 %v7922_v57  ;;  %3893 = vmatmul.mubr.bf16.gmra.mrb[104].mxu0 %v7922_v57  ;;  %v6586_v55 = vld [vmem:[%s9397_s5 + $0x208] ss:$28 sps:$4 sm:$0xff]  }
 0x278   : > { %3516 = vmatprep.mubr.bf16.mxu1 %v7970_v49  ;;  %3902 = vmatprep.mubr.bf16.mxu0 %v7970_v49 }
 0x279   : > { %4042 = vmatpush1.bf16.msra.mxu1 %v6567_v10  ;;  %5602 = vmatpush3.bf16.msra.mxu0 %v6582_v37  ;;  %v6591_v10 = vld [vmem:[%s9397_s5 + $0x240] ss:$28 sps:$4 sm:$0xff]  }
 0x27a   : > { %4043 = vmatprep.subr.bf16.mxu1 %v6572_v22  ;;  %5603 = vmatprep.subr.bf16.mxu0 %v6589_v46  ;;  %v6596_v37 = vld [vmem:[%s9397_s5 + $0x27c] ss:$28 sps:$4 sm:$0xff]   ;;  %v6601_v46 = vld [vmem:[%s9397_s5 + $0x2b4] ss:$28 sps:$4 sm:$0xff]  }
 0x27b   : > { %v6594_v22 = vld [vmem:[%s9397_s5 + $0x278] ss:$28 sps:$4 sm:$0xff]  }
 0x27d   : > { %4044 = vmatpush1.bf16.msra.mxu1 %v6570_v26  ;;  %5604 = vmatpush3.bf16.msra.mxu0 %v6590_v59  ;;  %v6599_v26 = vld [vmem:[%s9397_s5 + $0x2b0] ss:$28 sps:$4 sm:$0xff]  }
 0x27e   : > { %4045 = vmatprep.subr.bf16.mxu1 %v6577_v61  ;;  %5605 = vmatprep.subr.bf16.mxu0 %v6597_v44  ;;  %v6604_v59 = vld [vmem:[%s9397_s5 + $0x2ec] ss:$28 sps:$4 sm:$0xff]   ;;  %v6609_v44 = vld [vmem:[%s9397_s5 + $0x324] ss:$28 sps:$4 sm:$0xff]  }
 0x27f   : > { %3517 = vmatmul.mubr.bf16.gmra.mrb[108].mxu1 %v7966_v45  ;;  %3903 = vmatmul.mubr.bf16.gmra.mrb[108].mxu0 %v7966_v45  ;;  %v6602_v61 = vld [vmem:[%s9397_s5 + $0x2e8] ss:$28 sps:$4 sm:$0xff]  }
 0x280   : > { %3526 = vmatprep.mubr.bf16.mxu1 %v8014_v34  ;;  %3912 = vmatprep.mubr.bf16.mxu0 %v8014_v34 }
 0x281   : > { %4046 = vmatpush1.bf16.msra.mxu1 %v6575_v20  ;;  %5606 = vmatpush3.bf16.msra.mxu0 %v6598_v52  ;;  %v6607_v20 = vld [vmem:[%s9397_s5 + $0x320] ss:$28 sps:$4 sm:$0xff]  }
 0x282   : > { %4047 = vmatprep.subr.bf16.mxu1 %v6580_v21  ;;  %5607 = vmatprep.subr.bf16.mxu0 %v6605_v13  ;;  %v6612_v52 = vld [vmem:[%s9397_s5 + $0x35c] ss:$28 sps:$4 sm:$0xff]   ;;  %v6617_v13 = vld [vmem:[%s9397_s5 + $0x394] ss:$28 sps:$4 sm:$0xff]  }
 0x283   : > { %v6610_v21 = vld [vmem:[%s9397_s5 + $0x358] ss:$28 sps:$4 sm:$0xff]  }
 0x285   : > { %4048 = vmatpush1.bf16.msra.mxu1 %v6578_v36  ;;  %5608 = vmatpush3.bf16.msra.mxu0 %v6606_v1  ;;  %v6614_v36 = vld [vmem:[%s9397_s5 + $0x398] ss:$28 sps:$4 sm:$0xff]   ;;  %v6615_v1 = vld [vmem:[%s9397_s5 + $0x390] ss:$28 sps:$4 sm:$0xff]  }
 0x286   : > { %4049 = vmatprep.subr.bf16.mxu1 %v6585_v14  ;;  %5705 = vmatprep.subr.bf16.mxu0 %v6613_v3  ;;  %v6620_v14 = vld [vmem:[%s9397_s5 + $0x3cc] ss:$28 sps:$4 sm:$0xff]  }
 0x287   : > { %3527 = vmatmul.mubr.bf16.gmra.mrb[112].mxu1 %v8010_v32  ;;  %3913 = vmatmul.mubr.bf16.gmra.mrb[112].mxu0 %v8010_v32  ;;  %v6621_v3 = vld [vmem:[%s9397_s5 + $0x590] ss:$28 sps:$4 sm:$0xff]  }
 0x288   : > { %3536 = vmatprep.mubr.bf16.mxu1 %v8058_v35  ;;  %3922 = vmatprep.mubr.bf16.mxu0 %v8058_v35 }
 0x289   : > { %4050 = vmatpush1.bf16.msra.mxu1 %v6583_v12  ;;  %v6618_v12 = vld [vmem:[%s9397_s5 + $0x3c8] ss:$28 sps:$4 sm:$0xff]  }
 0x28a   : > { %4051 = vmatprep.subr.bf16.mxu1 %v6588_v15  ;;  %v6629_v15 = vld [vmem:[%s9397_s5 + $0x5c8] ss:$28 sps:$4 sm:$0xff]  }
 0x28d   : > { %4052 = vmatpush1.bf16.msra.mxu1 %v6586_v55  ;;  %v6630_v55 = vld [vmem:[%s9397_s5 + $0x408] ss:$28 sps:$4 sm:$0xff]  }
 0x28e   : > { %4053 = vmatprep.subr.bf16.mxu1 %v6593_v0  ;;  %v6628_v0 = vld [vmem:[%s9397_s5 + $0x43c] ss:$28 sps:$4 sm:$0xff]  }
 0x28f   : > { %3537 = vmatmul.mubr.bf16.gmra.mrb[116].mxu1 %v8054_v25  ;;  %3923 = vmatmul.mubr.bf16.gmra.mrb[116].mxu0 %v8054_v25 }
 0x290   : > { %3546 = vmatprep.mubr.bf16.mxu1 %v8102_v51  ;;  %3932 = vmatprep.mubr.bf16.mxu0 %v8102_v51 }
 0x291   : > { %4054 = vmatpush1.bf16.msra.mxu1 %v6591_v10  ;;  %v6637_v10 = vld [vmem:[%s9397_s5 + $0x600] ss:$28 sps:$4 sm:$0xff]  }
 0x292   : > { %4055 = vmatprep.subr.bf16.mxu1 %v6596_v37  ;;  %v6626_v37 = vld [vmem:[%s9397_s5 + $0x438] ss:$28 sps:$4 sm:$0xff]  }
 0x295   : > { %4056 = vmatpush1.bf16.msra.mxu1 %v6594_v22  ;;  %v6638_v22 = vld [vmem:[%s9397_s5 + $0x440] ss:$28 sps:$4 sm:$0xff]  }
 0x296   : > { %4057 = vmatprep.subr.bf16.mxu1 %v6601_v46  ;;  %v6633_v46 = vld [vmem:[%s9397_s5 + $0x474] ss:$28 sps:$4 sm:$0xff]  }
 0x297   : > { %3547 = vmatmul.mubr.bf16.gmra.mrb[120].mxu1 %v8098_v50  ;;  %3933 = vmatmul.mubr.bf16.gmra.mrb[120].mxu0 %v8098_v50 }
 0x298   : > { %3556 = vmatprep.mubr.bf16.mxu1 %v8146_v7  ;;  %3942 = vmatprep.mubr.bf16.mxu0 %v8146_v7 }
 0x299   : > { %4058 = vmatpush1.bf16.msra.mxu1 %v6599_v26  ;;  %v6646_v26 = vld [vmem:[%s9397_s5 + $0x478] ss:$28 sps:$4 sm:$0xff]  }
 0x29a   : > { %4059 = vmatprep.subr.bf16.mxu1 %v6604_v59  ;;  %v6636_v59 = vld [vmem:[%s9397_s5 + $0x4ac] ss:$28 sps:$4 sm:$0xff]  }
 0x29d   : > { %4060 = vmatpush1.bf16.msra.mxu1 %v6602_v61  ;;  %v6653_v61 = vld [vmem:[%s9397_s5 + $0x670] ss:$28 sps:$4 sm:$0xff]  }
 0x29e   : > { %4061 = vmatprep.subr.bf16.mxu1 %v6609_v44  ;;  %v6634_v44 = vld [vmem:[%s9397_s5 + $0x4a8] ss:$28 sps:$4 sm:$0xff]  }
 0x29f   : > { %3557 = vmatmul.mubr.bf16.gmra.mrb[124].mxu1 %v8142_v63  ;;  %3943 = vmatmul.mubr.bf16.gmra.mrb[124].mxu0 %v8142_v63 }
 0x2a0   : > { %3566 = vmatprep.mubr.bf16.mxu1 %v8190_v60  ;;  %3952 = vmatprep.mubr.bf16.mxu0 %v8190_v60 }
 0x2a1   : > { %4062 = vmatpush1.bf16.msra.mxu1 %v6607_v20  ;;  %v6654_v20 = vld [vmem:[%s9397_s5 + $0x4b0] ss:$28 sps:$4 sm:$0xff]  }
 0x2a2   : > { %4063 = vmatprep.subr.bf16.mxu1 %v6612_v52  ;;  %v6641_v52 = vld [vmem:[%s9397_s5 + $0x4e4] ss:$28 sps:$4 sm:$0xff]  }
 0x2a5   : > { %4064 = vmatpush1.bf16.msra.mxu1 %v6610_v21  ;;  %v6662_v21 = vld [vmem:[%s9397_s5 + $0x4e8] ss:$28 sps:$4 sm:$0xff]  }
 0x2a6   : > { %4226 = vmatprep.subr.bf16.mxu1 %v6617_v13  ;;  %v6644_v13 = vld [vmem:[%s9397_s5 + $0x51c] ss:$28 sps:$4 sm:$0xff]  }
 0x2a7   : > { %3567 = vmatmul.mubr.bf16.gmra.mrb[128].mxu1 %v8186_v42  ;;  %3953 = vmatmul.mubr.bf16.gmra.mrb[128].mxu0 %v8186_v42 }
 0x2a8   : > { %3576 = vmatprep.mubr.bf16.mxu1 %v8210_v39  ;;  %3962 = vmatprep.mubr.bf16.mxu0 %v8210_v39 }
 0x2af   : > { %3577 = vmatmul.mubr.bf16.gmra.mrb[132].mxu1 %v8206_v53  ;;  %3963 = vmatmul.mubr.bf16.gmra.mrb[132].mxu0 %v8206_v53 }
 0x2b0   : > { %3586 = vmatprep.mubr.bf16.mxu1 %v8230_v38  ;;  %3972 = vmatprep.mubr.bf16.mxu0 %v8230_v38 }
 0x2b7   : > { %3587 = vmatmul.mubr.bf16.gmra.mrb[136].mxu1 %v8226_v47  ;;  %3973 = vmatmul.mubr.bf16.gmra.mrb[136].mxu0 %v8226_v47 }
 0x2b8   : > { %3596 = vmatprep.mubr.bf16.mxu1 %v8250_v19  ;;  %3982 = vmatprep.mubr.bf16.mxu0 %v8250_v19 }
 0x2bf   : > { %3597 = vmatmul.mubr.bf16.gmra.mrb[140].mxu1 %v8246_v16  ;;  %3983 = vmatmul.mubr.bf16.gmra.mrb[140].mxu0 %v8246_v16 }
 0x2c0   : > { %3606 = vmatprep.mubr.bf16.mxu1 %v8270_v43  ;;  %3992 = vmatprep.mubr.bf16.mxu0 %v8270_v43 }
 0x2c7   : > { %3607 = vmatmul.mubr.bf16.gmra.mrb[144].mxu1 %v8266_v17  ;;  %3993 = vmatmul.mubr.bf16.gmra.mrb[144].mxu0 %v8266_v17 }
 0x2c8   : > { %3616 = vmatprep.mubr.bf16.mxu1 %v8290_v24  ;;  %4002 = vmatprep.mubr.bf16.mxu0 %v8290_v24 }
 0x2cf   : > { %3617 = vmatmul.mubr.bf16.gmra.mrb[148].mxu1 %v8286_v54  ;;  %4003 = vmatmul.mubr.bf16.gmra.mrb[148].mxu0 %v8286_v54 }
 0x2d0   : > { %3626 = vmatprep.mubr.bf16.mxu1 %v8310_v27  ;;  %4012 = vmatprep.mubr.bf16.mxu0 %v8310_v27 }
 0x2d7   : > { %3627 = vmatmul.mubr.bf16.gmra.mrb[152].mxu1 %v8306_v11  ;;  %4013 = vmatmul.mubr.bf16.gmra.mrb[152].mxu0 %v8306_v11 }
 0x2d8   : > { %3636 = vmatprep.mubr.bf16.mxu1 %v8330_v2  ;;  %4022 = vmatprep.mubr.bf16.mxu0 %v8330_v2 }
 0x2df   : > { %3637 = vmatmul.mubr.bf16.gmra.mrb[156].mxu1 %v8326_v23  ;;  %4023 = vmatmul.mubr.bf16.gmra.mrb[156].mxu0 %v8326_v23 }
 0x2e0   : > { %4065 = vmatprep.mubr.bf16.mxu1 %v7836_v30  ;;  %4451 = vmatprep.mubr.bf16.mxu0 %v7836_v30  ;;  %v6622_v30 = vld [vmem:[%s9397_s5 + $0x3d0] ss:$28 sps:$4 sm:$0xff]  }
 0x2e7   : > { %4066 = vmatmul.mubr.bf16.vlgmr.msra.gmra.mrb[160].mxu1 %v7832_v28  ;;  %4452 = vmatmul.mubr.bf16.vlgmr.msra.gmra.mrb[160].mxu0 %v7832_v28  ;;  %v6625_v28 = vld [vmem:[%s9397_s5 + $0x404] ss:$28 sps:$4 sm:$0xff]  }
 0x2e8   : > { %5706 = vmatpush3.bf16.msra.mxu0 %v6614_v36  ;;  %4075 = vmatprep.mubr.bf16.mxu1 %v7880_v8  ;;  %v6669_v36 = vld [vmem:[%s9397_s5 + $0x6e0] ss:$28 sps:$4 sm:$0xff]  }
 0x2e9   : > { %4459 = vmatprep.mubr.bf16.mxu0 %v7880_v8  ;;  %4227 = vmatpush1.bf16.msra.mxu1 %v6615_v1  ;;  %v6623_v8 = vld [vmem:[%s9397_s5 + $0x400] ss:$28 sps:$4 sm:$0xff]   ;;  %v6642_v1 = vld [vmem:[%s9397_s5 + $0x518] ss:$28 sps:$4 sm:$0xff]  }
 0x2ea   : > { %4228 = vmatprep.subr.bf16.mxu1 %v6620_v14  ;;  %5707 = vmatprep.subr.bf16.mxu0 %v6621_v3  ;;  %v6670_v14 = vld [vmem:[%s9397_s5 + $0x520] ss:$28 sps:$4 sm:$0xff]   ;;  %v6649_v3 = vld [vmem:[%s9397_s5 + $0x554] ss:$28 sps:$4 sm:$0xff]  }
 0x2ec   : > { %5708 = vmatpush3.bf16.msra.mxu0 %v6622_v30  ;;  %v9469_v30 = vld [vmem:[#allocation5_spill] sm:$0xff] }
 0x2ed   : > { %4229 = vmatpush1.bf16.msra.mxu1 %v6618_v12  ;;  %5709 = vmatprep.subr.bf16.mxu0 %v6629_v15  ;;  %v9470_v12 = vld [vmem:[#allocation7_spill] sm:$0xff] }
 0x2ee   : > { %4230 = vmatprep.subr.bf16.mxu1 %v6625_v28  ;;  %v6650_v15 = vld [vmem:[%s9397_s5 + $0x588] ss:$28 sps:$4 sm:$0xff]  }
 0x2ef   : > { %4076 = vmatmul.mubr.bf16.gmra.mrb[164].mxu1 %v7876_v5  ;;  %4460 = vmatmul.mubr.bf16.gmra.mrb[164].mxu0 %v7876_v5  ;;  %v6645_v5 = vld [vmem:[%s9397_s5 + $0x638] ss:$28 sps:$4 sm:$0xff]   ;;  %v6657_v28 = vld [vmem:[%s9397_s5 + $0x5c4] ss:$28 sps:$4 sm:$0xff]  }
 0x2f0   : > { %4085 = vmatprep.mubr.bf16.mxu1 %v7924_v58  ;;  %4467 = vmatprep.mubr.bf16.mxu0 %v7924_v58  ;;  %v6631_v58 = vld [vmem:[%s9397_s5 + $0x470] ss:$28 sps:$4 sm:$0xff]  }
 0x2f1   : > { %4231 = vmatpush1.bf16.msra.mxu1 %v6623_v8  ;;  %5710 = vmatpush3.bf16.msra.mxu0 %v6630_v55  ;;  %v6655_v8 = vld [vmem:[%s9397_s5 + $0x5c0] ss:$28 sps:$4 sm:$0xff]  }
 0x2f2   : > { %4232 = vmatprep.subr.bf16.mxu1 %v6628_v0  ;;  %5711 = vmatprep.subr.bf16.mxu0 %v6637_v10  ;;  %v6660_v55 = vld [vmem:[%s9397_s5 + $0x5fc] ss:$28 sps:$4 sm:$0xff]   ;;  %v9471_v0 = vld [vmem:[#allocation6_spill] sm:$0xff] }
 0x2f3   : > { %v9472_v10 = vld [vmem:[#allocation9_spill] sm:$0xff] }
 0x2f5   : > { %4233 = vmatpush1.bf16.msra.mxu1 %v6626_v37  ;;  %5712 = vmatpush3.bf16.msra.mxu0 %v6638_v22  ;;  %v6658_v37 = vld [vmem:[%s9397_s5 + $0x5f8] ss:$28 sps:$4 sm:$0xff]  }
 0x2f6   : > { %4234 = vmatprep.subr.bf16.mxu1 %v6633_v46  ;;  %5713 = vmatprep.subr.bf16.mxu0 %v6645_v5  ;;  %v6665_v22 = vld [vmem:[%s9397_s5 + $0x634] ss:$28 sps:$4 sm:$0xff]   ;;  %v6668_v5 = vld [vmem:[%s9397_s5 + $0x66c] ss:$28 sps:$4 sm:$0xff]  }
 0x2f7   : > { %4086 = vmatmul.mubr.bf16.gmra.mrb[168].mxu1 %v7920_v56  ;;  %4468 = vmatmul.mubr.bf16.gmra.mrb[168].mxu0 %v7920_v56  ;;  %v6661_v56 = vld [vmem:[%s9397_s5 + $0x6a8] ss:$28 sps:$4 sm:$0xff]   ;;  %v6663_v46 = vld [vmem:[%s9397_s5 + $0x630] ss:$28 sps:$4 sm:$0xff]  }
 0x2f8   : > { %4095 = vmatprep.mubr.bf16.mxu1 %v7968_v48  ;;  %4475 = vmatprep.mubr.bf16.mxu0 %v7968_v48  ;;  %v6639_v48 = vld [vmem:[%s9397_s5 + $0x4e0] ss:$28 sps:$4 sm:$0xff]  }
 0x2f9   : > { %4235 = vmatpush1.bf16.msra.mxu1 %v6631_v58  ;;  %5714 = vmatpush3.bf16.msra.mxu0 %v6646_v26  ;;  %v9473_v58 = vld [vmem:[#allocation8_spill] sm:$0xff]  ;;  %v9474_v26 = vld [vmem:[#allocation11_spill] sm:$0xff] }
 0x2fa   : > { %4236 = vmatprep.subr.bf16.mxu1 %v6636_v59  ;;  %5715 = vmatprep.subr.bf16.mxu0 %v6653_v61  ;;  %v6666_v59 = vld [vmem:[%s9397_s5 + $0x668] ss:$28 sps:$4 sm:$0xff]  }
 0x2fb   : > { %v6673_v61 = vld [vmem:[%s9397_s5 + $0x6a4] ss:$28 sps:$4 sm:$0xff]  }
 0x2fd   : > { %4237 = vmatpush1.bf16.msra.mxu1 %v6634_v44  ;;  %5716 = vmatpush3.bf16.msra.mxu0 %v6654_v20  ;;  %v6671_v44 = vld [vmem:[%s9397_s5 + $0x6a0] ss:$28 sps:$4 sm:$0xff]  }
 0x2fe   : > { %4238 = vmatprep.subr.bf16.mxu1 %v6641_v52  ;;  %5717 = vmatprep.subr.bf16.mxu0 %v6661_v56  ;;  %v6676_v20 = vld [vmem:[%s9397_s5 + $0x6dc] ss:$28 sps:$4 sm:$0xff]   ;;  %v9475_v52 = vld [vmem:[#allocation10_spill] sm:$0xff] }
 0x2ff   : > { %4096 = vmatmul.mubr.bf16.gmra.mrb[172].mxu1 %v7964_v40  ;;  %4476 = vmatmul.mubr.bf16.gmra.mrb[172].mxu0 %v7964_v40  ;;  %v6647_v40 = vld [vmem:[%s9397_s5 + $0x550] ss:$28 sps:$4 sm:$0xff]   ;;  %v9476_v56 = vld [vmem:[#allocation13_spill] sm:$0xff] }
 0x300   : > { %4105 = vmatprep.mubr.bf16.mxu1 %v8012_v33  ;;  %4483 = vmatprep.mubr.bf16.mxu0 %v8012_v33  ;;  %v6652_v33 = vld [vmem:[%s9397_s5 + $0x58c] ss:$28 sps:$4 sm:$0xff]  }
 0x301   : > { %4239 = vmatpush1.bf16.msra.mxu1 %v6639_v48  ;;  %5718 = vmatpush3.bf16.msra.mxu0 %v6662_v21  ;;  %v6674_v48 = vld [vmem:[%s9397_s5 + $0x6d8] ss:$28 sps:$4 sm:$0xff]  }
 0x302   : > { %4240 = vmatprep.subr.bf16.mxu1 %v6644_v13  ;;  %5719 = vmatprep.subr.bf16.mxu0 %v6669_v36  ;;  %v9477_v21 = vld [vmem:[#allocation12_spill] sm:$0xff]  ;;  %v9478_v13 = vld [vmem:[#allocation15_spill] sm:$0xff]  ;;  %v9479_v36 = vld [vmem:[#allocation14_spill] sm:$0xff] }
 0x305   : > { %4241 = vmatpush1.bf16.msra.mxu1 %v6642_v1  ;;  %5720 = vmatpush3.bf16.msra.mxu0 %v6670_v14  ;;  %v9480_v1 = vld [vmem:[#allocation17_spill] sm:$0xff]  ;;  %v2072_v14 = vld [vmem:[%s9398_s6] sm:$0xff] }
 0x306   : > { %4242 = vmatprep.subr.bf16.mxu1 %v6649_v3  ;;  %v9481_v3 = vld [vmem:[#allocation16_spill] sm:$0xff] }
 0x307   : > { %4106 = vmatmul.mubr.bf16.gmra.mrb[176].mxu1 %v9469_v30  ;;  %4484 = vmatmul.mubr.bf16.gmra.mrb[176].mxu0 %v9469_v30  ;;  %v9483_v30 = vld [vmem:[#allocation2_spill] sm:$0xff] }
 0x308   : > { %4115 = vmatprep.mubr.bf16.mxu1 %v9470_v12  ;;  %4491 = vmatprep.mubr.bf16.mxu0 %v9470_v12  ;;  %v9484_v12 = vsub.s32 2, %v9483_v30 }
 0x309   : > { %4243 = vmatpush1.bf16.msra.mxu1 %v6647_v40  ;;  %v9482_v40 = vld [vmem:[#allocation3_spill] sm:$0xff] }
 0x30a   : > { %4244 = vmatprep.subr.bf16.mxu1 %v6652_v33  ;;  %v8730_v33 = vrot.slane %v2072_v14, %v9482_v40 }
 0x30d   : > { %4245 = vmatpush1.bf16.msra.mxu1 %v6650_v15  ;;  %v8734_v15 = vrot.slane %v2072_v14, %v9484_v12 }
 0x30e   : > { %4246 = vmatprep.subr.bf16.mxu1 %v6657_v28  ;;  %v9485_v28 = vld [vmem:[#allocation19_spill] sm:$0xff] }
 0x30f   : > { %4116 = vmatmul.mubr.bf16.gmra.mrb[180].mxu1 %v9471_v0  ;;  %4492 = vmatmul.mubr.bf16.gmra.mrb[180].mxu0 %v9471_v0  ;;  %v9487_v0 = vsub.s32 3, %v9483_v30 }
 0x310   : > { %4125 = vmatprep.mubr.bf16.mxu1 %v9472_v10  ;;  %4499 = vmatprep.mubr.bf16.mxu0 %v9472_v10 }
 0x311   : > { %4247 = vmatpush1.bf16.msra.mxu1 %v6655_v8  ;;  %v9486_v8 = vld [vmem:[#allocation4_spill] sm:$0xff]  ;;  %v8743_v10 = vrot.slane %v2072_v14, %v9487_v0 }
 0x312   : > { %4248 = vmatprep.subr.bf16.mxu1 %v6660_v55  ;;  %v8739_v55 = vrot.slane %v2072_v14, %v9486_v8  ;;  %v9489_v14 = vld [vmem:[#allocation21_spill] sm:$0xff] }
 0x315   : > { %4249 = vmatpush1.bf16.msra.mxu1 %v6658_v37 }
 0x316   : > { %4250 = vmatprep.subr.bf16.mxu1 %v6665_v22 }
 0x317   : > { %4126 = vmatmul.mubr.bf16.gmra.mrb[184].mxu1 %v9473_v58  ;;  %4500 = vmatmul.mubr.bf16.gmra.mrb[184].mxu0 %v9473_v58 }
 0x318   : > { %4135 = vmatprep.mubr.bf16.mxu1 %v9474_v26  ;;  %4507 = vmatprep.mubr.bf16.mxu0 %v9474_v26 }
 0x319   : > { %4251 = vmatpush1.bf16.msra.mxu1 %v6663_v46 }
 0x31a   : > { %4252 = vmatprep.subr.bf16.mxu1 %v6668_v5 }
 0x31d   : > { %4253 = vmatpush1.bf16.msra.mxu1 %v6666_v59 }
 0x31e   : > { %4254 = vmatprep.subr.bf16.mxu1 %v6673_v61 }
 0x31f   : > { %4136 = vmatmul.mubr.bf16.gmra.mrb[188].mxu1 %v9475_v52  ;;  %4508 = vmatmul.mubr.bf16.gmra.mrb[188].mxu0 %v9475_v52 }
 0x320   : > { %4145 = vmatprep.mubr.bf16.mxu1 %v9476_v56  ;;  %4515 = vmatprep.mubr.bf16.mxu0 %v9476_v56 }
 0x321   : > { %4255 = vmatpush1.bf16.msra.mxu1 %v6671_v44 }
 0x322   : > { %4256 = vmatprep.subr.bf16.mxu1 %v6676_v20 }
 0x325   : > { %4257 = vmatpush1.bf16.msra.mxu1 %v6674_v48 }
 0x327   : > { %4146 = vmatmul.mubr.bf16.gmra.mrb[192].mxu1 %v9477_v21  ;;  %4516 = vmatmul.mubr.bf16.gmra.mrb[192].mxu0 %v9477_v21 }
 0x328   : > { %4155 = vmatprep.mubr.bf16.mxu1 %v9478_v13  ;;  %4523 = vmatprep.mubr.bf16.mxu0 %v9478_v13 }
 0x32f   : > { %4156 = vmatmul.mubr.bf16.gmra.mrb[196].mxu1 %v9479_v36  ;;  %4524 = vmatmul.mubr.bf16.gmra.mrb[196].mxu0 %v9479_v36  ;;  %v9488_v36 = vld [vmem:[#allocation18_spill] sm:$0xff] }
 0x330   : > { %4165 = vmatprep.mubr.bf16.mxu1 %v9480_v1  ;;  %4531 = vmatprep.mubr.bf16.mxu0 %v9480_v1 }
 0x337   : > { %4166 = vmatmul.mubr.bf16.gmra.mrb[200].mxu1 %v9481_v3  ;;  %4532 = vmatmul.mubr.bf16.gmra.mrb[200].mxu0 %v9481_v3 }
 0x338   : > { %4175 = vmatprep.mubr.bf16.mxu1 %v9485_v28  ;;  %4539 = vmatprep.mubr.bf16.mxu0 %v9485_v28 }
 0x33a   : > { %v3488_v37 = vpop.f32.mrb[96].mxu1  ;;  %v3874_v22 = vpop.f32.mrb[96].mxu0 }
 0x33b   : > { %v5831_v46 = vadd.f32 %v3488_v37, %v8730_v33  ;;  %v5895_v5 = vadd.f32 %v3874_v22, %v8734_v15  ;;  %v3490_v58 = vpop.f32.mrb[97].mxu1  ;;  %v3876_v26 = vpop.f32.mrb[97].mxu0 }
 0x33c   : > { %v5832_v59 = vadd.f32 %v3490_v58, %v8739_v55  ;;  %v5896_v61 = vadd.f32 %v3876_v26, %v8743_v10  ;;  %v3492_v44 = vpop.f32.mrb[98].mxu1  ;;  %v3878_v20 = vpop.f32.mrb[98].mxu0 }
 0x33d   : > { %6677 = vtanh.f32 %v5831_v46  ;;  %v5833_v52 = vadd.f32 %v3492_v44, %v8730_v33  ;;  %v3494_v56 = vpop.f32.mrb[99].mxu1  ;;  %v3880_v48 = vpop.f32.mrb[99].mxu0  ;;  %v5897_v21 = vadd.f32 %v3878_v20, %v8734_v15 }
 0x33e   : > { %6679 = vtanh.f32 %v5895_v5  ;;  %v5834_v13 = vadd.f32 %v3494_v56, %v8739_v55  ;;  %v5898_v1 = vadd.f32 %v3880_v48, %v8743_v10 }
 0x33f   : > { %6681 = vtanh.f32 %v5832_v59  ;;  %4176 = vmatmul.mubr.bf16.gmra.mrb[204].mxu1 %v9488_v36  ;;  %4540 = vmatmul.mubr.bf16.gmra.mrb[204].mxu0 %v9488_v36 }
 0x340   : > { %6683 = vtanh.f32 %v5896_v61  ;;  %4185 = vmatprep.mubr.bf16.mxu1 %v9489_v14  ;;  %4547 = vmatprep.mubr.bf16.mxu0 %v9489_v14 }
 0x341   : > { %6685 = vtanh.f32 %v5833_v52  ;;  %v9490_v52 = vld [vmem:[#allocation20_spill] sm:$0xff] }
 0x342   : > { %6687 = vtanh.f32 %v5897_v21  ;;  %v3498_v3 = vpop.f32.mrb[100].mxu1  ;;  %v3884_v40 = vpop.f32.mrb[100].mxu0  ;;  %v9491_v21 = vld [vmem:[#allocation23_spill] sm:$0xff] }
 0x343   : > { %6689 = vtanh.f32 %v5834_v13  ;;  %v5835_v12 = vadd.f32 %v3498_v3, %v8730_v33  ;;  %v5899_v28 = vadd.f32 %v3884_v40, %v8734_v15  ;;  %v3500_v8 = vpop.f32.mrb[101].mxu1  ;;  %v3886_v0 = vpop.f32.mrb[101].mxu0 }
 0x344   : > { %6691 = vtanh.f32 %v5898_v1  ;;  %v5836_v37 = vadd.f32 %v3500_v8, %v8739_v55  ;;  %v5900_v22 = vadd.f32 %v3886_v0, %v8743_v10  ;;  %v3502_v46 = vpop.f32.mrb[102].mxu1  ;;  %v3888_v5 = vpop.f32.mrb[102].mxu0 }
 0x345   : > { %6693 = vtanh.f32 %v5835_v12  ;;  %v5837_v58 = vadd.f32 %v3502_v46, %v8730_v33  ;;  %v3504_v26 = vpop.f32.mrb[103].mxu1  ;;  %v3890_v59 = vpop.f32.mrb[103].mxu0  ;;  %v5901_v61 = vadd.f32 %v3888_v5, %v8734_v15 }
 0x346   : > { %6695 = vtanh.f32 %v5899_v28  ;;  %v5838_v20 = vadd.f32 %v3504_v26, %v8739_v55  ;;  %v5902_v48 = vadd.f32 %v3890_v59, %v8743_v10 }
 0x347   : > { %v6678_v44 = vpop.eup %6677  ;;  %6697 = vtanh.f32 %v5836_v37  ;;  %4186 = vmatmul.mubr.bf16.gmra.mrb[208].mxu1 %v9490_v52  ;;  %4548 = vmatmul.mubr.bf16.gmra.mrb[208].mxu0 %v9490_v52 }
 0x348   : > { %v6680_v56 = vpop.eup %6679  ;;  %4965 = vst [vmem:[%s8765_s14] sm:$0xff] %v6678_v44  ;;  %6699 = vtanh.f32 %v5900_v22  ;;  %4195 = vmatprep.mubr.bf16.mxu1 %v9491_v21  ;;  %4555 = vmatprep.mubr.bf16.mxu0 %v9491_v21 }
 0x349   : > { %v6682_v13 = vpop.eup %6681  ;;  %4967 = vst [vmem:[%s8765_s14 + $0x10] sm:$0xff] %v6680_v56  ;;  %6701 = vtanh.f32 %v5837_v58 }
 0x34a   : > { %v6684_v36 = vpop.eup %6683  ;;  %4966 = vst [vmem:[%s8765_s14 + $0x8] sm:$0xff] %v6682_v13  ;;  %6703 = vtanh.f32 %v5901_v61  ;;  %v3508_v1 = vpop.f32.mrb[104].mxu1 }
 0x34b   : > { %v3894_v14 = vpop.f32.mrb[104].mxu0  ;;  %v6686_v3 = vpop.eup %6685  ;;  %4968 = vst [vmem:[%s8765_s14 + $0x18] sm:$0xff] %v6684_v36  ;;  %6705 = vtanh.f32 %v5838_v20  ;;  %v5839_v40 = vadd.f32 %v3508_v1, %v8730_v33  ;;  %v9493_v36 = vld [vmem:[#allocation24_spill] sm:$0xff] }
 0x34c   : > { %v5903_v12 = vadd.f32 %v3894_v14, %v8734_v15  ;;  %v3510_v28 = vpop.f32.mrb[105].mxu1  ;;  %v3896_v8 = vpop.f32.mrb[105].mxu0  ;;  %4972 = vst [vmem:[%s8765_s14 + $0x38] sm:$0xff] %v6686_v3  ;;  %6707 = vtanh.f32 %v5902_v48  ;;  %v9492_v48 = vld [vmem:[#allocation22_spill] sm:$0xff] }
 0x34d   : > { %v6688_v0 = vpop.eup %6687  ;;  %v5840_v37 = vadd.f32 %v3510_v28, %v8739_v55  ;;  %v5904_v22 = vadd.f32 %v3896_v8, %v8743_v10  ;;  %v3512_v46 = vpop.f32.mrb[106].mxu1  ;;  %6709 = vtanh.f32 %v5839_v40 }
 0x34e   : > { %v3898_v5 = vpop.f32.mrb[106].mxu0  ;;  %v6690_v58 = vpop.eup %6689  ;;  %4974 = vst [vmem:[%s8765_s14 + $0x48] sm:$0xff] %v6688_v0  ;;  %v5841_v26 = vadd.f32 %v3512_v46, %v8730_v33  ;;  %6711 = vtanh.f32 %v5903_v12 }
 0x34f   : > { %v3514_v59 = vpop.f32.mrb[107].mxu1  ;;  %v3900_v61 = vpop.f32.mrb[107].mxu0  ;;  %4973 = vst [vmem:[%s8765_s14 + $0x40] sm:$0xff] %v6690_v58  ;;  %v5905_v20 = vadd.f32 %v3898_v5, %v8734_v15  ;;  %6713 = vtanh.f32 %v5840_v37  ;;  %4196 = vmatmul.mubr.bf16.gmra.mrb[212].mxu1 %v9492_v48  ;;  %4556 = vmatmul.mubr.bf16.gmra.mrb[212].mxu0 %v9492_v48 }
 0x350   : > { %v6692_v44 = vpop.eup %6691  ;;  %v5842_v56 = vadd.f32 %v3514_v59, %v8739_v55  ;;  %6715 = vtanh.f32 %v5904_v22  ;;  %v5906_v13 = vadd.f32 %v3900_v61, %v8743_v10  ;;  %4205 = vmatprep.mubr.bf16.mxu1 %v9493_v36  ;;  %4563 = vmatprep.mubr.bf16.mxu0 %v9493_v36 }
 0x351   : > { %v6694_v52 = vpop.eup %6693  ;;  %4975 = vst [vmem:[%s8765_s14 + $0x50] sm:$0xff] %v6692_v44  ;;  %6717 = vtanh.f32 %v5841_v26 }
 0x352   : > { %v6696_v21 = vpop.eup %6695  ;;  %4979 = vst [vmem:[%s8765_s14 + $0x70] sm:$0xff] %v6694_v52  ;;  %6719 = vtanh.f32 %v5905_v20  ;;  %v3518_v3 = vpop.f32.mrb[108].mxu1 }
 0x353   : > { %v6698_v1 = vpop.eup %6697  ;;  %4981 = vst [vmem:[%s8765_s14 + $0x80] sm:$0xff] %v6696_v21  ;;  %v3904_v40 = vpop.f32.mrb[108].mxu0  ;;  %6721 = vtanh.f32 %v5842_v56  ;;  %v5843_v28 = vadd.f32 %v3518_v3, %v8730_v33 }
 0x354   : > { %v6700_v14 = vpop.eup %6699  ;;  %4980 = vst [vmem:[%s8765_s14 + $0x78] sm:$0xff] %v6698_v1  ;;  %v5907_v8 = vadd.f32 %v3904_v40, %v8734_v15  ;;  %v3520_v0 = vpop.f32.mrb[109].mxu1  ;;  %6723 = vtanh.f32 %v5906_v13 }
 0x355   : > { %v6702_v12 = vpop.eup %6701  ;;  %4982 = vst [vmem:[%s8765_s14 + $0x88] sm:$0xff] %v6700_v14  ;;  %v3906_v37 = vpop.f32.mrb[109].mxu0  ;;  %v5844_v46 = vadd.f32 %v3520_v0, %v8739_v55  ;;  %6725 = vtanh.f32 %v5843_v28 }
 0x356   : > { %v6704_v22 = vpop.eup %6703  ;;  %4986 = vst [vmem:[%s8765_s14 + $0xa8] sm:$0xff] %v6702_v12  ;;  %v5908_v5 = vadd.f32 %v3906_v37, %v8743_v10  ;;  %v3522_v58 = vpop.f32.mrb[110].mxu1  ;;  %6727 = vtanh.f32 %v5907_v8 }
 0x357   : > { %v3908_v26 = vpop.f32.mrb[110].mxu0  ;;  %v6706_v59 = vpop.eup %6705  ;;  %4988 = vst [vmem:[%s8765_s14 + $0xb8] sm:$0xff] %v6704_v22  ;;  %v5845_v61 = vadd.f32 %v3522_v58, %v8730_v33  ;;  %6729 = vtanh.f32 %v5844_v46  ;;  %4206 = vmatmul.mubr.bf16.gmra.mrb[216].mxu1 %v8304_v41  ;;  %4564 = vmatmul.mubr.bf16.gmra.mrb[216].mxu0 %v8304_v41 }
 0x358   : > { %v3524_v44 = vpop.f32.mrb[111].mxu1  ;;  %v3910_v20 = vpop.f32.mrb[111].mxu0  ;;  %4987 = vst [vmem:[%s8765_s14 + $0xb0] sm:$0xff] %v6706_v59  ;;  %v5909_v56 = vadd.f32 %v3908_v26, %v8734_v15  ;;  %6731 = vtanh.f32 %v5908_v5  ;;  %4215 = vmatprep.mubr.bf16.mxu1 %v8328_v18  ;;  %4571 = vmatprep.mubr.bf16.mxu0 %v8328_v18 }
 0x359   : > { %v6708_v52 = vpop.eup %6707  ;;  %v5846_v21 = vadd.f32 %v3524_v44, %v8739_v55  ;;  %v5910_v36 = vadd.f32 %v3910_v20, %v8743_v10  ;;  %6733 = vtanh.f32 %v5845_v61 }
 0x35a   : > { %v6710_v48 = vpop.eup %6709  ;;  %4989 = vst [vmem:[%s8765_s14 + $0xc0] sm:$0xff] %v6708_v52  ;;  %6735 = vtanh.f32 %v5909_v56  ;;  %v3528_v3 = vpop.f32.mrb[112].mxu1 }
 0x35b   : > { %v6712_v13 = vpop.eup %6711  ;;  %4993 = vst [vmem:[%s8765_s14 + $0xe0] sm:$0xff] %v6710_v48  ;;  %v3914_v40 = vpop.f32.mrb[112].mxu0  ;;  %6737 = vtanh.f32 %v5846_v21  ;;  %v5847_v12 = vadd.f32 %v3528_v3, %v8730_v33 }
 0x35c   : > { %v6714_v1 = vpop.eup %6713  ;;  %4995 = vst [vmem:[%s8765_s14 + $0xf0] sm:$0xff] %v6712_v13  ;;  %v5911_v28 = vadd.f32 %v3914_v40, %v8734_v15  ;;  %v3530_v8 = vpop.f32.mrb[113].mxu1  ;;  %6739 = vtanh.f32 %v5910_v36 }
 0x35d   : > { %v6716_v14 = vpop.eup %6715  ;;  %4994 = vst [vmem:[%s8765_s14 + $0xe8] sm:$0xff] %v6714_v1  ;;  %v3916_v18 = vpop.f32.mrb[113].mxu0  ;;  %v5848_v37 = vadd.f32 %v3530_v8, %v8739_v55  ;;  %6741 = vtanh.f32 %v5847_v12 }
 0x35e   : > { %v6718_v41 = vpop.eup %6717  ;;  %4996 = vst [vmem:[%s8765_s14 + $0xf8] sm:$0xff] %v6716_v14  ;;  %v5912_v22 = vadd.f32 %v3916_v18, %v8743_v10  ;;  %v3532_v46 = vpop.f32.mrb[114].mxu1  ;;  %6743 = vtanh.f32 %v5911_v28 }
 0x35f   : > { %v6720_v0 = vpop.eup %6719  ;;  %5000 = vst [vmem:[%s8765_s14 + $0x118] sm:$0xff] %v6718_v41  ;;  %v3918_v5 = vpop.f32.mrb[114].mxu0  ;;  %v5849_v26 = vadd.f32 %v3532_v46, %v8730_v33  ;;  %6745 = vtanh.f32 %v5848_v37  ;;  %4216 = vmatmul.mubr.bf16.gmra.mrb[220].mxu1 %v8324_v62  ;;  %4572 = vmatmul.mubr.bf16.gmra.mrb[220].mxu0 %v8324_v62 }
 0x360   : > { %v6722_v58 = vpop.eup %6721  ;;  %5002 = vst [vmem:[%s8765_s14 + $0x128] sm:$0xff] %v6720_v0  ;;  %v3534_v59 = vpop.f32.mrb[115].mxu1  ;;  %v5913_v20 = vadd.f32 %v3918_v5, %v8734_v15  ;;  %6747 = vtanh.f32 %v5912_v22  ;;  %4258 = vmatprep.mubr.bf16.mxu1 %v7838_v31  ;;  %4612 = vmatprep.mubr.bf16.mxu0 %v7838_v31 }
 0x361   : > { %v3920_v61 = vpop.f32.mrb[115].mxu0  ;;  %v6724_v44 = vpop.eup %6723  ;;  %5001 = vst [vmem:[%s8765_s14 + $0x120] sm:$0xff] %v6722_v58  ;;  %v5850_v56 = vadd.f32 %v3534_v59, %v8739_v55  ;;  %6749 = vtanh.f32 %v5849_v26 }
 0x362   : > { %v6726_v52 = vpop.eup %6725  ;;  %5003 = vst [vmem:[%s8765_s14 + $0x130] sm:$0xff] %v6724_v44  ;;  %v5914_v21 = vadd.f32 %v3920_v61, %v8743_v10  ;;  %6751 = vtanh.f32 %v5913_v20  ;;  %v3538_v1 = vpop.f32.mrb[116].mxu1 }
 0x363   : > { %v6728_v48 = vpop.eup %6727  ;;  %5007 = vst [vmem:[%s8765_s14 + $0x150] sm:$0xff] %v6726_v52  ;;  %v3924_v14 = vpop.f32.mrb[116].mxu0  ;;  %6753 = vtanh.f32 %v5850_v56  ;;  %v5851_v3 = vadd.f32 %v3538_v1, %v8730_v33 }
 0x364   : > { %v6730_v13 = vpop.eup %6729  ;;  %5009 = vst [vmem:[%s8765_s14 + $0x160] sm:$0xff] %v6728_v48  ;;  %v5915_v40 = vadd.f32 %v3924_v14, %v8734_v15  ;;  %v3540_v41 = vpop.f32.mrb[117].mxu1  ;;  %6755 = vtanh.f32 %v5914_v21 }
 0x365   : > { %v6732_v36 = vpop.eup %6731  ;;  %5008 = vst [vmem:[%s8765_s14 + $0x158] sm:$0xff] %v6730_v13  ;;  %v3926_v31 = vpop.f32.mrb[117].mxu0  ;;  %v5852_v28 = vadd.f32 %v3540_v41, %v8739_v55  ;;  %6757 = vtanh.f32 %v5851_v3 }
 0x366   : > { %v6734_v62 = vpop.eup %6733  ;;  %5010 = vst [vmem:[%s8765_s14 + $0x168] sm:$0xff] %v6732_v36  ;;  %v5916_v8 = vadd.f32 %v3926_v31, %v8743_v10  ;;  %v3542_v18 = vpop.f32.mrb[118].mxu1  ;;  %6759 = vtanh.f32 %v5915_v40 }
 0x367   : > { %v6736_v12 = vpop.eup %6735  ;;  %5014 = vst [vmem:[%s8765_s14 + $0x188] sm:$0xff] %v6734_v62  ;;  %v3928_v0 = vpop.f32.mrb[118].mxu0  ;;  %v5853_v22 = vadd.f32 %v3542_v18, %v8730_v33  ;;  %6761 = vtanh.f32 %v5852_v28  ;;  %4259 = vmatmul.mubr.bf16.vlgmr.msra.gmra.mrb[160].mxu1 %v7834_v29  ;;  %4613 = vmatmul.mubr.bf16.vlgmr.msra.gmra.mrb[224].mxu0 %v7834_v29 }
 0x368   : > { %v6738_v37 = vpop.eup %6737  ;;  %5016 = vst [vmem:[%s8765_s14 + $0x198] sm:$0xff] %v6736_v12  ;;  %v3544_v46 = vpop.f32.mrb[119].mxu1  ;;  %v5917_v26 = vadd.f32 %v3928_v0, %v8734_v15  ;;  %6763 = vtanh.f32 %v5916_v8  ;;  %4268 = vmatprep.mubr.bf16.mxu1 %v7882_v9  ;;  %4620 = vmatprep.mubr.bf16.mxu0 %v7882_v9 }
 0x369   : > { %v3930_v5 = vpop.f32.mrb[119].mxu0  ;;  %v6740_v58 = vpop.eup %6739  ;;  %5015 = vst [vmem:[%s8765_s14 + $0x190] sm:$0xff] %v6738_v37  ;;  %v5854_v61 = vadd.f32 %v3544_v46, %v8739_v55  ;;  %6765 = vtanh.f32 %v5853_v22 }
 0x36a   : > { %v6742_v59 = vpop.eup %6741  ;;  %5017 = vst [vmem:[%s8765_s14 + $0x1a0] sm:$0xff] %v6740_v58  ;;  %v5918_v20 = vadd.f32 %v3930_v5, %v8743_v10  ;;  %6767 = vtanh.f32 %v5917_v26  ;;  %v3548_v48 = vpop.f32.mrb[120].mxu1 }
 0x36b   : > { %v6744_v44 = vpop.eup %6743  ;;  %5021 = vst [vmem:[%s8765_s14 + $0x1c0] sm:$0xff] %v6742_v59  ;;  %v3934_v21 = vpop.f32.mrb[120].mxu0  ;;  %6769 = vtanh.f32 %v5854_v61  ;;  %v5855_v13 = vadd.f32 %v3548_v48, %v8730_v33 }
 0x36c   : > { %v6746_v52 = vpop.eup %6745  ;;  %5023 = vst [vmem:[%s8765_s14 + $0x1d0] sm:$0xff] %v6744_v44  ;;  %v5919_v36 = vadd.f32 %v3934_v21, %v8734_v15  ;;  %v3550_v1 = vpop.f32.mrb[121].mxu1  ;;  %6771 = vtanh.f32 %v5918_v20 }
 0x36d   : > { %v6748_v56 = vpop.eup %6747  ;;  %5022 = vst [vmem:[%s8765_s14 + $0x1c8] sm:$0xff] %v6746_v52  ;;  %v3936_v9 = vpop.f32.mrb[121].mxu0  ;;  %v5856_v62 = vadd.f32 %v3550_v1, %v8739_v55  ;;  %6773 = vtanh.f32 %v5855_v13 }
 0x36e   : > { %v6750_v29 = vpop.eup %6749  ;;  %5024 = vst [vmem:[%s8765_s14 + $0x1d8] sm:$0xff] %v6748_v56  ;;  %v5920_v3 = vadd.f32 %v3936_v9, %v8743_v10  ;;  %v3552_v40 = vpop.f32.mrb[122].mxu1  ;;  %6775 = vtanh.f32 %v5919_v36 }
 0x36f   : > { %v6752_v14 = vpop.eup %6751  ;;  %5028 = vst [vmem:[%s8765_s14 + $0x1f8] sm:$0xff] %v6750_v29  ;;  %v3938_v41 = vpop.f32.mrb[122].mxu0  ;;  %v5857_v12 = vadd.f32 %v3552_v40, %v8730_v33  ;;  %6777 = vtanh.f32 %v5856_v62  ;;  %4269 = vmatmul.mubr.bf16.gmra.mrb[164].mxu1 %v7878_v6  ;;  %4621 = vmatmul.mubr.bf16.gmra.mrb[228].mxu0 %v7878_v6 }
 0x370   : > { %v6754_v31 = vpop.eup %6753  ;;  %5030 = vst [vmem:[%s8765_s14 + $0x208] sm:$0xff] %v6752_v14  ;;  %v3554_v28 = vpop.f32.mrb[123].mxu1  ;;  %v5921_v0 = vadd.f32 %v3938_v41, %v8734_v15  ;;  %6779 = vtanh.f32 %v5920_v3  ;;  %4278 = vmatprep.mubr.bf16.mxu1 %v7926_v4  ;;  %4628 = vmatprep.mubr.bf16.mxu0 %v7926_v4 }
 0x371   : > { %v3940_v8 = vpop.f32.mrb[123].mxu0  ;;  %v6756_v18 = vpop.eup %6755  ;;  %5029 = vst [vmem:[%s8765_s14 + $0x200] sm:$0xff] %v6754_v31  ;;  %v5858_v22 = vadd.f32 %v3554_v28, %v8739_v55  ;;  %6781 = vtanh.f32 %v5857_v12 }
 0x372   : > { %v6758_v37 = vpop.eup %6757  ;;  %5031 = vst [vmem:[%s8765_s14 + $0x210] sm:$0xff] %v6756_v18  ;;  %v5922_v5 = vadd.f32 %v3940_v8, %v8743_v10  ;;  %6783 = vtanh.f32 %v5921_v0  ;;  %v3558_v59 = vpop.f32.mrb[124].mxu1 }
 0x373   : > { %v6760_v46 = vpop.eup %6759  ;;  %5035 = vst [vmem:[%s8765_s14 + $0x230] sm:$0xff] %v6758_v37  ;;  %v3944_v61 = vpop.f32.mrb[124].mxu0  ;;  %6785 = vtanh.f32 %v5858_v22  ;;  %v5859_v44 = vadd.f32 %v3558_v59, %v8730_v33 }
 0x374   : > { %v6762_v58 = vpop.eup %6761  ;;  %5037 = vst [vmem:[%s8765_s14 + $0x240] sm:$0xff] %v6760_v46  ;;  %v5923_v20 = vadd.f32 %v3944_v61, %v8734_v15  ;;  %v3560_v52 = vpop.f32.mrb[125].mxu1  ;;  %6787 = vtanh.f32 %v5922_v5 }
 0x375   : > { %v6764_v26 = vpop.eup %6763  ;;  %5036 = vst [vmem:[%s8765_s14 + $0x238] sm:$0xff] %v6762_v58  ;;  %v3946_v4 = vpop.f32.mrb[125].mxu0  ;;  %v5860_v48 = vadd.f32 %v3560_v52, %v8739_v55  ;;  %6789 = vtanh.f32 %v5859_v44 }
 0x376   : > { %v6766_v6 = vpop.eup %6765  ;;  %5038 = vst [vmem:[%s8765_s14 + $0x248] sm:$0xff] %v6764_v26  ;;  %v5924_v21 = vadd.f32 %v3946_v4, %v8743_v10  ;;  %v3562_v29 = vpop.f32.mrb[126].mxu1  ;;  %6791 = vtanh.f32 %v5923_v20 }
 0x377   : > { %v6768_v56 = vpop.eup %6767  ;;  %5042 = vst [vmem:[%s8765_s14 + $0x268] sm:$0xff] %v6766_v6  ;;  %v3948_v13 = vpop.f32.mrb[126].mxu0  ;;  %v5861_v1 = vadd.f32 %v3562_v29, %v8730_v33  ;;  %6793 = vtanh.f32 %v5860_v48  ;;  %4279 = vmatmul.mubr.bf16.gmra.mrb[168].mxu1 %v7922_v57  ;;  %4629 = vmatmul.mubr.bf16.gmra.mrb[232].mxu0 %v7922_v57 }
 0x378   : > { %v6770_v36 = vpop.eup %6769  ;;  %5044 = vst [vmem:[%s8765_s14 + $0x278] sm:$0xff] %v6768_v56  ;;  %v3564_v9 = vpop.f32.mrb[127].mxu1  ;;  %v5925_v3 = vadd.f32 %v3948_v13, %v8734_v15  ;;  %6795 = vtanh.f32 %v5924_v21  ;;  %4288 = vmatprep.mubr.bf16.mxu1 %v7970_v49  ;;  %4636 = vmatprep.mubr.bf16.mxu0 %v7970_v49 }
 0x379   : > { %v3950_v14 = vpop.f32.mrb[127].mxu0  ;;  %v6772_v62 = vpop.eup %6771  ;;  %5043 = vst [vmem:[%s8765_s14 + $0x270] sm:$0xff] %v6770_v36  ;;  %v5862_v41 = vadd.f32 %v3564_v9, %v8739_v55  ;;  %6797 = vtanh.f32 %v5861_v1 }
 0x37a   : > { %v6774_v40 = vpop.eup %6773  ;;  %5045 = vst [vmem:[%s8765_s14 + $0x280] sm:$0xff] %v6772_v62  ;;  %v5926_v12 = vadd.f32 %v3950_v14, %v8743_v10  ;;  %6799 = vtanh.f32 %v5925_v3  ;;  %v3568_v18 = vpop.f32.mrb[128].mxu1 }
 0x37b   : > { %v6776_v31 = vpop.eup %6775  ;;  %5049 = vst [vmem:[%s8765_s14 + $0x2a0] sm:$0xff] %v6774_v40  ;;  %v3954_v0 = vpop.f32.mrb[128].mxu0  ;;  %6801 = vtanh.f32 %v5862_v41  ;;  %v5863_v37 = vadd.f32 %v3568_v18, %v8730_v33 }
 0x37c   : > { %v6778_v28 = vpop.eup %6777  ;;  %5051 = vst [vmem:[%s8765_s14 + $0x2b0] sm:$0xff] %v6776_v31  ;;  %v5927_v22 = vadd.f32 %v3954_v0, %v8734_v15  ;;  %v3570_v46 = vpop.f32.mrb[129].mxu1  ;;  %6803 = vtanh.f32 %v5926_v12 }
 0x37d   : > { %v6780_v8 = vpop.eup %6779  ;;  %5050 = vst [vmem:[%s8765_s14 + $0x2a8] sm:$0xff] %v6778_v28  ;;  %v3956_v49 = vpop.f32.mrb[129].mxu0  ;;  %v5864_v58 = vadd.f32 %v3570_v46, %v8739_v55  ;;  %6805 = vtanh.f32 %v5863_v37 }
 0x37e   : > { %v6782_v57 = vpop.eup %6781  ;;  %5052 = vst [vmem:[%s8765_s14 + $0x2b8] sm:$0xff] %v6780_v8  ;;  %v5928_v26 = vadd.f32 %v3956_v49, %v8743_v10  ;;  %v3572_v59 = vpop.f32.mrb[130].mxu1  ;;  %6807 = vtanh.f32 %v5927_v22 }
 0x37f   : > { %v6784_v5 = vpop.eup %6783  ;;  %5056 = vst [vmem:[%s8765_s14 + $0x2d8] sm:$0xff] %v6782_v57  ;;  %v3958_v61 = vpop.f32.mrb[130].mxu0  ;;  %v5865_v44 = vadd.f32 %v3572_v59, %v8730_v33  ;;  %6809 = vtanh.f32 %v5864_v58  ;;  %4289 = vmatmul.mubr.bf16.gmra.mrb[172].mxu1 %v7966_v45  ;;  %4637 = vmatmul.mubr.bf16.gmra.mrb[236].mxu0 %v7966_v45 }
 0x380   : > { %v6786_v6 = vpop.eup %6785  ;;  %5058 = vst [vmem:[%s8765_s14 + $0x2e8] sm:$0xff] %v6784_v5  ;;  %v3574_v20 = vpop.f32.mrb[131].mxu1  ;;  %v5929_v56 = vadd.f32 %v3958_v61, %v8734_v15  ;;  %6811 = vtanh.f32 %v5928_v26  ;;  %4298 = vmatprep.mubr.bf16.mxu1 %v8014_v34  ;;  %4644 = vmatprep.mubr.bf16.mxu0 %v8014_v34 }
 0x381   : > { %v3960_v52 = vpop.f32.mrb[131].mxu0  ;;  %v6788_v4 = vpop.eup %6787  ;;  %5057 = vst [vmem:[%s8765_s14 + $0x2e0] sm:$0xff] %v6786_v6  ;;  %v5866_v21 = vadd.f32 %v3574_v20, %v8739_v55  ;;  %6813 = vtanh.f32 %v5865_v44 }
 0x382   : > { %v6790_v48 = vpop.eup %6789  ;;  %5059 = vst [vmem:[%s8765_s14 + $0x2f0] sm:$0xff] %v6788_v4  ;;  %v5930_v13 = vadd.f32 %v3960_v52, %v8743_v10  ;;  %6815 = vtanh.f32 %v5929_v56  ;;  %v3578_v9 = vpop.f32.mrb[132].mxu1 }
 0x383   : > { %v6792_v29 = vpop.eup %6791  ;;  %5063 = vst [vmem:[%s8765_s14 + $0x310] sm:$0xff] %v6790_v48  ;;  %v3964_v14 = vpop.f32.mrb[132].mxu0  ;;  %6817 = vtanh.f32 %v5866_v21  ;;  %v5867_v62 = vadd.f32 %v3578_v9, %v8730_v33 }
 0x384   : > { %v6794_v36 = vpop.eup %6793  ;;  %5065 = vst [vmem:[%s8765_s14 + $0x320] sm:$0xff] %v6792_v29  ;;  %v5931_v3 = vadd.f32 %v3964_v14, %v8734_v15  ;;  %v3580_v40 = vpop.f32.mrb[133].mxu1  ;;  %6819 = vtanh.f32 %v5930_v13 }
 0x385   : > { %v6796_v1 = vpop.eup %6795  ;;  %5064 = vst [vmem:[%s8765_s14 + $0x318] sm:$0xff] %v6794_v36  ;;  %v3966_v34 = vpop.f32.mrb[133].mxu0  ;;  %v5868_v31 = vadd.f32 %v3580_v40, %v8739_v55  ;;  %6821 = vtanh.f32 %v5867_v62 }
 0x386   : > { %v6798_v45 = vpop.eup %6797  ;;  %5066 = vst [vmem:[%s8765_s14 + $0x328] sm:$0xff] %v6796_v1  ;;  %v5932_v12 = vadd.f32 %v3966_v34, %v8743_v10  ;;  %v3582_v28 = vpop.f32.mrb[134].mxu1  ;;  %6823 = vtanh.f32 %v5931_v3 }
 0x387   : > { %v6800_v41 = vpop.eup %6799  ;;  %5070 = vst [vmem:[%s8765_s14 + $0x348] sm:$0xff] %v6798_v45  ;;  %v3968_v8 = vpop.f32.mrb[134].mxu0  ;;  %v5869_v0 = vadd.f32 %v3582_v28, %v8730_v33  ;;  %6825 = vtanh.f32 %v5868_v31  ;;  %4299 = vmatmul.mubr.bf16.gmra.mrb[176].mxu1 %v8010_v32  ;;  %4645 = vmatmul.mubr.bf16.gmra.mrb[240].mxu0 %v8010_v32 }
 0x388   : > { %v6802_v18 = vpop.eup %6801  ;;  %5072 = vst [vmem:[%s8765_s14 + $0x358] sm:$0xff] %v6800_v41  ;;  %v3584_v57 = vpop.f32.mrb[135].mxu1  ;;  %v5933_v46 = vadd.f32 %v3968_v8, %v8734_v15  ;;  %6827 = vtanh.f32 %v5932_v12  ;;  %4308 = vmatprep.mubr.bf16.mxu1 %v8058_v35  ;;  %4652 = vmatprep.mubr.bf16.mxu0 %v8058_v35 }
 0x389   : > { %v3970_v37 = vpop.f32.mrb[135].mxu0  ;;  %v6804_v22 = vpop.eup %6803  ;;  %5071 = vst [vmem:[%s8765_s14 + $0x350] sm:$0xff] %v6802_v18  ;;  %v5870_v5 = vadd.f32 %v3584_v57, %v8739_v55  ;;  %6829 = vtanh.f32 %v5869_v0 }
 0x38a   : > { %v6806_v49 = vpop.eup %6805  ;;  %5073 = vst [vmem:[%s8765_s14 + $0x360] sm:$0xff] %v6804_v22  ;;  %v5934_v26 = vadd.f32 %v3970_v37, %v8743_v10  ;;  %6831 = vtanh.f32 %v5933_v46  ;;  %v3588_v6 = vpop.f32.mrb[136].mxu1 }
 0x38b   : > { %v6808_v58 = vpop.eup %6807  ;;  %5077 = vst [vmem:[%s8765_s14 + $0x380] sm:$0xff] %v6806_v49  ;;  %v3974_v44 = vpop.f32.mrb[136].mxu0  ;;  %6833 = vtanh.f32 %v5870_v5  ;;  %v5871_v20 = vadd.f32 %v3588_v6, %v8730_v33 }
 0x38c   : > { %v6810_v59 = vpop.eup %6809  ;;  %5079 = vst [vmem:[%s8765_s14 + $0x390] sm:$0xff] %v6808_v58  ;;  %v5935_v52 = vadd.f32 %v3974_v44, %v8734_v15  ;;  %v3590_v4 = vpop.f32.mrb[137].mxu1  ;;  %6835 = vtanh.f32 %v5934_v26 }
 0x38d   : > { %v6812_v61 = vpop.eup %6811  ;;  %5078 = vst [vmem:[%s8765_s14 + $0x388] sm:$0xff] %v6810_v59  ;;  %v3976_v35 = vpop.f32.mrb[137].mxu0  ;;  %v5872_v48 = vadd.f32 %v3590_v4, %v8739_v55  ;;  %6837 = vtanh.f32 %v5871_v20 }
 0x38e   : > { %v6814_v32 = vpop.eup %6813  ;;  %5080 = vst [vmem:[%s8765_s14 + $0x398] sm:$0xff] %v6812_v61  ;;  %v5936_v21 = vadd.f32 %v3976_v35, %v8743_v10  ;;  %v3592_v29 = vpop.f32.mrb[138].mxu1  ;;  %6839 = vtanh.f32 %v5935_v52 }
 0x38f   : > { %v6816_v56 = vpop.eup %6815  ;;  %5084 = vst [vmem:[%s8765_s14 + $0x3b8] sm:$0xff] %v6814_v32  ;;  %v3978_v13 = vpop.f32.mrb[138].mxu0  ;;  %v5873_v1 = vadd.f32 %v3592_v29, %v8730_v33  ;;  %6841 = vtanh.f32 %v5872_v48  ;;  %4309 = vmatmul.mubr.bf16.gmra.mrb[180].mxu1 %v8054_v25  ;;  %4653 = vmatmul.mubr.bf16.gmra.mrb[244].mxu0 %v8054_v25 }
 0x390   : > { %v6818_v36 = vpop.eup %6817  ;;  %5086 = vst [vmem:[%s8765_s14 + $0x3c8] sm:$0xff] %v6816_v56  ;;  %v3594_v9 = vpop.f32.mrb[139].mxu1  ;;  %v5937_v62 = vadd.f32 %v3978_v13, %v8734_v15  ;;  %6843 = vtanh.f32 %v5936_v21  ;;  %4318 = vmatprep.mubr.bf16.mxu1 %v8102_v51  ;;  %4660 = vmatprep.mubr.bf16.mxu0 %v8102_v51 }
 0x391   : > { %v3980_v14 = vpop.f32.mrb[139].mxu0  ;;  %v6820_v45 = vpop.eup %6819  ;;  %5085 = vst [vmem:[%s8765_s14 + $0x3c0] sm:$0xff] %v6818_v36  ;;  %v5874_v40 = vadd.f32 %v3594_v9, %v8739_v55  ;;  %6845 = vtanh.f32 %v5873_v1 }
 0x392   : > { %v6822_v3 = vpop.eup %6821  ;;  %5087 = vst [vmem:[%s8765_s14 + $0x3d0] sm:$0xff] %v6820_v45  ;;  %v5938_v41 = vadd.f32 %v3980_v14, %v8743_v10  ;;  %6847 = vtanh.f32 %v5937_v62  ;;  %v3598_v28 = vpop.f32.mrb[140].mxu1 }
 0x393   : > { %v6824_v34 = vpop.eup %6823  ;;  %5091 = vst [vmem:[%s8765_s14 + $0x3f0] sm:$0xff] %v6822_v3  ;;  %v3984_v8 = vpop.f32.mrb[140].mxu0  ;;  %6849 = vtanh.f32 %v5874_v40  ;;  %v5875_v18 = vadd.f32 %v3598_v28, %v8730_v33 }
 0x394   : > { %v6826_v31 = vpop.eup %6825  ;;  %5093 = vst [vmem:[%s8765_s14 + $0x400] sm:$0xff] %v6824_v34  ;;  %v5939_v0 = vadd.f32 %v3984_v8, %v8734_v15  ;;  %v3600_v57 = vpop.f32.mrb[141].mxu1  ;;  %6851 = vtanh.f32 %v5938_v41 }
 0x395   : > { %v6828_v12 = vpop.eup %6827  ;;  %5092 = vst [vmem:[%s8765_s14 + $0x3f8] sm:$0xff] %v6826_v31  ;;  %v3986_v51 = vpop.f32.mrb[141].mxu0  ;;  %v5876_v22 = vadd.f32 %v3600_v57, %v8739_v55  ;;  %6853 = vtanh.f32 %v5875_v18 }
 0x396   : > { %v6830_v25 = vpop.eup %6829  ;;  %5094 = vst [vmem:[%s8765_s14 + $0x408] sm:$0xff] %v6828_v12  ;;  %v5940_v46 = vadd.f32 %v3986_v51, %v8743_v10  ;;  %v3602_v49 = vpop.f32.mrb[142].mxu1  ;;  %6855 = vtanh.f32 %v5939_v0 }
 0x397   : > { %v6832_v37 = vpop.eup %6831  ;;  %5098 = vst [vmem:[%s8765_s14 + $0x428] sm:$0xff] %v6830_v25  ;;  %v3988_v5 = vpop.f32.mrb[142].mxu0  ;;  %v5877_v26 = vadd.f32 %v3602_v49, %v8730_v33  ;;  %6857 = vtanh.f32 %v5876_v22  ;;  %4319 = vmatmul.mubr.bf16.gmra.mrb[184].mxu1 %v8098_v50  ;;  %4661 = vmatmul.mubr.bf16.gmra.mrb[248].mxu0 %v8098_v50 }
 0x398   : > { %v6834_v58 = vpop.eup %6833  ;;  %5100 = vst [vmem:[%s8765_s14 + $0x438] sm:$0xff] %v6832_v37  ;;  %v3604_v59 = vpop.f32.mrb[143].mxu1  ;;  %v5941_v44 = vadd.f32 %v3988_v5, %v8734_v15  ;;  %6859 = vtanh.f32 %v5940_v46  ;;  %4328 = vmatprep.mubr.bf16.mxu1 %v8146_v7  ;;  %4668 = vmatprep.mubr.bf16.mxu0 %v8146_v7 }
 0x399   : > { %v3990_v61 = vpop.f32.mrb[143].mxu0  ;;  %v6836_v6 = vpop.eup %6835  ;;  %5099 = vst [vmem:[%s8765_s14 + $0x430] sm:$0xff] %v6834_v58  ;;  %v5878_v20 = vadd.f32 %v3604_v59, %v8739_v55  ;;  %6861 = vtanh.f32 %v5877_v26 }
 0x39a   : > { %v6838_v32 = vpop.eup %6837  ;;  %5101 = vst [vmem:[%s8765_s14 + $0x440] sm:$0xff] %v6836_v6  ;;  %v5942_v4 = vadd.f32 %v3990_v61, %v8743_v10  ;;  %6863 = vtanh.f32 %v5941_v44  ;;  %v3608_v48 = vpop.f32.mrb[144].mxu1 }
 0x39b   : > { %v6840_v52 = vpop.eup %6839  ;;  %5105 = vst [vmem:[%s8765_s14 + $0x460] sm:$0xff] %v6838_v32  ;;  %v3994_v21 = vpop.f32.mrb[144].mxu0  ;;  %6865 = vtanh.f32 %v5878_v20  ;;  %v5879_v29 = vadd.f32 %v3608_v48, %v8730_v33 }
 0x39c   : > { %v6842_v35 = vpop.eup %6841  ;;  %5107 = vst [vmem:[%s8765_s14 + $0x470] sm:$0xff] %v6840_v52  ;;  %v5943_v13 = vadd.f32 %v3994_v21, %v8734_v15  ;;  %v3610_v36 = vpop.f32.mrb[145].mxu1  ;;  %6867 = vtanh.f32 %v5942_v4 }
 0x39d   : > { %v6844_v56 = vpop.eup %6843  ;;  %5106 = vst [vmem:[%s8765_s14 + $0x468] sm:$0xff] %v6842_v35  ;;  %v3996_v7 = vpop.f32.mrb[145].mxu0  ;;  %v5880_v9 = vadd.f32 %v3610_v36, %v8739_v55  ;;  %6869 = vtanh.f32 %v5879_v29 }
 0x39e   : > { %v6846_v50 = vpop.eup %6845  ;;  %5108 = vst [vmem:[%s8765_s14 + $0x478] sm:$0xff] %v6844_v56  ;;  %v5944_v14 = vadd.f32 %v3996_v7, %v8743_v10  ;;  %v3612_v45 = vpop.f32.mrb[146].mxu1  ;;  %6871 = vtanh.f32 %v5943_v13 }
 0x39f   : > { %v6848_v1 = vpop.eup %6847  ;;  %5112 = vst [vmem:[%s8765_s14 + $0x498] sm:$0xff] %v6846_v50  ;;  %v3998_v62 = vpop.f32.mrb[146].mxu0  ;;  %v5881_v40 = vadd.f32 %v3612_v45, %v8730_v33  ;;  %6873 = vtanh.f32 %v5880_v9  ;;  %4329 = vmatmul.mubr.bf16.gmra.mrb[188].mxu1 %v8142_v63  ;;  %4669 = vmatmul.mubr.bf16.gmra.mrb[252].mxu0 %v8142_v63 }
 0x3a0   : > { %v6850_v3 = vpop.eup %6849  ;;  %5114 = vst [vmem:[%s8765_s14 + $0x4a8] sm:$0xff] %v6848_v1  ;;  %v3614_v34 = vpop.f32.mrb[147].mxu1  ;;  %v5945_v12 = vadd.f32 %v3998_v62, %v8734_v15  ;;  %6875 = vtanh.f32 %v5944_v14  ;;  %4338 = vmatprep.mubr.bf16.mxu1 %v8190_v60  ;;  %4676 = vmatprep.mubr.bf16.mxu0 %v8190_v60 }
 0x3a1   : > { %v4000_v41 = vpop.f32.mrb[147].mxu0  ;;  %v6852_v31 = vpop.eup %6851  ;;  %5113 = vst [vmem:[%s8765_s14 + $0x4a0] sm:$0xff] %v6850_v3  ;;  %v5882_v8 = vadd.f32 %v3614_v34, %v8739_v55  ;;  %6877 = vtanh.f32 %v5881_v40 }
 0x3a2   : > { %v6854_v28 = vpop.eup %6853  ;;  %5115 = vst [vmem:[%s8765_s14 + $0x4b0] sm:$0xff] %v6852_v31  ;;  %v5946_v18 = vadd.f32 %v4000_v41, %v8743_v10  ;;  %6879 = vtanh.f32 %v5945_v12  ;;  %v3618_v51 = vpop.f32.mrb[148].mxu1 }
 0x3a3   : > { %v6856_v25 = vpop.eup %6855  ;;  %5119 = vst [vmem:[%s8765_s14 + $0x4d0] sm:$0xff] %v6854_v28  ;;  %v4004_v37 = vpop.f32.mrb[148].mxu0  ;;  %6881 = vtanh.f32 %v5882_v8  ;;  %v5883_v22 = vadd.f32 %v3618_v51, %v8730_v33 }
 0x3a4   : > { %v6858_v0 = vpop.eup %6857  ;;  %5121 = vst [vmem:[%s8765_s14 + $0x4e0] sm:$0xff] %v6856_v25  ;;  %v5947_v46 = vadd.f32 %v4004_v37, %v8734_v15  ;;  %v3620_v49 = vpop.f32.mrb[149].mxu1  ;;  %6883 = vtanh.f32 %v5946_v18 }
 0x3a5   : > { %v6860_v57 = vpop.eup %6859  ;;  %5120 = vst [vmem:[%s8765_s14 + $0x4d8] sm:$0xff] %v6858_v0  ;;  %v4006_v60 = vpop.f32.mrb[149].mxu0  ;;  %v5884_v58 = vadd.f32 %v3620_v49, %v8739_v55  ;;  %6885 = vtanh.f32 %v5883_v22 }
 0x3a6   : > { %v6862_v63 = vpop.eup %6861  ;;  %5122 = vst [vmem:[%s8765_s14 + $0x4e8] sm:$0xff] %v6860_v57  ;;  %v5948_v26 = vadd.f32 %v4006_v60, %v8743_v10  ;;  %v3622_v59 = vpop.f32.mrb[150].mxu1  ;;  %6887 = vtanh.f32 %v5947_v46 }
 0x3a7   : > { %v6864_v5 = vpop.eup %6863  ;;  %5126 = vst [vmem:[%s8765_s14 + $0x508] sm:$0xff] %v6862_v63  ;;  %v4008_v61 = vpop.f32.mrb[150].mxu0  ;;  %v5885_v44 = vadd.f32 %v3622_v59, %v8730_v33  ;;  %6889 = vtanh.f32 %v5884_v58  ;;  %4339 = vmatmul.mubr.bf16.gmra.mrb[192].mxu1 %v8186_v42  ;;  %4677 = vmatmul.mubr.bf16.gmra.mrb[0].mxu0 %v8186_v42 }
 0x3a8   : > { %v6866_v6 = vpop.eup %6865  ;;  %5128 = vst [vmem:[%s8765_s14 + $0x518] sm:$0xff] %v6864_v5  ;;  %v3624_v32 = vpop.f32.mrb[151].mxu1  ;;  %v5949_v4 = vadd.f32 %v4008_v61, %v8734_v15  ;;  %6891 = vtanh.f32 %v5948_v26  ;;  %4348 = vmatprep.mubr.bf16.mxu1 %v8210_v39  ;;  %4684 = vmatprep.mubr.bf16.mxu0 %v8210_v39 }
 0x3a9   : > { %v4010_v20 = vpop.f32.mrb[151].mxu0  ;;  %v6868_v52 = vpop.eup %6867  ;;  %5127 = vst [vmem:[%s8765_s14 + $0x510] sm:$0xff] %v6866_v6  ;;  %v5886_v56 = vadd.f32 %v3624_v32, %v8739_v55  ;;  %6893 = vtanh.f32 %v5885_v44 }
 0x3aa   : > { %v6870_v35 = vpop.eup %6869  ;;  %5129 = vst [vmem:[%s8765_s14 + $0x520] sm:$0xff] %v6868_v52  ;;  %v5950_v21 = vadd.f32 %v4010_v20, %v8743_v10  ;;  %6895 = vtanh.f32 %v5949_v4  ;;  %v3628_v13 = vpop.f32.mrb[152].mxu1 }
 0x3ab   : > { %v6872_v48 = vpop.eup %6871  ;;  %5133 = vst [vmem:[%s8765_s14 + $0x540] sm:$0xff] %v6870_v35  ;;  %v4014_v36 = vpop.f32.mrb[152].mxu0  ;;  %6897 = vtanh.f32 %v5886_v56  ;;  %v5887_v7 = vadd.f32 %v3628_v13, %v8730_v33 }
 0x3ac   : > { %v6874_v50 = vpop.eup %6873  ;;  %5135 = vst [vmem:[%s8765_s14 + $0x550] sm:$0xff] %v6872_v48  ;;  %v5951_v1 = vadd.f32 %v4014_v36, %v8734_v15  ;;  %v3630_v9 = vpop.f32.mrb[153].mxu1  ;;  %6899 = vtanh.f32 %v5950_v21 }
 0x3ad   : > { %v6876_v29 = vpop.eup %6875  ;;  %5134 = vst [vmem:[%s8765_s14 + $0x548] sm:$0xff] %v6874_v50  ;;  %v4016_v39 = vpop.f32.mrb[153].mxu0  ;;  %v5888_v45 = vadd.f32 %v3630_v9, %v8739_v55  ;;  %6901 = vtanh.f32 %v5887_v7 }
 0x3ae   : > { %v6878_v42 = vpop.eup %6877  ;;  %5136 = vst [vmem:[%s8765_s14 + $0x558] sm:$0xff] %v6876_v29  ;;  %v5952_v62 = vadd.f32 %v4016_v39, %v8743_v10  ;;  %v3632_v3 = vpop.f32.mrb[154].mxu1  ;;  %6903 = vtanh.f32 %v5951_v1 }
 0x3af   : > { %v6880_v14 = vpop.eup %6879  ;;  %5140 = vst [vmem:[%s8765_s14 + $0x578] sm:$0xff] %v6878_v42  ;;  %v4018_v40 = vpop.f32.mrb[154].mxu0  ;;  %v5889_v41 = vadd.f32 %v3632_v3, %v8730_v33  ;;  %6905 = vtanh.f32 %v5888_v45  ;;  %4349 = vmatmul.mubr.bf16.gmra.mrb[196].mxu1 %v8206_v53  ;;  %4685 = vmatmul.mubr.bf16.gmra.mrb[4].mxu0 %v8206_v53 }
 0x3b0   : > { %v6882_v34 = vpop.eup %6881  ;;  %5142 = vst [vmem:[%s8765_s14 + $0x588] sm:$0xff] %v6880_v14  ;;  %v3634_v31 = vpop.f32.mrb[155].mxu1  ;;  %v5953_v8 = vadd.f32 %v4018_v40, %v8734_v15  ;;  %6907 = vtanh.f32 %v5952_v62  ;;  %4358 = vmatprep.mubr.bf16.mxu1 %v8230_v38  ;;  %4692 = vmatprep.mubr.bf16.mxu0 %v8230_v38 }
 0x3b1   : > { %v4020_v12 = vpop.f32.mrb[155].mxu0  ;;  %v6884_v28 = vpop.eup %6883  ;;  %5141 = vst [vmem:[%s8765_s14 + $0x580] sm:$0xff] %v6882_v34  ;;  %v5890_v18 = vadd.f32 %v3634_v31, %v8739_v55  ;;  %6909 = vtanh.f32 %v5889_v41 }
 0x3b2   : > { %v6886_v25 = vpop.eup %6885  ;;  %5143 = vst [vmem:[%s8765_s14 + $0x590] sm:$0xff] %v6884_v28  ;;  %v5954_v57 = vadd.f32 %v4020_v12, %v8743_v10  ;;  %6911 = vtanh.f32 %v5953_v8  ;;  %v3638_v63 = vpop.f32.mrb[156].mxu1 }
 0x3b3   : > { %v6888_v0 = vpop.eup %6887  ;;  %5147 = vst [vmem:[%s8765_s14 + $0x5b0] sm:$0xff] %v6886_v25  ;;  %v4024_v22 = vpop.f32.mrb[156].mxu0  ;;  %6913 = vtanh.f32 %v5890_v18  ;;  %v5891_v46 = vadd.f32 %v3638_v63, %v8730_v33 }
 0x3b4   : > { %v6890_v51 = vpop.eup %6889  ;;  %5149 = vst [vmem:[%s8765_s14 + $0x5c0] sm:$0xff] %v6888_v0  ;;  %v5955_v49 = vadd.f32 %v4024_v22, %v8734_v15  ;;  %v3640_v60 = vpop.f32.mrb[157].mxu1  ;;  %6915 = vtanh.f32 %v5954_v57 }
 0x3b5   : > { %v6892_v37 = vpop.eup %6891  ;;  %5148 = vst [vmem:[%s8765_s14 + $0x5b8] sm:$0xff] %v6890_v51  ;;  %v4026_v38 = vpop.f32.mrb[157].mxu0  ;;  %v5892_v58 = vadd.f32 %v3640_v60, %v8739_v55  ;;  %6917 = vtanh.f32 %v5891_v46 }
 0x3b6   : > { %v6894_v53 = vpop.eup %6893  ;;  %5150 = vst [vmem:[%s8765_s14 + $0x5c8] sm:$0xff] %v6892_v37  ;;  %v5956_v26 = vadd.f32 %v4026_v38, %v8743_v10  ;;  %v3642_v59 = vpop.f32.mrb[158].mxu1  ;;  %6919 = vtanh.f32 %v5955_v49 }
 0x3b7   : > { %v6896_v5 = vpop.eup %6895  ;;  %5154 = vst [vmem:[%s8765_s14 + $0x5e8] sm:$0xff] %v6894_v53  ;;  %v4028_v61 = vpop.f32.mrb[158].mxu0  ;;  %v5893_v44 = vadd.f32 %v3642_v59, %v8730_v33  ;;  %6921 = vtanh.f32 %v5892_v58  ;;  %4359 = vmatmul.mubr.bf16.gmra.mrb[200].mxu1 %v8226_v47  ;;  %4693 = vmatmul.mubr.bf16.gmra.mrb[8].mxu0 %v8226_v47 }
 0x3b8   : > { %v6898_v6 = vpop.eup %6897  ;;  %5156 = vst [vmem:[%s8765_s14 + $0x5f8] sm:$0xff] %v6896_v5  ;;  %v3644_v32 = vpop.f32.mrb[159].mxu1  ;;  %v5957_v4 = vadd.f32 %v4028_v61, %v8734_v15  ;;  %6923 = vtanh.f32 %v5956_v26  ;;  %4368 = vmatprep.mubr.bf16.mxu1 %v8250_v19  ;;  %4700 = vmatprep.mubr.bf16.mxu0 %v8250_v19 }
 0x3b9   : > { %v4030_v20 = vpop.f32.mrb[159].mxu0  ;;  %v6900_v52 = vpop.eup %6899  ;;  %5155 = vst [vmem:[%s8765_s14 + $0x5f0] sm:$0xff] %v6898_v6  ;;  %v5894_v56 = vadd.f32 %v3644_v32, %v8739_v55  ;;  %6925 = vtanh.f32 %v5893_v44 }
 0x3ba   : > { %v6902_v35 = vpop.eup %6901  ;;  %5157 = vst [vmem:[%s8765_s14 + $0x600] sm:$0xff] %v6900_v52  ;;  %v5958_v48 = vadd.f32 %v4030_v20, %v8743_v10  ;;  %6927 = vtanh.f32 %v5957_v4  ;;  %v5609_v21 = vpop.f32.mrb[160].mxu0 }
 0x3bb   : > { %v6904_v33 = vpop.eup %6903  ;;  %5161 = vst [vmem:[%s8765_s14 + $0x620] sm:$0xff] %v6902_v35  ;;  %6929 = vtanh.f32 %v5894_v56  ;;  %v5610_v50 = vpop.f32.mrb[161].mxu0 }
 0x3bc   : > { %v6906_v15 = vpop.eup %6905  ;;  %5163 = vst [vmem:[%s8765_s14 + $0x630] sm:$0xff] %v6904_v33  ;;  %6931 = vtanh.f32 %v5958_v48  ;;  %v9060_v10 = vadd.f32 %v5610_v50, %v5609_v21  ;;  %v5612_v19 = vpop.f32.mrb[162].mxu0 }
 0x3bd   : > { %v6908_v55 = vpop.eup %6907  ;;  %5162 = vst [vmem:[%s8765_s14 + $0x628] sm:$0xff] %v6906_v15  ;;  %v5613_v36 = vpop.f32.mrb[163].mxu0 }
 0x3be   : > { %v6910_v47 = vpop.eup %6909  ;;  %5164 = vst [vmem:[%s8765_s14 + $0x638] sm:$0xff] %v6908_v55  ;;  %v9064_v7 = vadd.f32 %v5613_v36, %v5612_v19 }
 0x3bf   : > { %v6912_v29 = vpop.eup %6911  ;;  %5168 = vst [vmem:[%s8765_s14 + $0x658] sm:$0xff] %v6910_v47  ;;  %4369 = vmatmul.mubr.bf16.gmra.mrb[204].mxu1 %v8246_v16  ;;  %4701 = vmatmul.mubr.bf16.gmra.mrb[12].mxu0 %v8246_v16 }
 0x3c0   : > { %v6914_v13 = vpop.eup %6913  ;;  %5170 = vst [vmem:[%s8765_s14 + $0x668] sm:$0xff] %v6912_v29  ;;  %4378 = vmatprep.mubr.bf16.mxu1 %v8270_v43  ;;  %4708 = vmatprep.mubr.bf16.mxu0 %v8270_v43 }
 0x3c1   : > { %v6916_v42 = vpop.eup %6915  ;;  %5169 = vst [vmem:[%s8765_s14 + $0x660] sm:$0xff] %v6914_v13 }
 0x3c2   : > { %v6918_v1 = vpop.eup %6917  ;;  %5171 = vst [vmem:[%s8765_s14 + $0x670] sm:$0xff] %v6916_v42  ;;  %v5615_v45 = vpop.f32.mrb[164].mxu0 }
 0x3c3   : > { %v6920_v9 = vpop.eup %6919  ;;  %5175 = vst [vmem:[%s8765_s14 + $0x690] sm:$0xff] %v6918_v1  ;;  %v5616_v3 = vpop.f32.mrb[165].mxu0 }
 0x3c4   : > { %v6922_v39 = vpop.eup %6921  ;;  %5177 = vst [vmem:[%s8765_s14 + $0x6a0] sm:$0xff] %v6920_v9  ;;  %v9076_v16 = vadd.f32 %v5616_v3, %v5615_v45  ;;  %v5618_v34 = vpop.f32.mrb[166].mxu0 }
 0x3c5   : > { %v6924_v14 = vpop.eup %6923  ;;  %5176 = vst [vmem:[%s8765_s14 + $0x698] sm:$0xff] %v6922_v39  ;;  %v5619_v31 = vpop.f32.mrb[167].mxu0 }
 0x3c6   : > { %v6926_v62 = vpop.eup %6925  ;;  %5178 = vst [vmem:[%s8765_s14 + $0x6a8] sm:$0xff] %v6924_v14  ;;  %v9080_v43 = vadd.f32 %v5619_v31, %v5618_v34 }
 0x3c7   : > { %v6928_v40 = vpop.eup %6927  ;;  %5182 = vst [vmem:[%s8765_s14 + $0x6c8] sm:$0xff] %v6926_v62  ;;  %4379 = vmatmul.mubr.bf16.gmra.mrb[208].mxu1 %v8266_v17  ;;  %4709 = vmatmul.mubr.bf16.gmra.mrb[16].mxu0 %v8266_v17 }
 0x3c8   : > { %v6930_v41 = vpop.eup %6929  ;;  %5184 = vst [vmem:[%s8765_s14 + $0x6d8] sm:$0xff] %v6928_v40  ;;  %4388 = vmatprep.mubr.bf16.mxu1 %v8290_v24  ;;  %4716 = vmatprep.mubr.bf16.mxu0 %v8290_v24 }
 0x3c9   : > { %v6932_v12 = vpop.eup %6931  ;;  %5183 = vst [vmem:[%s8765_s14 + $0x6d0] sm:$0xff] %v6930_v41 }
 0x3ca   : > { %5185 = vst [vmem:[%s8765_s14 + $0x6e0] sm:$0xff] %v6932_v12  ;;  %v5621_v28 = vpop.f32.mrb[168].mxu0 }
 0x3cb   : > { %v5622_v8 = vpop.f32.mrb[169].mxu0 }
 0x3cc   : > { %v9087_v25 = vadd.f32 %v5622_v8, %v5621_v28  ;;  %v5624_v18 = vpop.f32.mrb[170].mxu0 }
 0x3cd   : > { %v5625_v0 = vpop.f32.mrb[171].mxu0 }
 0x3ce   : > { %v9089_v57 = vadd.f32 %v5625_v0, %v5624_v18 }
 0x3cf   : > { %4389 = vmatmul.mubr.bf16.gmra.mrb[212].mxu1 %v8286_v54  ;;  %4717 = vmatmul.mubr.bf16.gmra.mrb[20].mxu0 %v8286_v54 }
 0x3d0   : > { %4398 = vmatprep.mubr.bf16.mxu1 %v8310_v27  ;;  %4724 = vmatprep.mubr.bf16.mxu0 %v8310_v27 }
 0x3d2   : > { %v5627_v17 = vpop.f32.mrb[172].mxu0 }
 0x3d3   : > { %v5628_v51 = vpop.f32.mrb[173].mxu0 }
 0x3d4   : > { %v9095_v37 = vadd.f32 %v5628_v51, %v5627_v17  ;;  %v5630_v24 = vpop.f32.mrb[174].mxu0 }
 0x3d5   : > { %v5631_v63 = vpop.f32.mrb[175].mxu0 }
 0x3d6   : > { %v9097_v22 = vadd.f32 %v5631_v63, %v5630_v24 }
 0x3d7   : > { %4399 = vmatmul.mubr.bf16.gmra.mrb[216].mxu1 %v8306_v11  ;;  %4725 = vmatmul.mubr.bf16.gmra.mrb[24].mxu0 %v8306_v11 }
 0x3d8   : > { %4408 = vmatprep.mubr.bf16.mxu1 %v8330_v2  ;;  %4732 = vmatprep.mubr.bf16.mxu0 %v8330_v2 }
 0x3da   : > { %v5633_v54 = vpop.f32.mrb[176].mxu0 }
 0x3db   : > { %v5634_v53 = vpop.f32.mrb[177].mxu0 }
 0x3dc   : > { %v9103_v46 = vadd.f32 %v5634_v53, %v5633_v54  ;;  %v5636_v27 = vpop.f32.mrb[178].mxu0 }
 0x3dd   : > { %v5637_v49 = vpop.f32.mrb[179].mxu0 }
 0x3de   : > { %v9105_v60 = vadd.f32 %v5637_v49, %v5636_v27 }
 0x3df   : > { %4409 = vmatmul.mubr.bf16.gmra.mrb[220].mxu1 %v8326_v23  ;;  %4733 = vmatmul.mubr.bf16.gmra.mrb[28].mxu0 %v8326_v23 }
 0x3e2   : > { %v5639_v38 = vpop.f32.mrb[180].mxu0 }
 0x3e3   : > { %v5640_v5 = vpop.f32.mrb[181].mxu0 }
 0x3e4   : > { %v9109_v58 = vadd.f32 %v5640_v5, %v5639_v38  ;;  %v5642_v11 = vpop.f32.mrb[182].mxu0 }
 0x3e5   : > { %v5643_v26 = vpop.f32.mrb[183].mxu0 }
 0x3e6   : > { %v9111_v59 = vadd.f32 %v5643_v26, %v5642_v11 }
 0x3ea   : > { %v5645_v2 = vpop.f32.mrb[184].mxu0 }
 0x3eb   : > { %v5646_v61 = vpop.f32.mrb[185].mxu0 }
 0x3ec   : > { %v9113_v6 = vadd.f32 %v5646_v61, %v5645_v2  ;;  %v5648_v44 = vpop.f32.mrb[186].mxu0 }
 0x3ed   : > { %v5649_v32 = vpop.f32.mrb[187].mxu0 }
 0x3ee   : > { %v9115_v20 = vadd.f32 %v5649_v32, %v5648_v44 }
 0x3f2   : > { %v5651_v52 = vpop.f32.mrb[188].mxu0 }
 0x3f3   : > { %v5652_v4 = vpop.f32.mrb[189].mxu0 }
 0x3f4   : > { %v9117_v35 = vadd.f32 %v5652_v4, %v5651_v52  ;;  %v5654_v23 = vpop.f32.mrb[190].mxu0  ;;  %v2092_v4 = vsub.s32 4, %v9483_v30 }
 0x3f5   : > { %v5655_v56 = vpop.f32.mrb[191].mxu0 }
 0x3f6   : > { %v9119_v33 = vadd.f32 %v5655_v56, %v5654_v23  ;;  %v2100_v23 = vsub.s32 6, %v9483_v30 }
 0x3fa   : > { %v5657_v48 = vpop.f32.mrb[192].mxu0 }
 0x3fb   : > { %v5658_v15 = vpop.f32.mrb[193].mxu0 }
 0x3fc   : > { %v9121_v55 = vadd.f32 %v5658_v15, %v5657_v48  ;;  %v5660_v21 = vpop.f32.mrb[194].mxu0  ;;  %v2096_v15 = vsub.s32 5, %v9483_v30 }
 0x3fd   : > { %v5661_v47 = vpop.f32.mrb[195].mxu0 }
 0x3fe   : > { %v9123_v50 = vadd.f32 %v5661_v47, %v5660_v21 }
 0x402   : > { %v5663_v29 = vpop.f32.mrb[196].mxu0 }
 0x403   : > { %v5664_v19 = vpop.f32.mrb[197].mxu0 }
 0x404   : > { %v9125_v13 = vadd.f32 %v5664_v19, %v5663_v29  ;;  %v5666_v36 = vpop.f32.mrb[198].mxu0  ;;  %v7125_v29 = vld [vmem:[%s9398_s6] sm:$0xff] }
 0x405   : > { %v5667_v42 = vpop.f32.mrb[199].mxu0  ;;  %v9159_v19 = vrot.slane %v7125_v29, %v2092_v4 }
 0x406   : > { %v9127_v1 = vadd.f32 %v5667_v42, %v5666_v36  ;;  %v9161_v36 = vrot.slane %v7125_v29, %v2100_v23  ;;  %v9163_v42 = vrot.slane %v7125_v29, %v2096_v15 }
 0x408   : > { %v4454_v30 = vadd.f32 %v9060_v10, %v9161_v36  ;;  %v4465_v15 = vadd.f32 %v9080_v43, %v9161_v36 }
 0x40a   : > { %v5669_v9 = vpop.f32.mrb[200].mxu0 }
 0x40b   : > { %v5670_v39 = vpop.f32.mrb[201].mxu0 }
 0x40c   : > { %v9129_v14 = vadd.f32 %v5670_v39, %v5669_v9  ;;  %v5672_v45 = vpop.f32.mrb[202].mxu0 }
 0x40d   : > { %v5673_v62 = vpop.f32.mrb[203].mxu0 }
 0x40e   : > { %v9131_v3 = vadd.f32 %v5673_v62, %v5672_v45 }
 0x412   : > { %v5675_v40 = vpop.f32.mrb[204].mxu0 }
 0x413   : > { %v5676_v34 = vpop.f32.mrb[205].mxu0 }
 0x414   : > { %v9133_v41 = vadd.f32 %v5676_v34, %v5675_v40  ;;  %v5678_v31 = vpop.f32.mrb[206].mxu0 }
 0x415   : > { %v5679_v12 = vpop.f32.mrb[207].mxu0 }
 0x416   : > { %v9135_v28 = vadd.f32 %v5679_v12, %v5678_v31 }
 0x41a   : > { %v5681_v8 = vpop.f32.mrb[208].mxu0 }
 0x41b   : > { %v5682_v18 = vpop.f32.mrb[209].mxu0 }
 0x41c   : > { %v9137_v0 = vadd.f32 %v5682_v18, %v5681_v8  ;;  %v5684_v17 = vpop.f32.mrb[210].mxu0  ;;  %v4457_v18 = vadd.f32 %v9064_v7, %v9161_v36 }
 0x41d   : > { %v5685_v51 = vpop.f32.mrb[211].mxu0 }
 0x41e   : > { %v9139_v24 = vadd.f32 %v5685_v51, %v5684_v17 }
 0x422   : > { %v5687_v63 = vpop.f32.mrb[212].mxu0 }
 0x423   : > { %v5688_v54 = vpop.f32.mrb[213].mxu0 }
 0x424   : > { %v9141_v53 = vadd.f32 %v5688_v54, %v5687_v63  ;;  %v5690_v27 = vpop.f32.mrb[214].mxu0 }
 0x425   : > { %v5691_v49 = vpop.f32.mrb[215].mxu0 }
 0x426   : > { %v9143_v38 = vadd.f32 %v5691_v49, %v5690_v27 }
 0x42a   : > { %v5693_v5 = vpop.f32.mrb[216].mxu0 }
 0x42b   : > { %v5694_v11 = vpop.f32.mrb[217].mxu0 }
 0x42c   : > { %v9145_v26 = vadd.f32 %v5694_v11, %v5693_v5  ;;  %v5696_v2 = vpop.f32.mrb[218].mxu0 }
 0x42d   : > { %v5697_v61 = vpop.f32.mrb[219].mxu0 }
 0x42e   : > { %v9147_v44 = vadd.f32 %v5697_v61, %v5696_v2 }
 0x432   : > { %v5699_v32 = vpop.f32.mrb[220].mxu0 }
 0x433   : > { %v5700_v52 = vpop.f32.mrb[221].mxu0 }
 0x434   : > { %v9151_v56 = vadd.f32 %v5700_v52, %v5699_v32  ;;  %v5702_v48 = vpop.f32.mrb[222].mxu0  ;;  %v4462_v32 = vadd.f32 %v9076_v16, %v9161_v36 }
 0x435   : > { %v5703_v21 = vpop.f32.mrb[223].mxu0 }
 0x436   : > { %v9154_v47 = vadd.f32 %v5703_v21, %v5702_v48 }
 0x43a   : > { %v4260_v9 = vpop.f32.mrb[160].mxu1  ;;  %v5721_v39 = vpop.f32.mrb[224].mxu0 }
 0x43b   : > { %v5959_v45 = vadd.f32 %v4260_v9, %v9159_v19  ;;  %v4262_v62 = vpop.f32.mrb[161].mxu1  ;;  %v5722_v40 = vpop.f32.mrb[225].mxu0 }
 0x43c   : > { %v5960_v34 = vadd.f32 %v4262_v62, %v9163_v42  ;;  %v5723_v31 = vadd.f32 %v5722_v40, %v5721_v39  ;;  %v4264_v12 = vpop.f32.mrb[162].mxu1  ;;  %v5724_v8 = vpop.f32.mrb[226].mxu0 }
 0x43d   : > { %6933 = vtanh.f32 %v5959_v45  ;;  %v5961_v17 = vadd.f32 %v4264_v12, %v9159_v19  ;;  %v4266_v51 = vpop.f32.mrb[163].mxu1  ;;  %v5725_v63 = vpop.f32.mrb[227].mxu0 }
 0x43e   : > { %6935 = vtanh.f32 %v5960_v34  ;;  %v4615_v54 = vadd.f32 %v5723_v31, %v4454_v30  ;;  %v5962_v27 = vadd.f32 %v4266_v51, %v9163_v42  ;;  %v5726_v49 = vadd.f32 %v5725_v63, %v5724_v8 }
 0x43f   : > { %6937 = vtanh.f32 %v5961_v17 }
 0x440   : > { %6939 = vtanh.f32 %v4615_v54  ;;  %v4618_v10 = vadd.f32 %v5726_v49, %v4457_v18  ;;  %v4470_v54 = vadd.f32 %v9087_v25, %v9161_v36 }
 0x441   : > { %6941 = vtanh.f32 %v5962_v27 }
 0x442   : > { %6943 = vtanh.f32 %v4618_v10  ;;  %v4270_v5 = vpop.f32.mrb[164].mxu1  ;;  %v5727_v11 = vpop.f32.mrb[228].mxu0 }
 0x443   : > { %v5963_v2 = vadd.f32 %v4270_v5, %v9159_v19  ;;  %v4272_v7 = vpop.f32.mrb[165].mxu1  ;;  %v5728_v61 = vpop.f32.mrb[229].mxu0 }
 0x444   : > { %v5964_v52 = vadd.f32 %v4272_v7, %v9163_v42  ;;  %v5729_v4 = vadd.f32 %v5728_v61, %v5727_v11  ;;  %v4274_v23 = vpop.f32.mrb[166].mxu1  ;;  %v5730_v48 = vpop.f32.mrb[230].mxu0  ;;  %v4473_v11 = vadd.f32 %v9089_v57, %v9161_v36 }
 0x445   : > { %6945 = vtanh.f32 %v5963_v2  ;;  %v5965_v21 = vadd.f32 %v4274_v23, %v9159_v19  ;;  %v4276_v29 = vpop.f32.mrb[167].mxu1  ;;  %v5731_v9 = vpop.f32.mrb[231].mxu0 }
 0x446   : > { %6947 = vtanh.f32 %v5964_v52  ;;  %v4623_v39 = vadd.f32 %v5729_v4, %v4462_v32  ;;  %v5966_v16 = vadd.f32 %v4276_v29, %v9163_v42  ;;  %v5732_v45 = vadd.f32 %v5731_v9, %v5730_v48 }
 0x447   : > { %v6934_v62 = vpop.eup %6933  ;;  %6949 = vtanh.f32 %v5965_v21 }
 0x448   : > { %v6936_v40 = vpop.eup %6935  ;;  %4969 = vst [vmem:[%s8765_s14 + $0x20] sm:$0xff] %v6934_v62  ;;  %6951 = vtanh.f32 %v4623_v39  ;;  %v4626_v30 = vadd.f32 %v5732_v45, %v4465_v15 }
 0x449   : > { %v6938_v43 = vpop.eup %6937  ;;  %4970 = vst [vmem:[%s8765_s14 + $0x28] sm:$0xff] %v6936_v40  ;;  %6953 = vtanh.f32 %v5966_v16  ;;  %v4478_v40 = vadd.f32 %v9095_v37, %v9161_v36 }
 0x44a   : > { %v6940_v34 = vpop.eup %6939  ;;  %4976 = vst [vmem:[%s8765_s14 + $0x58] sm:$0xff] %v6938_v43  ;;  %6955 = vtanh.f32 %v4626_v30  ;;  %v4280_v31 = vpop.f32.mrb[168].mxu1 }
 0x44b   : > { %v5733_v12 = vpop.f32.mrb[232].mxu0  ;;  %v6942_v8 = vpop.eup %6941  ;;  %4971 = vst [vmem:[%s8765_s14 + $0x30] sm:$0xff] %v6940_v34  ;;  %v5967_v18 = vadd.f32 %v4280_v31, %v9159_v19 }
 0x44c   : > { %v4282_v17 = vpop.f32.mrb[169].mxu1  ;;  %v5734_v51 = vpop.f32.mrb[233].mxu0  ;;  %4977 = vst [vmem:[%s8765_s14 + $0x60] sm:$0xff] %v6942_v8 }
 0x44d   : > { %v6944_v63 = vpop.eup %6943  ;;  %v5968_v27 = vadd.f32 %v4282_v17, %v9163_v42  ;;  %v5735_v49 = vadd.f32 %v5734_v51, %v5733_v12  ;;  %v4284_v10 = vpop.f32.mrb[170].mxu1  ;;  %6957 = vtanh.f32 %v5967_v18  ;;  %v4481_v12 = vadd.f32 %v9097_v22, %v9161_v36 }
 0x44e   : > { %v5736_v5 = vpop.f32.mrb[234].mxu0  ;;  %4978 = vst [vmem:[%s8765_s14 + $0x68] sm:$0xff] %v6944_v63  ;;  %v5969_v2 = vadd.f32 %v4284_v10, %v9159_v19  ;;  %v4286_v7 = vpop.f32.mrb[171].mxu1 }
 0x44f   : > { %v5737_v61 = vpop.f32.mrb[235].mxu0  ;;  %6959 = vtanh.f32 %v5968_v27  ;;  %v4631_v25 = vadd.f32 %v5735_v49, %v4470_v54  ;;  %v5970_v32 = vadd.f32 %v4286_v7, %v9163_v42  ;;  %v6946_v4 = vpop.eup %6945 }
 0x450   : > { %v5738_v52 = vadd.f32 %v5737_v61, %v5736_v5  ;;  %6961 = vtanh.f32 %v5969_v2  ;;  %v6948_v23 = vpop.eup %6947  ;;  %4983 = vst [vmem:[%s8765_s14 + $0x90] sm:$0xff] %v6946_v4 }
 0x451   : > { %6963 = vtanh.f32 %v4631_v25  ;;  %v6950_v48 = vpop.eup %6949  ;;  %4984 = vst [vmem:[%s8765_s14 + $0x98] sm:$0xff] %v6948_v23 }
 0x452   : > { %v4634_v57 = vadd.f32 %v5738_v52, %v4473_v11  ;;  %6965 = vtanh.f32 %v5970_v32  ;;  %v6952_v15 = vpop.eup %6951  ;;  %4990 = vst [vmem:[%s8765_s14 + $0xc8] sm:$0xff] %v6950_v48  ;;  %v4290_v21 = vpop.f32.mrb[172].mxu1  ;;  %v4486_v52 = vadd.f32 %v9103_v46, %v9161_v36 }
 0x453   : > { %v5739_v29 = vpop.f32.mrb[236].mxu0  ;;  %v6954_v9 = vpop.eup %6953  ;;  %4985 = vst [vmem:[%s8765_s14 + $0xa0] sm:$0xff] %v6952_v15  ;;  %v5971_v39 = vadd.f32 %v4290_v21, %v9159_v19  ;;  %v4489_v15 = vadd.f32 %v9105_v60, %v9161_v36 }
 0x454   : > { %6967 = vtanh.f32 %v4634_v57  ;;  %v4292_v16 = vpop.f32.mrb[173].mxu1  ;;  %v5740_v45 = vpop.f32.mrb[237].mxu0  ;;  %4991 = vst [vmem:[%s8765_s14 + $0xd0] sm:$0xff] %v6954_v9 }
 0x455   : > { %v6956_v62 = vpop.eup %6955  ;;  %v5972_v30 = vadd.f32 %v4292_v16, %v9163_v42  ;;  %v5741_v43 = vadd.f32 %v5740_v45, %v5739_v29  ;;  %v4294_v34 = vpop.f32.mrb[174].mxu1  ;;  %6969 = vtanh.f32 %v5971_v39 }
 0x456   : > { %v5742_v31 = vpop.f32.mrb[238].mxu0  ;;  %4992 = vst [vmem:[%s8765_s14 + $0xd8] sm:$0xff] %v6956_v62  ;;  %v5973_v8 = vadd.f32 %v4294_v34, %v9159_v19  ;;  %v4296_v18 = vpop.f32.mrb[175].mxu1 }
 0x457   : > { %v5743_v17 = vpop.f32.mrb[239].mxu0  ;;  %6971 = vtanh.f32 %v5972_v30  ;;  %v4639_v37 = vadd.f32 %v5741_v43, %v4478_v40  ;;  %v5974_v51 = vadd.f32 %v4296_v18, %v9163_v42  ;;  %v6958_v54 = vpop.eup %6957 }
 0x458   : > { %v5744_v63 = vadd.f32 %v5743_v17, %v5742_v31  ;;  %6973 = vtanh.f32 %v5973_v8  ;;  %4997 = vst [vmem:[%s8765_s14 + $0x100] sm:$0xff] %v6958_v54 }
 0x459   : > { %v6960_v27 = vpop.eup %6959  ;;  %6975 = vtanh.f32 %v4639_v37  ;;  %v4494_v37 = vadd.f32 %v9109_v58, %v9161_v36 }
 0x45a   : > { %v4642_v22 = vadd.f32 %v5744_v63, %v4481_v12  ;;  %v6962_v49 = vpop.eup %6961  ;;  %4998 = vst [vmem:[%s8765_s14 + $0x108] sm:$0xff] %v6960_v27  ;;  %6977 = vtanh.f32 %v5974_v51  ;;  %v4300_v5 = vpop.f32.mrb[176].mxu1 }
 0x45b   : > { %v6964_v10 = vpop.eup %6963  ;;  %5004 = vst [vmem:[%s8765_s14 + $0x138] sm:$0xff] %v6962_v49  ;;  %v5745_v11 = vpop.f32.mrb[240].mxu0  ;;  %v5975_v7 = vadd.f32 %v4300_v5, %v9159_v19 }
 0x45c   : > { %6979 = vtanh.f32 %v4642_v22  ;;  %v6966_v2 = vpop.eup %6965  ;;  %4999 = vst [vmem:[%s8765_s14 + $0x110] sm:$0xff] %v6964_v10  ;;  %v4302_v61 = vpop.f32.mrb[177].mxu1  ;;  %v4497_v22 = vadd.f32 %v9111_v59, %v9161_v36 }
 0x45d   : > { %v5746_v25 = vpop.f32.mrb[241].mxu0  ;;  %5005 = vst [vmem:[%s8765_s14 + $0x140] sm:$0xff] %v6966_v2  ;;  %v5976_v4 = vadd.f32 %v4302_v61, %v9163_v42  ;;  %v4304_v57 = vpop.f32.mrb[178].mxu1  ;;  %6981 = vtanh.f32 %v5975_v7 }
 0x45e   : > { %v6968_v32 = vpop.eup %6967  ;;  %v5747_v23 = vadd.f32 %v5746_v25, %v5745_v11  ;;  %v5748_v48 = vpop.f32.mrb[242].mxu0  ;;  %v5977_v21 = vadd.f32 %v4304_v57, %v9159_v19 }
 0x45f   : > { %5006 = vst [vmem:[%s8765_s14 + $0x148] sm:$0xff] %v6968_v32  ;;  %v4306_v29 = vpop.f32.mrb[179].mxu1  ;;  %v5749_v9 = vpop.f32.mrb[243].mxu0  ;;  %6983 = vtanh.f32 %v5976_v4 }
 0x460   : > { %v4647_v46 = vadd.f32 %v5747_v23, %v4486_v52  ;;  %v5978_v39 = vadd.f32 %v4306_v29, %v9163_v42  ;;  %v5750_v16 = vadd.f32 %v5749_v9, %v5748_v48  ;;  %v6970_v45 = vpop.eup %6969  ;;  %6985 = vtanh.f32 %v5977_v21 }
 0x461   : > { %v6972_v62 = vpop.eup %6971  ;;  %5011 = vst [vmem:[%s8765_s14 + $0x170] sm:$0xff] %v6970_v45  ;;  %v4502_v29 = vadd.f32 %v9113_v6, %v9161_v36  ;;  %v4505_v45 = vadd.f32 %v9115_v20, %v9161_v36 }
 0x462   : > { %6987 = vtanh.f32 %v4647_v46  ;;  %v4650_v60 = vadd.f32 %v5750_v16, %v4489_v15  ;;  %v6974_v40 = vpop.eup %6973  ;;  %5012 = vst [vmem:[%s8765_s14 + $0x178] sm:$0xff] %v6972_v62  ;;  %v4310_v43 = vpop.f32.mrb[180].mxu1 }
 0x463   : > { %6989 = vtanh.f32 %v5978_v39  ;;  %v6976_v30 = vpop.eup %6975  ;;  %5018 = vst [vmem:[%s8765_s14 + $0x1a8] sm:$0xff] %v6974_v40  ;;  %v5751_v34 = vpop.f32.mrb[244].mxu0  ;;  %v5979_v12 = vadd.f32 %v4310_v43, %v9159_v19 }
 0x464   : > { %6991 = vtanh.f32 %v4650_v60  ;;  %v6978_v31 = vpop.eup %6977  ;;  %5013 = vst [vmem:[%s8765_s14 + $0x180] sm:$0xff] %v6976_v30  ;;  %v4312_v8 = vpop.f32.mrb[181].mxu1 }
 0x465   : > { %v5752_v18 = vpop.f32.mrb[245].mxu0  ;;  %5019 = vst [vmem:[%s8765_s14 + $0x1b0] sm:$0xff] %v6978_v31  ;;  %v5980_v51 = vadd.f32 %v4312_v8, %v9163_v42  ;;  %v4314_v54 = vpop.f32.mrb[182].mxu1  ;;  %6993 = vtanh.f32 %v5979_v12 }
 0x466   : > { %v6980_v17 = vpop.eup %6979  ;;  %v5753_v63 = vadd.f32 %v5752_v18, %v5751_v34  ;;  %v5754_v27 = vpop.f32.mrb[246].mxu0  ;;  %v5981_v49 = vadd.f32 %v4314_v54, %v9159_v19 }
 0x467   : > { %5020 = vst [vmem:[%s8765_s14 + $0x1b8] sm:$0xff] %v6980_v17  ;;  %v4316_v10 = vpop.f32.mrb[183].mxu1  ;;  %v5755_v5 = vpop.f32.mrb[247].mxu0  ;;  %6995 = vtanh.f32 %v5980_v51 }
 0x468   : > { %v4655_v58 = vadd.f32 %v5753_v63, %v4494_v37  ;;  %v5982_v11 = vadd.f32 %v4316_v10, %v9163_v42  ;;  %v5756_v2 = vadd.f32 %v5755_v5, %v5754_v27  ;;  %v6982_v7 = vpop.eup %6981  ;;  %6997 = vtanh.f32 %v5981_v49 }
 0x469   : > { %v6984_v61 = vpop.eup %6983  ;;  %5025 = vst [vmem:[%s8765_s14 + $0x1e0] sm:$0xff] %v6982_v7 }
 0x46a   : > { %6999 = vtanh.f32 %v4655_v58  ;;  %v4658_v59 = vadd.f32 %v5756_v2, %v4497_v22  ;;  %v6986_v25 = vpop.eup %6985  ;;  %5026 = vst [vmem:[%s8765_s14 + $0x1e8] sm:$0xff] %v6984_v61  ;;  %v4320_v52 = vpop.f32.mrb[184].mxu1  ;;  %v4510_v22 = vadd.f32 %v9117_v35, %v9161_v36 }
 0x46b   : > { %7001 = vtanh.f32 %v5982_v11  ;;  %5032 = vst [vmem:[%s8765_s14 + $0x218] sm:$0xff] %v6986_v25  ;;  %v5757_v4 = vpop.f32.mrb[248].mxu0  ;;  %v5983_v57 = vadd.f32 %v4320_v52, %v9159_v19  ;;  %v4322_v48 = vpop.f32.mrb[185].mxu1  ;;  %v4513_v11 = vadd.f32 %v9119_v33, %v9161_v36 }
 0x46c   : > { %v6988_v32 = vpop.eup %6987  ;;  %7003 = vtanh.f32 %v4658_v59  ;;  %v5758_v15 = vpop.f32.mrb[249].mxu0  ;;  %v5984_v9 = vadd.f32 %v4322_v48, %v9163_v42 }
 0x46d   : > { %v6990_v23 = vpop.eup %6989  ;;  %5027 = vst [vmem:[%s8765_s14 + $0x1f0] sm:$0xff] %v6988_v32  ;;  %v5759_v46 = vadd.f32 %v5758_v15, %v5757_v4  ;;  %v4324_v39 = vpop.f32.mrb[186].mxu1  ;;  %7005 = vtanh.f32 %v5983_v57 }
 0x46e   : > { %v6992_v21 = vpop.eup %6991  ;;  %5033 = vst [vmem:[%s8765_s14 + $0x220] sm:$0xff] %v6990_v23  ;;  %v5760_v16 = vpop.f32.mrb[250].mxu0  ;;  %v5985_v62 = vadd.f32 %v4324_v39, %v9159_v19  ;;  %7007 = vtanh.f32 %v5984_v9  ;;  %v4518_v39 = vadd.f32 %v9121_v55, %v9161_v36 }
 0x46f   : > { %5034 = vst [vmem:[%s8765_s14 + $0x228] sm:$0xff] %v6992_v21  ;;  %v4326_v60 = vpop.f32.mrb[187].mxu1  ;;  %v5761_v40 = vpop.f32.mrb[251].mxu0  ;;  %v4663_v6 = vadd.f32 %v5759_v46, %v4502_v29 }
 0x470   : > { %v5986_v30 = vadd.f32 %v4326_v60, %v9163_v42  ;;  %v5762_v43 = vadd.f32 %v5761_v40, %v5760_v16  ;;  %v6994_v34 = vpop.eup %6993  ;;  %7009 = vtanh.f32 %v5985_v62  ;;  %v4521_v40 = vadd.f32 %v9123_v50, %v9161_v36 }
 0x471   : > { %v6996_v31 = vpop.eup %6995  ;;  %5039 = vst [vmem:[%s8765_s14 + $0x250] sm:$0xff] %v6994_v34  ;;  %7011 = vtanh.f32 %v4663_v6 }
 0x472   : > { %v4666_v20 = vadd.f32 %v5762_v43, %v4505_v45  ;;  %v6998_v12 = vpop.eup %6997  ;;  %5040 = vst [vmem:[%s8765_s14 + $0x258] sm:$0xff] %v6996_v31  ;;  %7013 = vtanh.f32 %v5986_v30  ;;  %v4330_v18 = vpop.f32.mrb[188].mxu1 }
 0x473   : > { %5046 = vst [vmem:[%s8765_s14 + $0x288] sm:$0xff] %v6998_v12  ;;  %v5763_v17 = vpop.f32.mrb[252].mxu0  ;;  %v5987_v51 = vadd.f32 %v4330_v18, %v9159_v19  ;;  %v4332_v63 = vpop.f32.mrb[189].mxu1 }
 0x474   : > { %v7000_v8 = vpop.eup %6999  ;;  %7015 = vtanh.f32 %v4666_v20  ;;  %v5764_v54 = vpop.f32.mrb[253].mxu0  ;;  %v5988_v49 = vadd.f32 %v4332_v63, %v9163_v42 }
 0x475   : > { %v7002_v37 = vpop.eup %7001  ;;  %5041 = vst [vmem:[%s8765_s14 + $0x260] sm:$0xff] %v7000_v8  ;;  %v5765_v10 = vadd.f32 %v5764_v54, %v5763_v17  ;;  %v4334_v5 = vpop.f32.mrb[190].mxu1  ;;  %7017 = vtanh.f32 %v5987_v51 }
 0x476   : > { %v7004_v27 = vpop.eup %7003  ;;  %5047 = vst [vmem:[%s8765_s14 + $0x290] sm:$0xff] %v7002_v37  ;;  %v5766_v58 = vpop.f32.mrb[254].mxu0  ;;  %v5989_v2 = vadd.f32 %v4334_v5, %v9159_v19  ;;  %7019 = vtanh.f32 %v5988_v49  ;;  %v4526_v49 = vadd.f32 %v9125_v13, %v9161_v36 }
 0x477   : > { %5048 = vst [vmem:[%s8765_s14 + $0x298] sm:$0xff] %v7004_v27  ;;  %v4336_v7 = vpop.f32.mrb[191].mxu1  ;;  %v5767_v61 = vpop.f32.mrb[255].mxu0  ;;  %v4671_v35 = vadd.f32 %v5765_v10, %v4510_v22 }
 0x478   : > { %v5990_v59 = vadd.f32 %v4336_v7, %v9163_v42  ;;  %v5768_v25 = vadd.f32 %v5767_v61, %v5766_v58  ;;  %v7006_v32 = vpop.eup %7005  ;;  %7021 = vtanh.f32 %v5989_v2  ;;  %v4529_v2 = vadd.f32 %v9127_v1, %v9161_v36 }
 0x479   : > { %v7008_v52 = vpop.eup %7007  ;;  %5053 = vst [vmem:[%s8765_s14 + $0x2c0] sm:$0xff] %v7006_v32  ;;  %7023 = vtanh.f32 %v4671_v35 }
 0x47a   : > { %v4674_v33 = vadd.f32 %v5768_v25, %v4513_v11  ;;  %v7010_v4 = vpop.eup %7009  ;;  %5054 = vst [vmem:[%s8765_s14 + $0x2c8] sm:$0xff] %v7008_v52  ;;  %7025 = vtanh.f32 %v5990_v59  ;;  %v4340_v57 = vpop.f32.mrb[192].mxu1 }
 0x47b   : > { %v7012_v23 = vpop.eup %7011  ;;  %5060 = vst [vmem:[%s8765_s14 + $0x2f8] sm:$0xff] %v7010_v4  ;;  %v5769_v48 = vpop.f32.mrb[0].mxu0  ;;  %v5991_v21 = vadd.f32 %v4340_v57, %v9159_v19 }
 0x47c   : > { %7027 = vtanh.f32 %v4674_v33  ;;  %v7014_v15 = vpop.eup %7013  ;;  %5055 = vst [vmem:[%s8765_s14 + $0x2d0] sm:$0xff] %v7012_v23  ;;  %v4342_v29 = vpop.f32.mrb[193].mxu1 }
 0x47d   : > { %v5770_v9 = vpop.f32.mrb[1].mxu0  ;;  %5061 = vst [vmem:[%s8765_s14 + $0x300] sm:$0xff] %v7014_v15  ;;  %v5992_v16 = vadd.f32 %v4342_v29, %v9163_v42  ;;  %v4344_v62 = vpop.f32.mrb[194].mxu1  ;;  %7029 = vtanh.f32 %v5991_v21 }
 0x47e   : > { %v7016_v46 = vpop.eup %7015  ;;  %v5771_v45 = vadd.f32 %v5770_v9, %v5769_v48  ;;  %v5772_v60 = vpop.f32.mrb[2].mxu0  ;;  %v5993_v6 = vadd.f32 %v4344_v62, %v9159_v19 }
 0x47f   : > { %5062 = vst [vmem:[%s8765_s14 + $0x308] sm:$0xff] %v7016_v46  ;;  %v4346_v30 = vpop.f32.mrb[195].mxu1  ;;  %v5773_v43 = vpop.f32.mrb[3].mxu0  ;;  %7031 = vtanh.f32 %v5992_v16  ;;  %v4534_v46 = vadd.f32 %v9129_v14, %v9161_v36 }
 0x480   : > { %v4679_v55 = vadd.f32 %v5771_v45, %v4518_v39  ;;  %v5994_v34 = vadd.f32 %v4346_v30, %v9163_v42  ;;  %v5774_v31 = vadd.f32 %v5773_v43, %v5772_v60  ;;  %v7018_v20 = vpop.eup %7017  ;;  %7033 = vtanh.f32 %v5993_v6 }
 0x481   : > { %v7020_v12 = vpop.eup %7019  ;;  %5067 = vst [vmem:[%s8765_s14 + $0x330] sm:$0xff] %v7018_v20  ;;  %v4537_v60 = vadd.f32 %v9131_v3, %v9161_v36 }
 0x482   : > { %7035 = vtanh.f32 %v4679_v55  ;;  %v4682_v50 = vadd.f32 %v5774_v31, %v4521_v40  ;;  %v7022_v8 = vpop.eup %7021  ;;  %5068 = vst [vmem:[%s8765_s14 + $0x338] sm:$0xff] %v7020_v12  ;;  %v4350_v17 = vpop.f32.mrb[196].mxu1 }
 0x483   : > { %7037 = vtanh.f32 %v5994_v34  ;;  %v7024_v18 = vpop.eup %7023  ;;  %5074 = vst [vmem:[%s8765_s14 + $0x368] sm:$0xff] %v7022_v8  ;;  %v5775_v37 = vpop.f32.mrb[4].mxu0  ;;  %v5995_v63 = vadd.f32 %v4350_v17, %v9159_v19 }
 0x484   : > { %7039 = vtanh.f32 %v4682_v50  ;;  %v7026_v51 = vpop.eup %7025  ;;  %5069 = vst [vmem:[%s8765_s14 + $0x340] sm:$0xff] %v7024_v18  ;;  %v4352_v54 = vpop.f32.mrb[197].mxu1 }
 0x485   : > { %v5776_v27 = vpop.f32.mrb[5].mxu0  ;;  %5075 = vst [vmem:[%s8765_s14 + $0x370] sm:$0xff] %v7026_v51  ;;  %v5996_v10 = vadd.f32 %v4352_v54, %v9163_v42  ;;  %v4354_v58 = vpop.f32.mrb[198].mxu1  ;;  %7041 = vtanh.f32 %v5995_v63  ;;  %v4542_v54 = vadd.f32 %v9133_v41, %v9161_v36 }
 0x486   : > { %v7028_v22 = vpop.eup %7027  ;;  %v5777_v5 = vadd.f32 %v5776_v27, %v5775_v37  ;;  %v5778_v11 = vpop.f32.mrb[6].mxu0  ;;  %v5997_v7 = vadd.f32 %v4354_v58, %v9159_v19 }
 0x487   : > { %5076 = vst [vmem:[%s8765_s14 + $0x378] sm:$0xff] %v7028_v22  ;;  %v4356_v61 = vpop.f32.mrb[199].mxu1  ;;  %v5779_v35 = vpop.f32.mrb[7].mxu0  ;;  %7043 = vtanh.f32 %v5996_v10 }
 0x488   : > { %v4687_v13 = vadd.f32 %v5777_v5, %v4526_v49  ;;  %v5998_v59 = vadd.f32 %v4356_v61, %v9163_v42  ;;  %v5780_v25 = vadd.f32 %v5779_v35, %v5778_v11  ;;  %v7030_v32 = vpop.eup %7029  ;;  %7045 = vtanh.f32 %v5997_v7 }
 0x489   : > { %v7032_v52 = vpop.eup %7031  ;;  %5081 = vst [vmem:[%s8765_s14 + $0x3a0] sm:$0xff] %v7030_v32  ;;  %v4545_v5 = vadd.f32 %v9135_v28, %v9161_v36 }
 0x48a   : > { %7047 = vtanh.f32 %v4687_v13  ;;  %v4690_v1 = vadd.f32 %v5780_v25, %v4529_v2  ;;  %v7034_v33 = vpop.eup %7033  ;;  %5082 = vst [vmem:[%s8765_s14 + $0x3a8] sm:$0xff] %v7032_v52  ;;  %v4360_v23 = vpop.f32.mrb[200].mxu1 }
 0x48b   : > { %7049 = vtanh.f32 %v5998_v59  ;;  %5088 = vst [vmem:[%s8765_s14 + $0x3d8] sm:$0xff] %v7034_v33  ;;  %v5781_v57 = vpop.f32.mrb[8].mxu0  ;;  %v5999_v15 = vadd.f32 %v4360_v23, %v9159_v19  ;;  %v4362_v21 = vpop.f32.mrb[201].mxu1 }
 0x48c   : > { %v7036_v4 = vpop.eup %7035  ;;  %7051 = vtanh.f32 %v4690_v1  ;;  %v5782_v29 = vpop.f32.mrb[9].mxu0  ;;  %v6000_v39 = vadd.f32 %v4362_v21, %v9163_v42 }
 0x48d   : > { %v7038_v48 = vpop.eup %7037  ;;  %5083 = vst [vmem:[%s8765_s14 + $0x3b0] sm:$0xff] %v7036_v4  ;;  %v5783_v16 = vadd.f32 %v5782_v29, %v5781_v57  ;;  %v4364_v45 = vpop.f32.mrb[202].mxu1  ;;  %7053 = vtanh.f32 %v5999_v15 }
 0x48e   : > { %v7040_v9 = vpop.eup %7039  ;;  %5089 = vst [vmem:[%s8765_s14 + $0x3e0] sm:$0xff] %v7038_v48  ;;  %v5784_v62 = vpop.f32.mrb[10].mxu0  ;;  %v6001_v40 = vadd.f32 %v4364_v45, %v9159_v19  ;;  %7055 = vtanh.f32 %v6000_v39  ;;  %v4550_v48 = vadd.f32 %v9137_v0, %v9161_v36 }
 0x48f   : > { %5090 = vst [vmem:[%s8765_s14 + $0x3e8] sm:$0xff] %v7040_v9  ;;  %v4366_v6 = vpop.f32.mrb[203].mxu1  ;;  %v5785_v30 = vpop.f32.mrb[11].mxu0  ;;  %v4695_v14 = vadd.f32 %v5783_v16, %v4534_v46  ;;  %v4553_v46 = vadd.f32 %v9139_v24, %v9161_v36 }
 0x490   : > { %v6002_v43 = vadd.f32 %v4366_v6, %v9163_v42  ;;  %v5786_v55 = vadd.f32 %v5785_v30, %v5784_v62  ;;  %v7042_v34 = vpop.eup %7041  ;;  %7057 = vtanh.f32 %v6001_v40 }
 0x491   : > { %v7044_v31 = vpop.eup %7043  ;;  %5095 = vst [vmem:[%s8765_s14 + $0x410] sm:$0xff] %v7042_v34  ;;  %7059 = vtanh.f32 %v4695_v14 }
 0x492   : > { %v4698_v3 = vadd.f32 %v5786_v55, %v4537_v60  ;;  %v7046_v20 = vpop.eup %7045  ;;  %5096 = vst [vmem:[%s8765_s14 + $0x418] sm:$0xff] %v7044_v31  ;;  %7061 = vtanh.f32 %v6002_v43  ;;  %v4370_v50 = vpop.f32.mrb[204].mxu1 }
 0x493   : > { %5102 = vst [vmem:[%s8765_s14 + $0x448] sm:$0xff] %v7046_v20  ;;  %v5787_v8 = vpop.f32.mrb[12].mxu0  ;;  %v6003_v17 = vadd.f32 %v4370_v50, %v9159_v19  ;;  %v4372_v37 = vpop.f32.mrb[205].mxu1  ;;  %v4558_v50 = vadd.f32 %v9141_v53, %v9161_v36 }
 0x494   : > { %v7048_v12 = vpop.eup %7047  ;;  %7063 = vtanh.f32 %v4698_v3  ;;  %v5788_v51 = vpop.f32.mrb[13].mxu0  ;;  %v6004_v27 = vadd.f32 %v4372_v37, %v9163_v42 }
 0x495   : > { %v7050_v18 = vpop.eup %7049  ;;  %5097 = vst [vmem:[%s8765_s14 + $0x420] sm:$0xff] %v7048_v12  ;;  %v5789_v22 = vadd.f32 %v5788_v51, %v5787_v8  ;;  %v4374_v49 = vpop.f32.mrb[206].mxu1  ;;  %7065 = vtanh.f32 %v6003_v17  ;;  %v4561_v51 = vadd.f32 %v9143_v38, %v9161_v36 }
 0x496   : > { %v7052_v63 = vpop.eup %7051  ;;  %5103 = vst [vmem:[%s8765_s14 + $0x450] sm:$0xff] %v7050_v18  ;;  %v5790_v10 = vpop.f32.mrb[14].mxu0  ;;  %v6005_v58 = vadd.f32 %v4374_v49, %v9159_v19  ;;  %7067 = vtanh.f32 %v6004_v27 }
 0x497   : > { %5104 = vst [vmem:[%s8765_s14 + $0x458] sm:$0xff] %v7052_v63  ;;  %v4376_v11 = vpop.f32.mrb[207].mxu1  ;;  %v5791_v2 = vpop.f32.mrb[15].mxu0  ;;  %v4703_v41 = vadd.f32 %v5789_v22, %v4542_v54 }
 0x498   : > { %v6006_v7 = vadd.f32 %v4376_v11, %v9163_v42  ;;  %v5792_v61 = vadd.f32 %v5791_v2, %v5790_v10  ;;  %v7054_v35 = vpop.eup %7053  ;;  %7069 = vtanh.f32 %v6005_v58 }
 0x499   : > { %v7056_v13 = vpop.eup %7055  ;;  %5109 = vst [vmem:[%s8765_s14 + $0x480] sm:$0xff] %v7054_v35  ;;  %7071 = vtanh.f32 %v4703_v41 }
 0x49a   : > { %v4706_v28 = vadd.f32 %v5792_v61, %v4545_v5  ;;  %v7058_v59 = vpop.eup %7057  ;;  %5110 = vst [vmem:[%s8765_s14 + $0x488] sm:$0xff] %v7056_v13  ;;  %7073 = vtanh.f32 %v6006_v7  ;;  %v4380_v32 = vpop.f32.mrb[208].mxu1 }
 0x49b   : > { %v7060_v25 = vpop.eup %7059  ;;  %5116 = vst [vmem:[%s8765_s14 + $0x4b8] sm:$0xff] %v7058_v59  ;;  %v5793_v52 = vpop.f32.mrb[16].mxu0  ;;  %v6007_v33 = vadd.f32 %v4380_v32, %v9159_v19  ;;  %v4566_v59 = vadd.f32 %v9145_v26, %v9161_v36 }
 0x49c   : > { %7075 = vtanh.f32 %v4706_v28  ;;  %v7062_v1 = vpop.eup %7061  ;;  %5111 = vst [vmem:[%s8765_s14 + $0x490] sm:$0xff] %v7060_v25  ;;  %v4382_v4 = vpop.f32.mrb[209].mxu1 }
 0x49d   : > { %v5794_v23 = vpop.f32.mrb[17].mxu0  ;;  %5117 = vst [vmem:[%s8765_s14 + $0x4c0] sm:$0xff] %v7062_v1  ;;  %v6008_v15 = vadd.f32 %v4382_v4, %v9163_v42  ;;  %v4384_v29 = vpop.f32.mrb[210].mxu1  ;;  %7077 = vtanh.f32 %v6007_v33  ;;  %v4569_v33 = vadd.f32 %v9147_v44, %v9161_v36 }
 0x49e   : > { %v7064_v57 = vpop.eup %7063  ;;  %v5795_v21 = vadd.f32 %v5794_v23, %v5793_v52  ;;  %v5796_v9 = vpop.f32.mrb[18].mxu0  ;;  %v6009_v39 = vadd.f32 %v4384_v29, %v9159_v19 }
 0x49f   : > { %5118 = vst [vmem:[%s8765_s14 + $0x4c8] sm:$0xff] %v7064_v57  ;;  %v4386_v16 = vpop.f32.mrb[211].mxu1  ;;  %v5797_v45 = vpop.f32.mrb[19].mxu0  ;;  %7079 = vtanh.f32 %v6008_v15 }
 0x4a0   : > { %v4711_v0 = vadd.f32 %v5795_v21, %v4550_v48  ;;  %v6010_v62 = vadd.f32 %v4386_v16, %v9163_v42  ;;  %v5798_v60 = vadd.f32 %v5797_v45, %v5796_v9  ;;  %v7066_v40 = vpop.eup %7065  ;;  %7081 = vtanh.f32 %v6009_v39 }
 0x4a1   : > { %v7068_v6 = vpop.eup %7067  ;;  %5123 = vst [vmem:[%s8765_s14 + $0x4f0] sm:$0xff] %v7066_v40 }
 0x4a2   : > { %7083 = vtanh.f32 %v4711_v0  ;;  %v4714_v24 = vadd.f32 %v5798_v60, %v4553_v46  ;;  %v7070_v30 = vpop.eup %7069  ;;  %5124 = vst [vmem:[%s8765_s14 + $0x4f8] sm:$0xff] %v7068_v6  ;;  %v4390_v43 = vpop.f32.mrb[212].mxu1  ;;  %v4574_v6 = vadd.f32 %v9151_v56, %v9161_v36 }
 0x4a3   : > { %7085 = vtanh.f32 %v6010_v62  ;;  %v7072_v14 = vpop.eup %7071  ;;  %5130 = vst [vmem:[%s8765_s14 + $0x528] sm:$0xff] %v7070_v30  ;;  %v5799_v55 = vpop.f32.mrb[20].mxu0  ;;  %v6011_v31 = vadd.f32 %v4390_v43, %v9159_v19 }
 0x4a4   : > { %7087 = vtanh.f32 %v4714_v24  ;;  %v7074_v34 = vpop.eup %7073  ;;  %5125 = vst [vmem:[%s8765_s14 + $0x500] sm:$0xff] %v7072_v14  ;;  %v4392_v3 = vpop.f32.mrb[213].mxu1 }
 0x4a5   : > { %v5800_v20 = vpop.f32.mrb[21].mxu0  ;;  %5131 = vst [vmem:[%s8765_s14 + $0x530] sm:$0xff] %v7074_v34  ;;  %v6012_v8 = vadd.f32 %v4392_v3, %v9163_v42  ;;  %v4394_v17 = vpop.f32.mrb[214].mxu1  ;;  %7089 = vtanh.f32 %v6011_v31 }
 0x4a6   : > { %v7076_v12 = vpop.eup %7075  ;;  %v5801_v18 = vadd.f32 %v5800_v20, %v5799_v55  ;;  %v5802_v37 = vpop.f32.mrb[22].mxu0  ;;  %v6013_v63 = vadd.f32 %v4394_v17, %v9159_v19  ;;  %v4577_v55 = vadd.f32 %v9154_v47, %v9161_v36 }
 0x4a7   : > { %5132 = vst [vmem:[%s8765_s14 + $0x538] sm:$0xff] %v7076_v12  ;;  %v4396_v54 = vpop.f32.mrb[215].mxu1  ;;  %v5803_v27 = vpop.f32.mrb[23].mxu0  ;;  %7091 = vtanh.f32 %v6012_v8 }
 0x4a8   : > { %v4719_v53 = vadd.f32 %v5801_v18, %v4558_v50  ;;  %v6014_v22 = vadd.f32 %v4396_v54, %v9163_v42  ;;  %v5804_v49 = vadd.f32 %v5803_v27, %v5802_v37  ;;  %v7078_v10 = vpop.eup %7077  ;;  %7093 = vtanh.f32 %v6013_v63 }
 0x4a9   : > { %v7080_v5 = vpop.eup %7079  ;;  %5137 = vst [vmem:[%s8765_s14 + $0x560] sm:$0xff] %v7078_v10 }
 0x4aa   : > { %7095 = vtanh.f32 %v4719_v53  ;;  %v4722_v38 = vadd.f32 %v5804_v49, %v4561_v51  ;;  %v7082_v58 = vpop.eup %7081  ;;  %5138 = vst [vmem:[%s8765_s14 + $0x568] sm:$0xff] %v7080_v5  ;;  %v4400_v2 = vpop.f32.mrb[216].mxu1 }
 0x4ab   : > { %7097 = vtanh.f32 %v6014_v22  ;;  %5144 = vst [vmem:[%s8765_s14 + $0x598] sm:$0xff] %v7082_v58  ;;  %v5805_v41 = vpop.f32.mrb[24].mxu0  ;;  %v6015_v61 = vadd.f32 %v4400_v2, %v9159_v19  ;;  %v4402_v35 = vpop.f32.mrb[217].mxu1 }
 0x4ac   : > { %v7084_v11 = vpop.eup %7083  ;;  %7099 = vtanh.f32 %v4722_v38  ;;  %v5806_v13 = vpop.f32.mrb[25].mxu0  ;;  %v6016_v25 = vadd.f32 %v4402_v35, %v9163_v42 }
 0x4ad   : > { %v7086_v7 = vpop.eup %7085  ;;  %5139 = vst [vmem:[%s8765_s14 + $0x570] sm:$0xff] %v7084_v11  ;;  %v5807_v32 = vadd.f32 %v5806_v13, %v5805_v41  ;;  %v4404_v52 = vpop.f32.mrb[218].mxu1  ;;  %7101 = vtanh.f32 %v6015_v61 }
 0x4ae   : > { %v7088_v28 = vpop.eup %7087  ;;  %5145 = vst [vmem:[%s8765_s14 + $0x5a0] sm:$0xff] %v7086_v7  ;;  %v5808_v1 = vpop.f32.mrb[26].mxu0  ;;  %v6017_v4 = vadd.f32 %v4404_v52, %v9159_v19  ;;  %7103 = vtanh.f32 %v6016_v25 }
 0x4af   : > { %5146 = vst [vmem:[%s8765_s14 + $0x5a8] sm:$0xff] %v7088_v28  ;;  %v4406_v23 = vpop.f32.mrb[219].mxu1  ;;  %v5809_v57 = vpop.f32.mrb[27].mxu0  ;;  %v4727_v26 = vadd.f32 %v5807_v32, %v4566_v59 }
 0x4b0   : > { %v6018_v48 = vadd.f32 %v4406_v23, %v9163_v42  ;;  %v5810_v15 = vadd.f32 %v5809_v57, %v5808_v1  ;;  %v7090_v21 = vpop.eup %7089  ;;  %7105 = vtanh.f32 %v6017_v4 }
 0x4b1   : > { %v7092_v29 = vpop.eup %7091  ;;  %5151 = vst [vmem:[%s8765_s14 + $0x5d0] sm:$0xff] %v7090_v21  ;;  %7107 = vtanh.f32 %v4727_v26 }
 0x4b2   : > { %v4730_v44 = vadd.f32 %v5810_v15, %v4569_v33  ;;  %v7094_v9 = vpop.eup %7093  ;;  %5152 = vst [vmem:[%s8765_s14 + $0x5d8] sm:$0xff] %v7092_v29  ;;  %7109 = vtanh.f32 %v6018_v48  ;;  %v4410_v39 = vpop.f32.mrb[220].mxu1 }
 0x4b3   : > { %5158 = vst [vmem:[%s8765_s14 + $0x608] sm:$0xff] %v7094_v9  ;;  %v5811_v16 = vpop.f32.mrb[28].mxu0  ;;  %v6019_v0 = vadd.f32 %v4410_v39, %v9159_v19  ;;  %v4412_v62 = vpop.f32.mrb[221].mxu1 }
 0x4b4   : > { %v7096_v46 = vpop.eup %7095  ;;  %7111 = vtanh.f32 %v4730_v44  ;;  %v5812_v60 = vpop.f32.mrb[29].mxu0  ;;  %v6020_v24 = vadd.f32 %v4412_v62, %v9163_v42 }
 0x4b5   : > { %v7098_v45 = vpop.eup %7097  ;;  %5153 = vst [vmem:[%s8765_s14 + $0x5e0] sm:$0xff] %v7096_v46  ;;  %v5813_v30 = vadd.f32 %v5812_v60, %v5811_v16  ;;  %v4414_v14 = vpop.f32.mrb[222].mxu1  ;;  %7113 = vtanh.f32 %v6019_v0 }
 0x4b6   : > { %v7100_v40 = vpop.eup %7099  ;;  %5159 = vst [vmem:[%s8765_s14 + $0x610] sm:$0xff] %v7098_v45  ;;  %v5814_v43 = vpop.f32.mrb[30].mxu0  ;;  %v6021_v34 = vadd.f32 %v4414_v14, %v9159_v19  ;;  %7115 = vtanh.f32 %v6020_v24 }
 0x4b7   : > { %5160 = vst [vmem:[%s8765_s14 + $0x618] sm:$0xff] %v7100_v40  ;;  %v4416_v31 = vpop.f32.mrb[223].mxu1  ;;  %v5815_v3 = vpop.f32.mrb[31].mxu0  ;;  %v4735_v56 = vadd.f32 %v5813_v30, %v4574_v6 }
 0x4b8   : > { %v6022_v20 = vadd.f32 %v4416_v31, %v9163_v42  ;;  %v5816_v12 = vadd.f32 %v5815_v3, %v5814_v43  ;;  %v7102_v50 = vpop.eup %7101  ;;  %7117 = vtanh.f32 %v6021_v34 }
 0x4b9   : > { %v7104_v8 = vpop.eup %7103  ;;  %5165 = vst [vmem:[%s8765_s14 + $0x640] sm:$0xff] %v7102_v50  ;;  %7119 = vtanh.f32 %v4735_v56 }
 0x4ba   : > { %v4738_v47 = vadd.f32 %v5816_v12, %v4577_v55  ;;  %v7106_v19 = vpop.eup %7105  ;;  %5166 = vst [vmem:[%s8765_s14 + $0x648] sm:$0xff] %v7104_v8  ;;  %7121 = vtanh.f32 %v6022_v20 }
 0x4bb   : > { %v7108_v36 = vpop.eup %7107  ;;  %5172 = vst [vmem:[%s8765_s14 + $0x678] sm:$0xff] %v7106_v19 }
 0x4bc   : > { %7123 = vtanh.f32 %v4738_v47  ;;  %v7110_v42 = vpop.eup %7109  ;;  %5167 = vst [vmem:[%s8765_s14 + $0x650] sm:$0xff] %v7108_v36 }
 0x4bd   : > { %5173 = vst [vmem:[%s8765_s14 + $0x680] sm:$0xff] %v7110_v42 }
 0x4be   : > { %v7112_v18 = vpop.eup %7111 }
 0x4bf   : > { %5174 = vst [vmem:[%s8765_s14 + $0x688] sm:$0xff] %v7112_v18  ;;  %v7114_v17 = vpop.eup %7113 }
 0x4c0   : > { %v7116_v37 = vpop.eup %7115  ;;  %5179 = vst [vmem:[%s8765_s14 + $0x6b0] sm:$0xff] %v7114_v17 }
 0x4c1   : > { %5180 = vst [vmem:[%s8765_s14 + $0x6b8] sm:$0xff] %v7116_v37 }
 0x4c2   : > { %v7118_v51 = vpop.eup %7117 }
 0x4c3   : > { %v7120_v63 = vpop.eup %7119  ;;  %5186 = vst [vmem:[%s8765_s14 + $0x6e8] sm:$0xff] %v7118_v51 }
 0x4c4   : > { %v7122_v54 = vpop.eup %7121  ;;  %5181 = vst [vmem:[%s8765_s14 + $0x6c0] sm:$0xff] %v7120_v63 }
 0x4c5   : > { %5187 = vst [vmem:[%s8765_s14 + $0x6f0] sm:$0xff] %v7122_v54 }
 0x4c6   : > { %v7124_v27 = vpop.eup %7123 }
 0x4c7   : > { %5188 = vst [vmem:[%s8765_s14 + $0x6f8] sm:$0xff] %v7124_v27 }
 0x4c8 PF: > { %s17_s24 = sadd.s32 1, %s7132_s24  }
 0x4c9   : > { %p14_p4 = scmp.ge.s32.totalorder %s17_s24, 4  }
 0x4cb   :  { %16 = sbr.rel (!%p14_p4) target bundleno = 1 (0x1), region = 78 }

</bundles_post_ra>
